<compile_context>
chip_gen: v7x
topology: tpu7x:2x2x1
jax: 0.10.0
libtpu: 0.0.40
codegen_flags: <defaults>
</compile_context>

<pallas_src>
import functools
import re

import jax
import jax.numpy as jnp
from jax.experimental import pallas as pl
from jax.experimental.pallas import tpu as pltpu


def _round_up(v, m):
    return -(-v // m) * m


def _tpu_generation():
    try:
        kind = jax.devices()[0].device_kind.lower()
    except Exception:
        return 0
    m = re.search(r"(\d+)", kind)
    return int(m.group(1)) if m else 0


def _rnn_fc_kernel(x_ref,        # (T, Bb, D)    time-major input chunk
                   wih0_ref,     # (D, Hp)       layer-0 input weights (transposed)
                   whh0_ref,     # (Hp, Hp)      layer-0 recurrent weights (transposed)
                   b0_ref,       # (1, Hp)       layer-0 combined bias (b_ih + b_hh), f32
                   wih_ref,      # (L-1, Hp, Hp) upper-layer input weights
                   whh_ref,      # (L-1, Hp, Hp) upper-layer recurrent weights
                   b_ref,        # (L-1, 1, Hp)  upper-layer combined biases, f32
                   wfc_ref,      # (Hp, O)       fc weight (transposed)
                   bfc_ref,      # (1, O)        fc bias, f32
                   out_ref,      # (Bb, O)
                   h_state,      # VMEM (L, Bb, Hp) f32   hidden state (persists over chunks)
                   pre,          # VMEM (T, Bb, Hp)       batched pre-activation staging
                   act,          # VMEM (T|1, Bb, Hp)     current layer's chunk outputs
                   *, num_upper_layers, seq_len, ragged):
    T, Bb, D = x_ref.shape
    Hp = whh0_ref.shape[0]
    c = pl.program_id(1)
    wdt = whh0_ref.dtype          # matmul operand dtype (f32 or bf16)

    @pl.when(c == 0)
    def _():
        h_state[...] = jnp.zeros_like(h_state)

    t0 = c * T                    # global time offset of this chunk

    def project(inp2d, wih, b):
        # Hoisted, batched (T*Bb, K) @ (K, Hp) input projection for the whole
        # chunk; written straight to VMEM so the unrolled recurrence never
        # holds a (T*Bb, Hp) value live in vregs.
        pre[...] = (jnp.dot(inp2d.astype(wdt), wih,
                            preferred_element_type=jnp.float32)
                    + b).reshape(T, Bb, Hp).astype(pre.dtype)

    def recur(layer_idx, whh, store_act):
        # Serial critical path: only h @ W_hh per step.
        # TODO(synk): pltpu.matmul_push_rhs/acc_lhs/pop to keep W_hh resident
        #             in the MXU weight registers across the unrolled loop.
        h = h_state[layer_idx]
        for t in range(T):        # static unroll (T capped small by wrapper)
            h_new = jnp.tanh(pre[t]
                             + jnp.dot(h.astype(wdt), whh,
                                       preferred_element_type=jnp.float32))
            if ragged:
                # Padded timesteps (last chunk only): hold the hidden state.
                h_new = jnp.where(t0 + t < seq_len, h_new, h)
            h = h_new
            if store_act:
                act[t] = h.astype(act.dtype)
        h_state[layer_idx] = h

    # ---------- layer 0 ----------
    project(x_ref[...].reshape(T * Bb, D), wih0_ref[...], b0_ref[...])
    recur(0, whh0_ref[...], num_upper_layers > 0)

    # ---------- layers 1 .. L-1 ----------
    for l in range(num_upper_layers):
        project(act[...].reshape(T * Bb, Hp), wih_ref[l], b_ref[l])
        recur(l + 1, whh_ref[l], l < num_upper_layers - 1)

    # ---------- final linear head, emitted once on the last chunk ----------
    @pl.when(c == pl.num_programs(1) - 1)
    def _():
        last = h_state[num_upper_layers]
        out_ref[...] = (jnp.dot(last.astype(wfc_ref.dtype), wfc_ref[...],
                                preferred_element_type=jnp.float32)
                        + bfc_ref[...]).astype(out_ref.dtype)


def rnn_model_forward(x, params, *, time_chunk=None, weight_dtype=None,
                      batch_blocks=None):
    """x: (batch, seq, input_dim) float32 (PyTorch batch_first convention)."""
    wih0, whh0, b0, wih_rest, whh_rest, b_rest, wfc, bfc = params
    B, S, D = x.shape
    H = whh0.shape[0]
    Lm1 = int(wih_rest.shape[0])
    L = Lm1 + 1
    O = wfc.shape[1]

    gen = _tpu_generation()
    if weight_dtype is None:
        # v6e/v7x MXU is native bf16 (f32 operands decompose into extra passes).
        weight_dtype = jnp.bfloat16 if gen >= 6 else jnp.float32
    bf16 = (weight_dtype == jnp.bfloat16)
    sub = 16 if bf16 else 8           # sublane tile for the activation dtype
    act_itemsize = 2 if bf16 else 4

    # ---- batch padding + optional batch-block split (uses both v7x cores) ----
    if batch_blocks is None:
        batch_blocks = 2 if (gen >= 7 and B > sub) else 1
    batch_blocks = max(1, int(batch_blocks))
    Bp = _round_up(max(B, sub), sub * batch_blocks)
    Bb = Bp // batch_blocks
    if Bp != B:
        x = jnp.pad(x, ((0, Bp - B), (0, 0), (0, 0)))

    # ---- lane-pad hidden dim to a multiple of 128 (dense stores, full MXU cols) ----
    Hp = _round_up(H, 128)
    dH = Hp - H

    def pad_h_last(a):
        return a if dH == 0 else jnp.pad(a, [(0, 0)] * (a.ndim - 1) + [(0, dH)])

    wih0_p = pad_h_last(wih0).astype(weight_dtype)                       # (D, Hp)
    whh0_p = (jnp.pad(whh0, ((0, dH), (0, dH))) if dH else whh0).astype(weight_dtype)
    b0_p = pad_h_last(b0)                                                # (1, Hp) f32
    wfc_p = (jnp.pad(wfc, ((0, dH), (0, 0))) if dH else wfc).astype(weight_dtype)
    bfc_p = bfc                                                          # (1, O) f32

    if Lm1 > 0:
        wih_r = (jnp.pad(wih_rest, ((0, 0), (0, dH), (0, dH))) if dH
                 else wih_rest).astype(weight_dtype)
        whh_r = (jnp.pad(whh_rest, ((0, 0), (0, dH), (0, dH))) if dH
                 else whh_rest).astype(weight_dtype)
        b_r = pad_h_last(b_rest)                                         # (Lm1, 1, Hp)
    else:
        # Never-read placeholders (the upper-layer loop is empty).
        wih_r = jnp.zeros((1, 8, 128), weight_dtype)
        whh_r = jnp.zeros((1, 8, 128), weight_dtype)
        b_r = jnp.zeros((1, 1, 128), jnp.float32)

    # ---- time chunking: fill an MXU pass (T*Bb rows); never collapse to T=1 ----
    target_rows = 256 if gen >= 6 else 128
    if time_chunk is None:
        T = max(8, -(-target_rows // Bb))
    else:
        T = int(time_chunk)
    T = max(1, min(T, S, 64))          # cap: the recurrence is fully unrolled
    num_chunks = -(-S // T)
    S_pad = num_chunks * T
    ragged = (S_pad != S)

    # Time-major for cheap leading-dim time indexing inside the kernel.
    # TODO(synk): fuse this transpose upstream for very long sequences.
    x_tm = jnp.transpose(x, (1, 0, 2))           # (S, Bp, D)
    if ragged:
        x_tm = jnp.pad(x_tm, ((0, S_pad - S), (0, 0), (0, 0)))

    act_T = T if Lm1 > 0 else 1
    kernel = functools.partial(_rnn_fc_kernel, num_upper_layers=Lm1,
                               seq_len=S, ragged=ragged)

    weight_arrays = (wih0_p, whh0_p, b0_p, wih_r, whh_r, b_r, wfc_p, bfc_p)
    wbytes = sum(int(a.size) * a.dtype.itemsize for a in weight_arrays)

    def make_call(single_buffer_weights):
        def full_spec(a):
            kw = {}
            if single_buffer_weights:
                # Constant index map => the block never changes; double
                # buffering resident weights is pure VMEM waste.
                kw["pipeline_mode"] = pl.Buffered(1)
            nd = a.ndim
            return pl.BlockSpec(a.shape, lambda b, c, _nd=nd: (0,) * _nd, **kw)

        vmem_bytes = (
            2 * T * Bb * D * 4                           # double-buffered x chunk
            + (1 if single_buffer_weights else 2) * wbytes
            + L * Bb * Hp * 4                            # persistent hidden state
            + (T + act_T) * Bb * Hp * act_itemsize       # pre + act staging
            + 2 * Bb * O * 4)                            # output block
        cap = (56 << 20) if gen >= 7 else (100 << 20)
        vmem_limit = int(min(cap, max(32 << 20, int(1.5 * vmem_bytes) + (4 << 20))))

        return pl.pallas_call(
            kernel,
            out_shape=jax.ShapeDtypeStruct((Bp, O), jnp.float32),
            grid_spec=pltpu.PrefetchScalarGridSpec(
                num_scalar_prefetch=0,
                grid=(batch_blocks, num_chunks),
                in_specs=[
                    pl.BlockSpec((T, Bb, D), lambda b, c: (c, b, 0)),  # streamed x chunk
                    full_spec(wih0_p), full_spec(whh0_p), full_spec(b0_p),
                    full_spec(wih_r), full_spec(whh_r), full_spec(b_r),
                    full_spec(wfc_p), full_spec(bfc_p),
                ],
                out_specs=pl.BlockSpec((Bb, O), lambda b, c: (b, 0)),
                scratch_shapes=[
                    pltpu.VMEM((L, Bb, Hp), jnp.float32),      # hidden state
                    pltpu.VMEM((T, Bb, Hp), weight_dtype),     # pre-activation staging
                    pltpu.VMEM((act_T, Bb, Hp), weight_dtype), # layer-output staging
                ],
            ),
            compiler_params=pltpu.CompilerParams(
                dimension_semantics=("parallel", "arbitrary"),
                vmem_limit_bytes=vmem_limit,
            ),
        )

    args = (x_tm, wih0_p, whh0_p, b0_p, wih_r, whh_r, b_r, wfc_p, bfc_p)
    try:
        out = jax.block_until_ready(make_call(True)(*args))
    except Exception:
        # pl.Buffered(1) unsupported in this jax build: fall back to default
        # (double-buffered) weight blocks.
        out = jax.block_until_ready(make_call(False)(*args))

    return out[:B]


def init_params(key, input_dim, hidden_dim, layer_dim, output_dim):
    """Deterministic init matching PyTorch shapes; weights stored pre-transposed."""
    ks = jax.random.split(key, 8)
    s = 1.0 / jnp.sqrt(hidden_dim)

    wih0 = jax.random.uniform(ks[0], (input_dim, hidden_dim), jnp.float32, -s, s)
    whh0 = jax.random.uniform(ks[1], (hidden_dim, hidden_dim), jnp.float32, -s, s)
    b0 = (jax.random.uniform(ks[2], (1, hidden_dim), jnp.float32, -s, s)
          + jax.random.uniform(ks[3], (1, hidden_dim), jnp.float32, -s, s))

    Lm1 = layer_dim - 1
    wih_rest = jax.random.uniform(ks[4], (Lm1, hidden_dim, hidden_dim), jnp.float32, -s, s)
    whh_rest = jax.random.uniform(ks[5], (Lm1, hidden_dim, hidden_dim), jnp.float32, -s, s)
    b_rest = (jax.random.uniform(ks[6], (Lm1, 1, hidden_dim), jnp.float32, -s, s)
              + jax.random.uniform(ks[7], (Lm1, 1, hidden_dim), jnp.float32, -s, s))

    kfc_w, kfc_b = jax.random.split(jax.random.fold_in(key, 123))
    sf = 1.0 / jnp.sqrt(hidden_dim)
    wfc = jax.random.uniform(kfc_w, (hidden_dim, output_dim), jnp.float32, -sf, sf)
    bfc = jax.random.uniform(kfc_b, (1, output_dim), jnp.float32, -sf, sf)

    return (wih0, whh0, b0, wih_rest, whh_rest, b_rest, wfc, bfc)


def _reference_forward(x, params):
    """Pure-JAX reference (same math as the kernel) for correctness check."""
    wih0, whh0, b0, wih_rest, whh_rest, b_rest, wfc, bfc = params
    B, S, D = x.shape
    H = whh0.shape[0]
    L = wih_rest.shape[0] + 1
    h = [jnp.zeros((B, H), jnp.float32) for _ in range(L)]
    for t in range(S):
        x_t = x[:, t, :]
        h[0] = jnp.tanh((x_t @ wih0 + b0) + h[0] @ whh0)
        inp = h[0]
        for l in range(L - 1):
            h[l + 1] = jnp.tanh((inp @ wih_rest[l] + b_rest[l]) + h[l + 1] @ whh_rest[l])
            inp = h[l + 1]
    return h[L - 1] @ wfc + bfc


if __name__ == "__main__":
    batch, seq, input_dim = 2, 8, 16
    hidden_dim, layer_dim, output_dim = 32, 2, 4

    key = jax.random.PRNGKey(0)
    k_x, k_p, k_x2 = jax.random.split(key, 3)
    x = jax.random.normal(k_x, (batch, seq, input_dim), dtype=jnp.float32)
    params = init_params(k_p, input_dim, hidden_dim, layer_dim, output_dim)
    ref = _reference_forward(x, params)

    # 1) f32 operands, auto chunking — tight correctness check.
    out = jax.block_until_ready(rnn_model_forward(x, params, weight_dtype=jnp.float32))
    assert out.shape == (batch, output_dim)
    assert jnp.allclose(out, ref, atol=1e-4, rtol=1e-4), \
        float(jnp.max(jnp.abs(out - ref)))

    # 2) Ragged sequence + multi-chunk streaming (S not divisible by T): the
    #    chunk size is kept and the tail is masked in-kernel.
    seq2 = 11
    x2 = jax.random.normal(k_x2, (batch, seq2, input_dim), dtype=jnp.float32)
    ref2 = _reference_forward(x2, params)
    out2 = jax.block_until_ready(
        rnn_model_forward(x2, params, time_chunk=4, weight_dtype=jnp.float32))
    assert jnp.allclose(out2, ref2, atol=1e-4, rtol=1e-4), \
        float(jnp.max(jnp.abs(out2 - ref2)))

    # 3) Hardware-default operand dtype (bf16 on v6e/v7x) — tolerance gated
    #    for reduced-precision matmul operands.
    out3 = jax.block_until_ready(rnn_model_forward(x, params))
    assert out3.shape == (batch, output_dim)
    assert jnp.allclose(out3, ref, atol=1e-1, rtol=1e-1), \
        float(jnp.max(jnp.abs(out3 - ref)))

    print("KERNEL_OK")
</pallas_src>

<mosaic_0001>
module attributes {stable_mosaic.version = 11 : i64} {
  func.func @_rnn_fc_kernel(%arg0: i32, %arg1: i32, %arg2: memref<8x8x16xf32, #tpu.memory_space<vmem>>, %arg3: memref<16x128xf32, #tpu.memory_space<vmem>>, %arg4: memref<128x128xf32, #tpu.memory_space<vmem>>, %arg5: memref<1x128xf32, #tpu.memory_space<vmem>>, %arg6: memref<1x128x128xf32, #tpu.memory_space<vmem>>, %arg7: memref<1x128x128xf32, #tpu.memory_space<vmem>>, %arg8: memref<1x1x128xf32, #tpu.memory_space<vmem>>, %arg9: memref<128x4xf32, #tpu.memory_space<vmem>>, %arg10: memref<1x4xf32, #tpu.memory_space<vmem>>, %arg11: memref<8x4xf32, #tpu.memory_space<vmem>>, %arg12: memref<2x8x128xf32, #tpu.memory_space<vmem>>, %arg13: memref<8x8x128xf32, #tpu.memory_space<vmem>>, %arg14: memref<8x8x128xf32, #tpu.memory_space<vmem>>) attributes {dimension_semantics = [#tpu.dimension_semantics<parallel>, #tpu.dimension_semantics<arbitrary>], iteration_bounds = array<i64: 1, 1>, scalar_prefetch = 0 : i64, scratch_operands = 3 : i64, tpu.core_type = #tpu.core_type<tc>, window_params = [{transform_indices = @transform_0, window_bounds = array<i64: 8, 8, 16>}, {pipeline_mode = #tpu.pipeline_mode<synchronous>, transform_indices = @transform_1, window_bounds = array<i64: 16, 128>}, {pipeline_mode = #tpu.pipeline_mode<synchronous>, transform_indices = @transform_2, window_bounds = array<i64: 128, 128>}, {pipeline_mode = #tpu.pipeline_mode<synchronous>, transform_indices = @transform_3, window_bounds = array<i64: 1, 128>}, {pipeline_mode = #tpu.pipeline_mode<synchronous>, transform_indices = @transform_4, window_bounds = array<i64: 1, 128, 128>}, {pipeline_mode = #tpu.pipeline_mode<synchronous>, transform_indices = @transform_5, window_bounds = array<i64: 1, 128, 128>}, {pipeline_mode = #tpu.pipeline_mode<synchronous>, transform_indices = @transform_6, window_bounds = array<i64: 1, 1, 128>}, {pipeline_mode = #tpu.pipeline_mode<synchronous>, transform_indices = @transform_7, window_bounds = array<i64: 128, 4>}, {pipeline_mode = #tpu.pipeline_mode<synchronous>, transform_indices = @transform_8, window_bounds = array<i64: 1, 4>}, {transform_indices = @transform_9, window_bounds = array<i64: 8, 4>}]} {
    %c0_i32 = arith.constant 0 : i32
    %0 = arith.cmpi eq, %arg1, %c0_i32 : i32
    %1 = arith.extui %0 : i1 to i32
    %c0_i32_0 = arith.constant 0 : i32
    %2 = arith.cmpi ne, %1, %c0_i32_0 : i32
    scf.if %2 {
      %cst_123 = arith.constant 0.000000e+00 : f32
      %143 = vector.broadcast %cst_123 : f32 to vector<2x8x128xf32>
      %c0_124 = arith.constant 0 : index
      %c0_125 = arith.constant 0 : index
      %c0_126 = arith.constant 0 : index
      %144 = vector.load %arg12[%c0_124, %c0_125, %c0_126] : memref<2x8x128xf32, #tpu.memory_space<vmem>>, vector<2x8x128xf32>
      tpu.vector_store %arg12[%c0_124, %c0_125, %c0_126], %143 {strides = array<i32>} : memref<2x8x128xf32, #tpu.memory_space<vmem>>, vector<2x8x128xf32>,
    } else {
    }
    %c0 = arith.constant 0 : index
    %c0_1 = arith.constant 0 : index
    %c0_2 = arith.constant 0 : index
    %3 = vector.load %arg2[%c0, %c0_1, %c0_2] : memref<8x8x16xf32, #tpu.memory_space<vmem>>, vector<8x8x16xf32>
    %4 = vector.shape_cast %3 : vector<8x8x16xf32> to vector<64x16xf32>
    %c0_3 = arith.constant 0 : index
    %c0_4 = arith.constant 0 : index
    %5 = vector.load %arg3[%c0_3, %c0_4] : memref<16x128xf32, #tpu.memory_space<vmem>>, vector<16x128xf32>
    %c0_5 = arith.constant 0 : index
    %c0_6 = arith.constant 0 : index
    %6 = vector.load %arg5[%c0_5, %c0_6] : memref<1x128xf32, #tpu.memory_space<vmem>>, vector<1x128xf32>
    %cst = arith.constant dense<0.000000e+00> : vector<64x128xf32>
    %7 = tpu.matmul %4, %5, %cst {dimension_numbers = #tpu.dot_dimension_numbers<[1], [0], [0], [1], [0, 0, 1, 1], [], []>} : vector<64x16xf32>, vector<16x128xf32>, vector<64x128xf32> -> vector<64x128xf32>
    %8 = vector.broadcast %6 : vector<1x128xf32> to vector<64x128xf32>
    %9 = arith.addf %7, %8 : vector<64x128xf32>
    %10 = vector.shape_cast %9 : vector<64x128xf32> to vector<8x8x128xf32>
    %c0_7 = arith.constant 0 : index
    %c0_8 = arith.constant 0 : index
    %c0_9 = arith.constant 0 : index
    %11 = vector.load %arg13[%c0_7, %c0_8, %c0_9] : memref<8x8x128xf32, #tpu.memory_space<vmem>>, vector<8x8x128xf32>
    tpu.vector_store %arg13[%c0_7, %c0_8, %c0_9], %10 {strides = array<i32>} : memref<8x8x128xf32, #tpu.memory_space<vmem>>, vector<8x8x128xf32>,
    %c0_10 = arith.constant 0 : index
    %c0_11 = arith.constant 0 : index
    %12 = vector.load %arg4[%c0_10, %c0_11] : memref<128x128xf32, #tpu.memory_space<vmem>>, vector<128x128xf32>
    %c0_12 = arith.constant 0 : index
    %c0_13 = arith.constant 0 : index
    %c0_14 = arith.constant 0 : index
    %13 = vector.load %arg12[%c0_12, %c0_13, %c0_14] : memref<2x8x128xf32, #tpu.memory_space<vmem>>, vector<1x8x128xf32>
    %14 = vector.shape_cast %13 : vector<1x8x128xf32> to vector<8x128xf32>
    %c0_15 = arith.constant 0 : index
    %c0_16 = arith.constant 0 : index
    %c0_17 = arith.constant 0 : index
    %15 = vector.load %arg13[%c0_15, %c0_16, %c0_17] : memref<8x8x128xf32, #tpu.memory_space<vmem>>, vector<1x8x128xf32>
    %16 = vector.shape_cast %15 : vector<1x8x128xf32> to vector<8x128xf32>
    %cst_18 = arith.constant dense<0.000000e+00> : vector<8x128xf32>
    %17 = tpu.matmul %14, %12, %cst_18 {dimension_numbers = #tpu.dot_dimension_numbers<[1], [0], [0], [1], [0, 0, 1, 1], [], []>} : vector<8x128xf32>, vector<128x128xf32>, vector<8x128xf32> -> vector<8x128xf32>
    %18 = arith.addf %16, %17 : vector<8x128xf32>
    %19 = math.tanh %18 : vector<8x128xf32>
    %c0_19 = arith.constant 0 : index
    %c0_20 = arith.constant 0 : index
    %c0_21 = arith.constant 0 : index
    %20 = vector.load %arg14[%c0_19, %c0_20, %c0_21] : memref<8x8x128xf32, #tpu.memory_space<vmem>>, vector<1x8x128xf32>
    %21 = vector.shape_cast %20 : vector<1x8x128xf32> to vector<8x128xf32>
    %22 = vector.shape_cast %19 : vector<8x128xf32> to vector<1x8x128xf32>
    tpu.vector_store %arg14[%c0_19, %c0_20, %c0_21], %22 {strides = array<i32>} : memref<8x8x128xf32, #tpu.memory_space<vmem>>, vector<1x8x128xf32>,
    %c1 = arith.constant 1 : index
    %c0_22 = arith.constant 0 : index
    %c0_23 = arith.constant 0 : index
    %23 = vector.load %arg13[%c1, %c0_22, %c0_23] : memref<8x8x128xf32, #tpu.memory_space<vmem>>, vector<1x8x128xf32>
    %24 = vector.shape_cast %23 : vector<1x8x128xf32> to vector<8x128xf32>
    %cst_24 = arith.constant dense<0.000000e+00> : vector<8x128xf32>
    %25 = tpu.matmul %19, %12, %cst_24 {dimension_numbers = #tpu.dot_dimension_numbers<[1], [0], [0], [1], [0, 0, 1, 1], [], []>} : vector<8x128xf32>, vector<128x128xf32>, vector<8x128xf32> -> vector<8x128xf32>
    %26 = arith.addf %24, %25 : vector<8x128xf32>
    %27 = math.tanh %26 : vector<8x128xf32>
    %c1_25 = arith.constant 1 : index
    %c0_26 = arith.constant 0 : index
    %c0_27 = arith.constant 0 : index
    %28 = vector.load %arg14[%c1_25, %c0_26, %c0_27] : memref<8x8x128xf32, #tpu.memory_space<vmem>>, vector<1x8x128xf32>
    %29 = vector.shape_cast %28 : vector<1x8x128xf32> to vector<8x128xf32>
    %30 = vector.shape_cast %27 : vector<8x128xf32> to vector<1x8x128xf32>
    tpu.vector_store %arg14[%c1_25, %c0_26, %c0_27], %30 {strides = array<i32>} : memref<8x8x128xf32, #tpu.memory_space<vmem>>, vector<1x8x128xf32>,
    %c2 = arith.constant 2 : index
    %c0_28 = arith.constant 0 : index
    %c0_29 = arith.constant 0 : index
    %31 = vector.load %arg13[%c2, %c0_28, %c0_29] : memref<8x8x128xf32, #tpu.memory_space<vmem>>, vector<1x8x128xf32>
    %32 = vector.shape_cast %31 : vector<1x8x128xf32> to vector<8x128xf32>
    %cst_30 = arith.constant dense<0.000000e+00> : vector<8x128xf32>
    %33 = tpu.matmul %27, %12, %cst_30 {dimension_numbers = #tpu.dot_dimension_numbers<[1], [0], [0], [1], [0, 0, 1, 1], [], []>} : vector<8x128xf32>, vector<128x128xf32>, vector<8x128xf32> -> vector<8x128xf32>
    %34 = arith.addf %32, %33 : vector<8x128xf32>
    %35 = math.tanh %34 : vector<8x128xf32>
    %c2_31 = arith.constant 2 : index
    %c0_32 = arith.constant 0 : index
    %c0_33 = arith.constant 0 : index
    %36 = vector.load %arg14[%c2_31, %c0_32, %c0_33] : memref<8x8x128xf32, #tpu.memory_space<vmem>>, vector<1x8x128xf32>
    %37 = vector.shape_cast %36 : vector<1x8x128xf32> to vector<8x128xf32>
    %38 = vector.shape_cast %35 : vector<8x128xf32> to vector<1x8x128xf32>
    tpu.vector_store %arg14[%c2_31, %c0_32, %c0_33], %38 {strides = array<i32>} : memref<8x8x128xf32, #tpu.memory_space<vmem>>, vector<1x8x128xf32>,
    %c3 = arith.constant 3 : index
    %c0_34 = arith.constant 0 : index
    %c0_35 = arith.constant 0 : index
    %39 = vector.load %arg13[%c3, %c0_34, %c0_35] : memref<8x8x128xf32, #tpu.memory_space<vmem>>, vector<1x8x128xf32>
    %40 = vector.shape_cast %39 : vector<1x8x128xf32> to vector<8x128xf32>
    %cst_36 = arith.constant dense<0.000000e+00> : vector<8x128xf32>
    %41 = tpu.matmul %35, %12, %cst_36 {dimension_numbers = #tpu.dot_dimension_numbers<[1], [0], [0], [1], [0, 0, 1, 1], [], []>} : vector<8x128xf32>, vector<128x128xf32>, vector<8x128xf32> -> vector<8x128xf32>
    %42 = arith.addf %40, %41 : vector<8x128xf32>
    %43 = math.tanh %42 : vector<8x128xf32>
    %c3_37 = arith.constant 3 : index
    %c0_38 = arith.constant 0 : index
    %c0_39 = arith.constant 0 : index
    %44 = vector.load %arg14[%c3_37, %c0_38, %c0_39] : memref<8x8x128xf32, #tpu.memory_space<vmem>>, vector<1x8x128xf32>
    %45 = vector.shape_cast %44 : vector<1x8x128xf32> to vector<8x128xf32>
    %46 = vector.shape_cast %43 : vector<8x128xf32> to vector<1x8x128xf32>
    tpu.vector_store %arg14[%c3_37, %c0_38, %c0_39], %46 {strides = array<i32>} : memref<8x8x128xf32, #tpu.memory_space<vmem>>, vector<1x8x128xf32>,
    %c4 = arith.constant 4 : index
    %c0_40 = arith.constant 0 : index
    %c0_41 = arith.constant 0 : index
    %47 = vector.load %arg13[%c4, %c0_40, %c0_41] : memref<8x8x128xf32, #tpu.memory_space<vmem>>, vector<1x8x128xf32>
    %48 = vector.shape_cast %47 : vector<1x8x128xf32> to vector<8x128xf32>
    %cst_42 = arith.constant dense<0.000000e+00> : vector<8x128xf32>
    %49 = tpu.matmul %43, %12, %cst_42 {dimension_numbers = #tpu.dot_dimension_numbers<[1], [0], [0], [1], [0, 0, 1, 1], [], []>} : vector<8x128xf32>, vector<128x128xf32>, vector<8x128xf32> -> vector<8x128xf32>
    %50 = arith.addf %48, %49 : vector<8x128xf32>
    %51 = math.tanh %50 : vector<8x128xf32>
    %c4_43 = arith.constant 4 : index
    %c0_44 = arith.constant 0 : index
    %c0_45 = arith.constant 0 : index
    %52 = vector.load %arg14[%c4_43, %c0_44, %c0_45] : memref<8x8x128xf32, #tpu.memory_space<vmem>>, vector<1x8x128xf32>
    %53 = vector.shape_cast %52 : vector<1x8x128xf32> to vector<8x128xf32>
    %54 = vector.shape_cast %51 : vector<8x128xf32> to vector<1x8x128xf32>
    tpu.vector_store %arg14[%c4_43, %c0_44, %c0_45], %54 {strides = array<i32>} : memref<8x8x128xf32, #tpu.memory_space<vmem>>, vector<1x8x128xf32>,
    %c5 = arith.constant 5 : index
    %c0_46 = arith.constant 0 : index
    %c0_47 = arith.constant 0 : index
    %55 = vector.load %arg13[%c5, %c0_46, %c0_47] : memref<8x8x128xf32, #tpu.memory_space<vmem>>, vector<1x8x128xf32>
    %56 = vector.shape_cast %55 : vector<1x8x128xf32> to vector<8x128xf32>
    %cst_48 = arith.constant dense<0.000000e+00> : vector<8x128xf32>
    %57 = tpu.matmul %51, %12, %cst_48 {dimension_numbers = #tpu.dot_dimension_numbers<[1], [0], [0], [1], [0, 0, 1, 1], [], []>} : vector<8x128xf32>, vector<128x128xf32>, vector<8x128xf32> -> vector<8x128xf32>
    %58 = arith.addf %56, %57 : vector<8x128xf32>
    %59 = math.tanh %58 : vector<8x128xf32>
    %c5_49 = arith.constant 5 : index
    %c0_50 = arith.constant 0 : index
    %c0_51 = arith.constant 0 : index
    %60 = vector.load %arg14[%c5_49, %c0_50, %c0_51] : memref<8x8x128xf32, #tpu.memory_space<vmem>>, vector<1x8x128xf32>
    %61 = vector.shape_cast %60 : vector<1x8x128xf32> to vector<8x128xf32>
    %62 = vector.shape_cast %59 : vector<8x128xf32> to vector<1x8x128xf32>
    tpu.vector_store %arg14[%c5_49, %c0_50, %c0_51], %62 {strides = array<i32>} : memref<8x8x128xf32, #tpu.memory_space<vmem>>, vector<1x8x128xf32>,
    %c6 = arith.constant 6 : index
    %c0_52 = arith.constant 0 : index
    %c0_53 = arith.constant 0 : index
    %63 = vector.load %arg13[%c6, %c0_52, %c0_53] : memref<8x8x128xf32, #tpu.memory_space<vmem>>, vector<1x8x128xf32>
    %64 = vector.shape_cast %63 : vector<1x8x128xf32> to vector<8x128xf32>
    %cst_54 = arith.constant dense<0.000000e+00> : vector<8x128xf32>
    %65 = tpu.matmul %59, %12, %cst_54 {dimension_numbers = #tpu.dot_dimension_numbers<[1], [0], [0], [1], [0, 0, 1, 1], [], []>} : vector<8x128xf32>, vector<128x128xf32>, vector<8x128xf32> -> vector<8x128xf32>
    %66 = arith.addf %64, %65 : vector<8x128xf32>
    %67 = math.tanh %66 : vector<8x128xf32>
    %c6_55 = arith.constant 6 : index
    %c0_56 = arith.constant 0 : index
    %c0_57 = arith.constant 0 : index
    %68 = vector.load %arg14[%c6_55, %c0_56, %c0_57] : memref<8x8x128xf32, #tpu.memory_space<vmem>>, vector<1x8x128xf32>
    %69 = vector.shape_cast %68 : vector<1x8x128xf32> to vector<8x128xf32>
    %70 = vector.shape_cast %67 : vector<8x128xf32> to vector<1x8x128xf32>
    tpu.vector_store %arg14[%c6_55, %c0_56, %c0_57], %70 {strides = array<i32>} : memref<8x8x128xf32, #tpu.memory_space<vmem>>, vector<1x8x128xf32>,
    %c7 = arith.constant 7 : index
    %c0_58 = arith.constant 0 : index
    %c0_59 = arith.constant 0 : index
    %71 = vector.load %arg13[%c7, %c0_58, %c0_59] : memref<8x8x128xf32, #tpu.memory_space<vmem>>, vector<1x8x128xf32>
    %72 = vector.shape_cast %71 : vector<1x8x128xf32> to vector<8x128xf32>
    %cst_60 = arith.constant dense<0.000000e+00> : vector<8x128xf32>
    %73 = tpu.matmul %67, %12, %cst_60 {dimension_numbers = #tpu.dot_dimension_numbers<[1], [0], [0], [1], [0, 0, 1, 1], [], []>} : vector<8x128xf32>, vector<128x128xf32>, vector<8x128xf32> -> vector<8x128xf32>
    %74 = arith.addf %72, %73 : vector<8x128xf32>
    %75 = math.tanh %74 : vector<8x128xf32>
    %c7_61 = arith.constant 7 : index
    %c0_62 = arith.constant 0 : index
    %c0_63 = arith.constant 0 : index
    %76 = vector.load %arg14[%c7_61, %c0_62, %c0_63] : memref<8x8x128xf32, #tpu.memory_space<vmem>>, vector<1x8x128xf32>
    %77 = vector.shape_cast %76 : vector<1x8x128xf32> to vector<8x128xf32>
    %78 = vector.shape_cast %75 : vector<8x128xf32> to vector<1x8x128xf32>
    tpu.vector_store %arg14[%c7_61, %c0_62, %c0_63], %78 {strides = array<i32>} : memref<8x8x128xf32, #tpu.memory_space<vmem>>, vector<1x8x128xf32>,
    %c0_64 = arith.constant 0 : index
    %c0_65 = arith.constant 0 : index
    %c0_66 = arith.constant 0 : index
    %79 = vector.load %arg12[%c0_64, %c0_65, %c0_66] : memref<2x8x128xf32, #tpu.memory_space<vmem>>, vector<1x8x128xf32>
    %80 = vector.shape_cast %79 : vector<1x8x128xf32> to vector<8x128xf32>
    %81 = vector.shape_cast %75 : vector<8x128xf32> to vector<1x8x128xf32>
    tpu.vector_store %arg12[%c0_64, %c0_65, %c0_66], %81 {strides = array<i32>} : memref<2x8x128xf32, #tpu.memory_space<vmem>>, vector<1x8x128xf32>,
    %c0_67 = arith.constant 0 : index
    %c0_68 = arith.constant 0 : index
    %c0_69 = arith.constant 0 : index
    %82 = vector.load %arg14[%c0_67, %c0_68, %c0_69] : memref<8x8x128xf32, #tpu.memory_space<vmem>>, vector<8x8x128xf32>
    %83 = vector.shape_cast %82 : vector<8x8x128xf32> to vector<64x128xf32>
    %c0_70 = arith.constant 0 : index
    %c0_71 = arith.constant 0 : index
    %c0_72 = arith.constant 0 : index
    %84 = vector.load %arg6[%c0_70, %c0_71, %c0_72] : memref<1x128x128xf32, #tpu.memory_space<vmem>>, vector<1x128x128xf32>
    %85 = vector.shape_cast %84 : vector<1x128x128xf32> to vector<128x128xf32>
    %c0_73 = arith.constant 0 : index
    %c0_74 = arith.constant 0 : index
    %c0_75 = arith.constant 0 : index
    %86 = vector.load %arg8[%c0_73, %c0_74, %c0_75] : memref<1x1x128xf32, #tpu.memory_space<vmem>>, vector<1x1x128xf32>
    %87 = vector.shape_cast %86 : vector<1x1x128xf32> to vector<1x128xf32>
    %cst_76 = arith.constant dense<0.000000e+00> : vector<64x128xf32>
    %88 = tpu.matmul %83, %85, %cst_76 {dimension_numbers = #tpu.dot_dimension_numbers<[1], [0], [0], [1], [0, 0, 1, 1], [], []>} : vector<64x128xf32>, vector<128x128xf32>, vector<64x128xf32> -> vector<64x128xf32>
    %89 = vector.broadcast %87 : vector<1x128xf32> to vector<64x128xf32>
    %90 = arith.addf %88, %89 : vector<64x128xf32>
    %91 = vector.shape_cast %90 : vector<64x128xf32> to vector<8x8x128xf32>
    %c0_77 = arith.constant 0 : index
    %c0_78 = arith.constant 0 : index
    %c0_79 = arith.constant 0 : index
    %92 = vector.load %arg13[%c0_77, %c0_78, %c0_79] : memref<8x8x128xf32, #tpu.memory_space<vmem>>, vector<8x8x128xf32>
    tpu.vector_store %arg13[%c0_77, %c0_78, %c0_79], %91 {strides = array<i32>} : memref<8x8x128xf32, #tpu.memory_space<vmem>>, vector<8x8x128xf32>,
    %c0_80 = arith.constant 0 : index
    %c0_81 = arith.constant 0 : index
    %c0_82 = arith.constant 0 : index
    %93 = vector.load %arg7[%c0_80, %c0_81, %c0_82] : memref<1x128x128xf32, #tpu.memory_space<vmem>>, vector<1x128x128xf32>
    %94 = vector.shape_cast %93 : vector<1x128x128xf32> to vector<128x128xf32>
    %c1_83 = arith.constant 1 : index
    %c0_84 = arith.constant 0 : index
    %c0_85 = arith.constant 0 : index
    %95 = vector.load %arg12[%c1_83, %c0_84, %c0_85] : memref<2x8x128xf32, #tpu.memory_space<vmem>>, vector<1x8x128xf32>
    %96 = vector.shape_cast %95 : vector<1x8x128xf32> to vector<8x128xf32>
    %c0_86 = arith.constant 0 : index
    %c0_87 = arith.constant 0 : index
    %c0_88 = arith.constant 0 : index
    %97 = vector.load %arg13[%c0_86, %c0_87, %c0_88] : memref<8x8x128xf32, #tpu.memory_space<vmem>>, vector<1x8x128xf32>
    %98 = vector.shape_cast %97 : vector<1x8x128xf32> to vector<8x128xf32>
    %cst_89 = arith.constant dense<0.000000e+00> : vector<8x128xf32>
    %99 = tpu.matmul %96, %94, %cst_89 {dimension_numbers = #tpu.dot_dimension_numbers<[1], [0], [0], [1], [0, 0, 1, 1], [], []>} : vector<8x128xf32>, vector<128x128xf32>, vector<8x128xf32> -> vector<8x128xf32>
    %100 = arith.addf %98, %99 : vector<8x128xf32>
    %101 = math.tanh %100 : vector<8x128xf32>
    %c1_90 = arith.constant 1 : index
    %c0_91 = arith.constant 0 : index
    %c0_92 = arith.constant 0 : index
    %102 = vector.load %arg13[%c1_90, %c0_91, %c0_92] : memref<8x8x128xf32, #tpu.memory_space<vmem>>, vector<1x8x128xf32>
    %103 = vector.shape_cast %102 : vector<1x8x128xf32> to vector<8x128xf32>
    %cst_93 = arith.constant dense<0.000000e+00> : vector<8x128xf32>
    %104 = tpu.matmul %101, %94, %cst_93 {dimension_numbers = #tpu.dot_dimension_numbers<[1], [0], [0], [1], [0, 0, 1, 1], [], []>} : vector<8x128xf32>, vector<128x128xf32>, vector<8x128xf32> -> vector<8x128xf32>
    %105 = arith.addf %103, %104 : vector<8x128xf32>
    %106 = math.tanh %105 : vector<8x128xf32>
    %c2_94 = arith.constant 2 : index
    %c0_95 = arith.constant 0 : index
    %c0_96 = arith.constant 0 : index
    %107 = vector.load %arg13[%c2_94, %c0_95, %c0_96] : memref<8x8x128xf32, #tpu.memory_space<vmem>>, vector<1x8x128xf32>
    %108 = vector.shape_cast %107 : vector<1x8x128xf32> to vector<8x128xf32>
    %cst_97 = arith.constant dense<0.000000e+00> : vector<8x128xf32>
    %109 = tpu.matmul %106, %94, %cst_97 {dimension_numbers = #tpu.dot_dimension_numbers<[1], [0], [0], [1], [0, 0, 1, 1], [], []>} : vector<8x128xf32>, vector<128x128xf32>, vector<8x128xf32> -> vector<8x128xf32>
    %110 = arith.addf %108, %109 : vector<8x128xf32>
    %111 = math.tanh %110 : vector<8x128xf32>
    %c3_98 = arith.constant 3 : index
    %c0_99 = arith.constant 0 : index
    %c0_100 = arith.constant 0 : index
    %112 = vector.load %arg13[%c3_98, %c0_99, %c0_100] : memref<8x8x128xf32, #tpu.memory_space<vmem>>, vector<1x8x128xf32>
    %113 = vector.shape_cast %112 : vector<1x8x128xf32> to vector<8x128xf32>
    %cst_101 = arith.constant dense<0.000000e+00> : vector<8x128xf32>
    %114 = tpu.matmul %111, %94, %cst_101 {dimension_numbers = #tpu.dot_dimension_numbers<[1], [0], [0], [1], [0, 0, 1, 1], [], []>} : vector<8x128xf32>, vector<128x128xf32>, vector<8x128xf32> -> vector<8x128xf32>
    %115 = arith.addf %113, %114 : vector<8x128xf32>
    %116 = math.tanh %115 : vector<8x128xf32>
    %c4_102 = arith.constant 4 : index
    %c0_103 = arith.constant 0 : index
    %c0_104 = arith.constant 0 : index
    %117 = vector.load %arg13[%c4_102, %c0_103, %c0_104] : memref<8x8x128xf32, #tpu.memory_space<vmem>>, vector<1x8x128xf32>
    %118 = vector.shape_cast %117 : vector<1x8x128xf32> to vector<8x128xf32>
    %cst_105 = arith.constant dense<0.000000e+00> : vector<8x128xf32>
    %119 = tpu.matmul %116, %94, %cst_105 {dimension_numbers = #tpu.dot_dimension_numbers<[1], [0], [0], [1], [0, 0, 1, 1], [], []>} : vector<8x128xf32>, vector<128x128xf32>, vector<8x128xf32> -> vector<8x128xf32>
    %120 = arith.addf %118, %119 : vector<8x128xf32>
    %121 = math.tanh %120 : vector<8x128xf32>
    %c5_106 = arith.constant 5 : index
    %c0_107 = arith.constant 0 : index
    %c0_108 = arith.constant 0 : index
    %122 = vector.load %arg13[%c5_106, %c0_107, %c0_108] : memref<8x8x128xf32, #tpu.memory_space<vmem>>, vector<1x8x128xf32>
    %123 = vector.shape_cast %122 : vector<1x8x128xf32> to vector<8x128xf32>
    %cst_109 = arith.constant dense<0.000000e+00> : vector<8x128xf32>
    %124 = tpu.matmul %121, %94, %cst_109 {dimension_numbers = #tpu.dot_dimension_numbers<[1], [0], [0], [1], [0, 0, 1, 1], [], []>} : vector<8x128xf32>, vector<128x128xf32>, vector<8x128xf32> -> vector<8x128xf32>
    %125 = arith.addf %123, %124 : vector<8x128xf32>
    %126 = math.tanh %125 : vector<8x128xf32>
    %c6_110 = arith.constant 6 : index
    %c0_111 = arith.constant 0 : index
    %c0_112 = arith.constant 0 : index
    %127 = vector.load %arg13[%c6_110, %c0_111, %c0_112] : memref<8x8x128xf32, #tpu.memory_space<vmem>>, vector<1x8x128xf32>
    %128 = vector.shape_cast %127 : vector<1x8x128xf32> to vector<8x128xf32>
    %cst_113 = arith.constant dense<0.000000e+00> : vector<8x128xf32>
    %129 = tpu.matmul %126, %94, %cst_113 {dimension_numbers = #tpu.dot_dimension_numbers<[1], [0], [0], [1], [0, 0, 1, 1], [], []>} : vector<8x128xf32>, vector<128x128xf32>, vector<8x128xf32> -> vector<8x128xf32>
    %130 = arith.addf %128, %129 : vector<8x128xf32>
    %131 = math.tanh %130 : vector<8x128xf32>
    %c7_114 = arith.constant 7 : index
    %c0_115 = arith.constant 0 : index
    %c0_116 = arith.constant 0 : index
    %132 = vector.load %arg13[%c7_114, %c0_115, %c0_116] : memref<8x8x128xf32, #tpu.memory_space<vmem>>, vector<1x8x128xf32>
    %133 = vector.shape_cast %132 : vector<1x8x128xf32> to vector<8x128xf32>
    %cst_117 = arith.constant dense<0.000000e+00> : vector<8x128xf32>
    %134 = tpu.matmul %131, %94, %cst_117 {dimension_numbers = #tpu.dot_dimension_numbers<[1], [0], [0], [1], [0, 0, 1, 1], [], []>} : vector<8x128xf32>, vector<128x128xf32>, vector<8x128xf32> -> vector<8x128xf32>
    %135 = arith.addf %133, %134 : vector<8x128xf32>
    %136 = math.tanh %135 : vector<8x128xf32>
    %c1_118 = arith.constant 1 : index
    %c0_119 = arith.constant 0 : index
    %c0_120 = arith.constant 0 : index
    %137 = vector.load %arg12[%c1_118, %c0_119, %c0_120] : memref<2x8x128xf32, #tpu.memory_space<vmem>>, vector<1x8x128xf32>
    %138 = vector.shape_cast %137 : vector<1x8x128xf32> to vector<8x128xf32>
    %139 = vector.shape_cast %136 : vector<8x128xf32> to vector<1x8x128xf32>
    tpu.vector_store %arg12[%c1_118, %c0_119, %c0_120], %139 {strides = array<i32>} : memref<2x8x128xf32, #tpu.memory_space<vmem>>, vector<1x8x128xf32>,
    %c0_i32_121 = arith.constant 0 : i32
    %140 = arith.cmpi eq, %arg1, %c0_i32_121 : i32
    %141 = arith.extui %140 : i1 to i32
    %c0_i32_122 = arith.constant 0 : i32
    %142 = arith.cmpi ne, %141, %c0_i32_122 : i32
    scf.if %142 {
      %c1_123 = arith.constant 1 : index
      %c0_124 = arith.constant 0 : index
      %c0_125 = arith.constant 0 : index
      %143 = vector.load %arg12[%c1_123, %c0_124, %c0_125] : memref<2x8x128xf32, #tpu.memory_space<vmem>>, vector<1x8x128xf32>
      %144 = vector.shape_cast %143 : vector<1x8x128xf32> to vector<8x128xf32>
      %c0_126 = arith.constant 0 : index
      %c0_127 = arith.constant 0 : index
      %145 = vector.load %arg9[%c0_126, %c0_127] : memref<128x4xf32, #tpu.memory_space<vmem>>, vector<128x4xf32>
      %cst_128 = arith.constant dense<0.000000e+00> : vector<8x4xf32>
      %146 = tpu.matmul %144, %145, %cst_128 {dimension_numbers = #tpu.dot_dimension_numbers<[1], [0], [0], [1], [0, 0, 1, 1], [], []>} : vector<8x128xf32>, vector<128x4xf32>, vector<8x4xf32> -> vector<8x4xf32>
      %c0_129 = arith.constant 0 : index
      %c0_130 = arith.constant 0 : index
      %147 = vector.load %arg10[%c0_129, %c0_130] : memref<1x4xf32, #tpu.memory_space<vmem>>, vector<1x4xf32>
      %148 = vector.broadcast %147 : vector<1x4xf32> to vector<8x4xf32>
      %149 = arith.addf %146, %148 : vector<8x4xf32>
      %c0_131 = arith.constant 0 : index
      %c0_132 = arith.constant 0 : index
      %150 = vector.load %arg11[%c0_131, %c0_132] : memref<8x4xf32, #tpu.memory_space<vmem>>, vector<8x4xf32>
      tpu.vector_store %arg11[%c0_131, %c0_132], %149 {strides = array<i32>} : memref<8x4xf32, #tpu.memory_space<vmem>>, vector<8x4xf32>,
    } else {
    }
    return
  }
  func.func @transform_0(%arg0: i32, %arg1: i32) -> (i32, i32, i32) {
    %c0_i32 = arith.constant 0 : i32
    %c0_i32_0 = arith.constant 0 : i32
    return %arg1, %arg0, %c0_i32 : i32, i32, i32
  }
  func.func @transform_1(%arg0: i32, %arg1: i32) -> (i32, i32) {
    %c0_i32 = arith.constant 0 : i32
    %c0_i32_0 = arith.constant 0 : i32
    %c0_i32_1 = arith.constant 0 : i32
    return %c0_i32, %c0_i32_0 : i32, i32
  }
  func.func @transform_2(%arg0: i32, %arg1: i32) -> (i32, i32) {
    %c0_i32 = arith.constant 0 : i32
    %c0_i32_0 = arith.constant 0 : i32
    %c0_i32_1 = arith.constant 0 : i32
    return %c0_i32, %c0_i32_0 : i32, i32
  }
  func.func @transform_3(%arg0: i32, %arg1: i32) -> (i32, i32) {
    %c0_i32 = arith.constant 0 : i32
    %c0_i32_0 = arith.constant 0 : i32
    %c0_i32_1 = arith.constant 0 : i32
    return %c0_i32, %c0_i32_0 : i32, i32
  }
  func.func @transform_4(%arg0: i32, %arg1: i32) -> (i32, i32, i32) {
    %c0_i32 = arith.constant 0 : i32
    %c0_i32_0 = arith.constant 0 : i32
    %c0_i32_1 = arith.constant 0 : i32
    %c0_i32_2 = arith.constant 0 : i32
    return %c0_i32, %c0_i32_0, %c0_i32_1 : i32, i32, i32
  }
  func.func @transform_5(%arg0: i32, %arg1: i32) -> (i32, i32, i32) {
    %c0_i32 = arith.constant 0 : i32
    %c0_i32_0 = arith.constant 0 : i32
    %c0_i32_1 = arith.constant 0 : i32
    %c0_i32_2 = arith.constant 0 : i32
    return %c0_i32, %c0_i32_0, %c0_i32_1 : i32, i32, i32
  }
  func.func @transform_6(%arg0: i32, %arg1: i32) -> (i32, i32, i32) {
    %c0_i32 = arith.constant 0 : i32
    %c0_i32_0 = arith.constant 0 : i32
    %c0_i32_1 = arith.constant 0 : i32
    %c0_i32_2 = arith.constant 0 : i32
    return %c0_i32, %c0_i32_0, %c0_i32_1 : i32, i32, i32
  }
  func.func @transform_7(%arg0: i32, %arg1: i32) -> (i32, i32) {
    %c0_i32 = arith.constant 0 : i32
    %c0_i32_0 = arith.constant 0 : i32
    %c0_i32_1 = arith.constant 0 : i32
    return %c0_i32, %c0_i32_0 : i32, i32
  }
  func.func @transform_8(%arg0: i32, %arg1: i32) -> (i32, i32) {
    %c0_i32 = arith.constant 0 : i32
    %c0_i32_0 = arith.constant 0 : i32
    %c0_i32_1 = arith.constant 0 : i32
    return %c0_i32, %c0_i32_0 : i32, i32
  }
  func.func @transform_9(%arg0: i32, %arg1: i32) -> (i32, i32) {
    %c0_i32 = arith.constant 0 : i32
    %c0_i32_0 = arith.constant 0 : i32
    return %arg0, %c0_i32 : i32, i32
  }
}

module attributes {stable_mosaic.version = 11 : i64} {
  func.func @_rnn_fc_kernel(%arg0: i32, %arg1: i32, %arg2: memref<8x8x16xf32, #tpu.memory_space<vmem>>, %arg3: memref<16x128xf32, #tpu.memory_space<vmem>>, %arg4: memref<128x128xf32, #tpu.memory_space<vmem>>, %arg5: memref<1x128xf32, #tpu.memory_space<vmem>>, %arg6: memref<1x128x128xf32, #tpu.memory_space<vmem>>, %arg7: memref<1x128x128xf32, #tpu.memory_space<vmem>>, %arg8: memref<1x1x128xf32, #tpu.memory_space<vmem>>, %arg9: memref<128x4xf32, #tpu.memory_space<vmem>>, %arg10: memref<1x4xf32, #tpu.memory_space<vmem>>, %arg11: memref<8x4xf32, #tpu.memory_space<vmem>>, %arg12: memref<2x8x128xf32, #tpu.memory_space<vmem>>, %arg13: memref<8x8x128xf32, #tpu.memory_space<vmem>>, %arg14: memref<8x8x128xf32, #tpu.memory_space<vmem>>) attributes {dimension_semantics = [#tpu.dimension_semantics<parallel>, #tpu.dimension_semantics<arbitrary>], iteration_bounds = array<i64: 1, 1>, scalar_prefetch = 0 : i64, scratch_operands = 3 : i64, tpu.core_type = #tpu.core_type<tc>, window_params = [{transform_indices = @transform_0, window_bounds = array<i64: 8, 8, 16>}, {pipeline_mode = #tpu.pipeline_mode<synchronous>, transform_indices = @transform_1, window_bounds = array<i64: 16, 128>}, {pipeline_mode = #tpu.pipeline_mode<synchronous>, transform_indices = @transform_2, window_bounds = array<i64: 128, 128>}, {pipeline_mode = #tpu.pipeline_mode<synchronous>, transform_indices = @transform_3, window_bounds = array<i64: 1, 128>}, {pipeline_mode = #tpu.pipeline_mode<synchronous>, transform_indices = @transform_4, window_bounds = array<i64: 1, 128, 128>}, {pipeline_mode = #tpu.pipeline_mode<synchronous>, transform_indices = @transform_5, window_bounds = array<i64: 1, 128, 128>}, {pipeline_mode = #tpu.pipeline_mode<synchronous>, transform_indices = @transform_6, window_bounds = array<i64: 1, 1, 128>}, {pipeline_mode = #tpu.pipeline_mode<synchronous>, transform_indices = @transform_7, window_bounds = array<i64: 128, 4>}, {pipeline_mode = #tpu.pipeline_mode<synchronous>, transform_indices = @transform_8, window_bounds = array<i64: 1, 4>}, {transform_indices = @transform_9, window_bounds = array<i64: 8, 4>}]} {
    %c0_i32 = arith.constant 0 : i32
    %0 = arith.cmpi eq, %arg1, %c0_i32 : i32
    %1 = arith.extui %0 : i1 to i32
    %c0_i32_0 = arith.constant 0 : i32
    %2 = arith.cmpi ne, %1, %c0_i32_0 : i32
    scf.if %2 {
      %cst_123 = arith.constant 0.000000e+00 : f32
      %143 = vector.broadcast %cst_123 : f32 to vector<2x8x128xf32>
      %c0_124 = arith.constant 0 : index
      %c0_125 = arith.constant 0 : index
      %c0_126 = arith.constant 0 : index
      %144 = vector.load %arg12[%c0_124, %c0_125, %c0_126] : memref<2x8x128xf32, #tpu.memory_space<vmem>>, vector<2x8x128xf32>
      tpu.vector_store %arg12[%c0_124, %c0_125, %c0_126], %143 {strides = array<i32>} : memref<2x8x128xf32, #tpu.memory_space<vmem>>, vector<2x8x128xf32>,
    } else {
    }
    %c0 = arith.constant 0 : index
    %c0_1 = arith.constant 0 : index
    %c0_2 = arith.constant 0 : index
    %3 = vector.load %arg2[%c0, %c0_1, %c0_2] : memref<8x8x16xf32, #tpu.memory_space<vmem>>, vector<8x8x16xf32>
    %4 = vector.shape_cast %3 : vector<8x8x16xf32> to vector<64x16xf32>
    %c0_3 = arith.constant 0 : index
    %c0_4 = arith.constant 0 : index
    %5 = vector.load %arg3[%c0_3, %c0_4] : memref<16x128xf32, #tpu.memory_space<vmem>>, vector<16x128xf32>
    %c0_5 = arith.constant 0 : index
    %c0_6 = arith.constant 0 : index
    %6 = vector.load %arg5[%c0_5, %c0_6] : memref<1x128xf32, #tpu.memory_space<vmem>>, vector<1x128xf32>
    %cst = arith.constant dense<0.000000e+00> : vector<64x128xf32>
    %7 = tpu.matmul %4, %5, %cst {dimension_numbers = #tpu.dot_dimension_numbers<[1], [0], [0], [1], [0, 0, 1, 1], [], []>} : vector<64x16xf32>, vector<16x128xf32>, vector<64x128xf32> -> vector<64x128xf32>
    %8 = vector.broadcast %6 : vector<1x128xf32> to vector<64x128xf32>
    %9 = arith.addf %7, %8 : vector<64x128xf32>
    %10 = vector.shape_cast %9 : vector<64x128xf32> to vector<8x8x128xf32>
    %c0_7 = arith.constant 0 : index
    %c0_8 = arith.constant 0 : index
    %c0_9 = arith.constant 0 : index
    %11 = vector.load %arg13[%c0_7, %c0_8, %c0_9] : memref<8x8x128xf32, #tpu.memory_space<vmem>>, vector<8x8x128xf32>
    tpu.vector_store %arg13[%c0_7, %c0_8, %c0_9], %10 {strides = array<i32>} : memref<8x8x128xf32, #tpu.memory_space<vmem>>, vector<8x8x128xf32>,
    %c0_10 = arith.constant 0 : index
    %c0_11 = arith.constant 0 : index
    %12 = vector.load %arg4[%c0_10, %c0_11] : memref<128x128xf32, #tpu.memory_space<vmem>>, vector<128x128xf32>
    %c0_12 = arith.constant 0 : index
    %c0_13 = arith.constant 0 : index
    %c0_14 = arith.constant 0 : index
    %13 = vector.load %arg12[%c0_12, %c0_13, %c0_14] : memref<2x8x128xf32, #tpu.memory_space<vmem>>, vector<1x8x128xf32>
    %14 = vector.shape_cast %13 : vector<1x8x128xf32> to vector<8x128xf32>
    %c0_15 = arith.constant 0 : index
    %c0_16 = arith.constant 0 : index
    %c0_17 = arith.constant 0 : index
    %15 = vector.load %arg13[%c0_15, %c0_16, %c0_17] : memref<8x8x128xf32, #tpu.memory_space<vmem>>, vector<1x8x128xf32>
    %16 = vector.shape_cast %15 : vector<1x8x128xf32> to vector<8x128xf32>
    %cst_18 = arith.constant dense<0.000000e+00> : vector<8x128xf32>
    %17 = tpu.matmul %14, %12, %cst_18 {dimension_numbers = #tpu.dot_dimension_numbers<[1], [0], [0], [1], [0, 0, 1, 1], [], []>} : vector<8x128xf32>, vector<128x128xf32>, vector<8x128xf32> -> vector<8x128xf32>
    %18 = arith.addf %16, %17 : vector<8x128xf32>
    %19 = math.tanh %18 : vector<8x128xf32>
    %c0_19 = arith.constant 0 : index
    %c0_20 = arith.constant 0 : index
    %c0_21 = arith.constant 0 : index
    %20 = vector.load %arg14[%c0_19, %c0_20, %c0_21] : memref<8x8x128xf32, #tpu.memory_space<vmem>>, vector<1x8x128xf32>
    %21 = vector.shape_cast %20 : vector<1x8x128xf32> to vector<8x128xf32>
    %22 = vector.shape_cast %19 : vector<8x128xf32> to vector<1x8x128xf32>
    tpu.vector_store %arg14[%c0_19, %c0_20, %c0_21], %22 {strides = array<i32>} : memref<8x8x128xf32, #tpu.memory_space<vmem>>, vector<1x8x128xf32>,
    %c1 = arith.constant 1 : index
    %c0_22 = arith.constant 0 : index
    %c0_23 = arith.constant 0 : index
    %23 = vector.load %arg13[%c1, %c0_22, %c0_23] : memref<8x8x128xf32, #tpu.memory_space<vmem>>, vector<1x8x128xf32>
    %24 = vector.shape_cast %23 : vector<1x8x128xf32> to vector<8x128xf32>
    %cst_24 = arith.constant dense<0.000000e+00> : vector<8x128xf32>
    %25 = tpu.matmul %19, %12, %cst_24 {dimension_numbers = #tpu.dot_dimension_numbers<[1], [0], [0], [1], [0, 0, 1, 1], [], []>} : vector<8x128xf32>, vector<128x128xf32>, vector<8x128xf32> -> vector<8x128xf32>
    %26 = arith.addf %24, %25 : vector<8x128xf32>
    %27 = math.tanh %26 : vector<8x128xf32>
    %c1_25 = arith.constant 1 : index
    %c0_26 = arith.constant 0 : index
    %c0_27 = arith.constant 0 : index
    %28 = vector.load %arg14[%c1_25, %c0_26, %c0_27] : memref<8x8x128xf32, #tpu.memory_space<vmem>>, vector<1x8x128xf32>
    %29 = vector.shape_cast %28 : vector<1x8x128xf32> to vector<8x128xf32>
    %30 = vector.shape_cast %27 : vector<8x128xf32> to vector<1x8x128xf32>
    tpu.vector_store %arg14[%c1_25, %c0_26, %c0_27], %30 {strides = array<i32>} : memref<8x8x128xf32, #tpu.memory_space<vmem>>, vector<1x8x128xf32>,
    %c2 = arith.constant 2 : index
    %c0_28 = arith.constant 0 : index
    %c0_29 = arith.constant 0 : index
    %31 = vector.load %arg13[%c2, %c0_28, %c0_29] : memref<8x8x128xf32, #tpu.memory_space<vmem>>, vector<1x8x128xf32>
    %32 = vector.shape_cast %31 : vector<1x8x128xf32> to vector<8x128xf32>
    %cst_30 = arith.constant dense<0.000000e+00> : vector<8x128xf32>
    %33 = tpu.matmul %27, %12, %cst_30 {dimension_numbers = #tpu.dot_dimension_numbers<[1], [0], [0], [1], [0, 0, 1, 1], [], []>} : vector<8x128xf32>, vector<128x128xf32>, vector<8x128xf32> -> vector<8x128xf32>
    %34 = arith.addf %32, %33 : vector<8x128xf32>
    %35 = math.tanh %34 : vector<8x128xf32>
    %c2_31 = arith.constant 2 : index
    %c0_32 = arith.constant 0 : index
    %c0_33 = arith.constant 0 : index
    %36 = vector.load %arg14[%c2_31, %c0_32, %c0_33] : memref<8x8x128xf32, #tpu.memory_space<vmem>>, vector<1x8x128xf32>
    %37 = vector.shape_cast %36 : vector<1x8x128xf32> to vector<8x128xf32>
    %38 = vector.shape_cast %35 : vector<8x128xf32> to vector<1x8x128xf32>
    tpu.vector_store %arg14[%c2_31, %c0_32, %c0_33], %38 {strides = array<i32>} : memref<8x8x128xf32, #tpu.memory_space<vmem>>, vector<1x8x128xf32>,
    %c3 = arith.constant 3 : index
    %c0_34 = arith.constant 0 : index
    %c0_35 = arith.constant 0 : index
    %39 = vector.load %arg13[%c3, %c0_34, %c0_35] : memref<8x8x128xf32, #tpu.memory_space<vmem>>, vector<1x8x128xf32>
    %40 = vector.shape_cast %39 : vector<1x8x128xf32> to vector<8x128xf32>
    %cst_36 = arith.constant dense<0.000000e+00> : vector<8x128xf32>
    %41 = tpu.matmul %35, %12, %cst_36 {dimension_numbers = #tpu.dot_dimension_numbers<[1], [0], [0], [1], [0, 0, 1, 1], [], []>} : vector<8x128xf32>, vector<128x128xf32>, vector<8x128xf32> -> vector<8x128xf32>
    %42 = arith.addf %40, %41 : vector<8x128xf32>
    %43 = math.tanh %42 : vector<8x128xf32>
    %c3_37 = arith.constant 3 : index
    %c0_38 = arith.constant 0 : index
    %c0_39 = arith.constant 0 : index
    %44 = vector.load %arg14[%c3_37, %c0_38, %c0_39] : memref<8x8x128xf32, #tpu.memory_space<vmem>>, vector<1x8x128xf32>
    %45 = vector.shape_cast %44 : vector<1x8x128xf32> to vector<8x128xf32>
    %46 = vector.shape_cast %43 : vector<8x128xf32> to vector<1x8x128xf32>
    tpu.vector_store %arg14[%c3_37, %c0_38, %c0_39], %46 {strides = array<i32>} : memref<8x8x128xf32, #tpu.memory_space<vmem>>, vector<1x8x128xf32>,
    %c4 = arith.constant 4 : index
    %c0_40 = arith.constant 0 : index
    %c0_41 = arith.constant 0 : index
    %47 = vector.load %arg13[%c4, %c0_40, %c0_41] : memref<8x8x128xf32, #tpu.memory_space<vmem>>, vector<1x8x128xf32>
    %48 = vector.shape_cast %47 : vector<1x8x128xf32> to vector<8x128xf32>
    %cst_42 = arith.constant dense<0.000000e+00> : vector<8x128xf32>
    %49 = tpu.matmul %43, %12, %cst_42 {dimension_numbers = #tpu.dot_dimension_numbers<[1], [0], [0], [1], [0, 0, 1, 1], [], []>} : vector<8x128xf32>, vector<128x128xf32>, vector<8x128xf32> -> vector<8x128xf32>
    %50 = arith.addf %48, %49 : vector<8x128xf32>
    %51 = math.tanh %50 : vector<8x128xf32>
    %c4_43 = arith.constant 4 : index
    %c0_44 = arith.constant 0 : index
    %c0_45 = arith.constant 0 : index
    %52 = vector.load %arg14[%c4_43, %c0_44, %c0_45] : memref<8x8x128xf32, #tpu.memory_space<vmem>>, vector<1x8x128xf32>
    %53 = vector.shape_cast %52 : vector<1x8x128xf32> to vector<8x128xf32>
    %54 = vector.shape_cast %51 : vector<8x128xf32> to vector<1x8x128xf32>
    tpu.vector_store %arg14[%c4_43, %c0_44, %c0_45], %54 {strides = array<i32>} : memref<8x8x128xf32, #tpu.memory_space<vmem>>, vector<1x8x128xf32>,
    %c5 = arith.constant 5 : index
    %c0_46 = arith.constant 0 : index
    %c0_47 = arith.constant 0 : index
    %55 = vector.load %arg13[%c5, %c0_46, %c0_47] : memref<8x8x128xf32, #tpu.memory_space<vmem>>, vector<1x8x128xf32>
    %56 = vector.shape_cast %55 : vector<1x8x128xf32> to vector<8x128xf32>
    %cst_48 = arith.constant dense<0.000000e+00> : vector<8x128xf32>
    %57 = tpu.matmul %51, %12, %cst_48 {dimension_numbers = #tpu.dot_dimension_numbers<[1], [0], [0], [1], [0, 0, 1, 1], [], []>} : vector<8x128xf32>, vector<128x128xf32>, vector<8x128xf32> -> vector<8x128xf32>
    %58 = arith.addf %56, %57 : vector<8x128xf32>
    %59 = math.tanh %58 : vector<8x128xf32>
    %c5_49 = arith.constant 5 : index
    %c0_50 = arith.constant 0 : index
    %c0_51 = arith.constant 0 : index
    %60 = vector.load %arg14[%c5_49, %c0_50, %c0_51] : memref<8x8x128xf32, #tpu.memory_space<vmem>>, vector<1x8x128xf32>
    %61 = vector.shape_cast %60 : vector<1x8x128xf32> to vector<8x128xf32>
    %62 = vector.shape_cast %59 : vector<8x128xf32> to vector<1x8x128xf32>
    tpu.vector_store %arg14[%c5_49, %c0_50, %c0_51], %62 {strides = array<i32>} : memref<8x8x128xf32, #tpu.memory_space<vmem>>, vector<1x8x128xf32>,
    %c6 = arith.constant 6 : index
    %c0_52 = arith.constant 0 : index
    %c0_53 = arith.constant 0 : index
    %63 = vector.load %arg13[%c6, %c0_52, %c0_53] : memref<8x8x128xf32, #tpu.memory_space<vmem>>, vector<1x8x128xf32>
    %64 = vector.shape_cast %63 : vector<1x8x128xf32> to vector<8x128xf32>
    %cst_54 = arith.constant dense<0.000000e+00> : vector<8x128xf32>
    %65 = tpu.matmul %59, %12, %cst_54 {dimension_numbers = #tpu.dot_dimension_numbers<[1], [0], [0], [1], [0, 0, 1, 1], [], []>} : vector<8x128xf32>, vector<128x128xf32>, vector<8x128xf32> -> vector<8x128xf32>
    %66 = arith.addf %64, %65 : vector<8x128xf32>
    %67 = math.tanh %66 : vector<8x128xf32>
    %c6_55 = arith.constant 6 : index
    %c0_56 = arith.constant 0 : index
    %c0_57 = arith.constant 0 : index
    %68 = vector.load %arg14[%c6_55, %c0_56, %c0_57] : memref<8x8x128xf32, #tpu.memory_space<vmem>>, vector<1x8x128xf32>
    %69 = vector.shape_cast %68 : vector<1x8x128xf32> to vector<8x128xf32>
    %70 = vector.shape_cast %67 : vector<8x128xf32> to vector<1x8x128xf32>
    tpu.vector_store %arg14[%c6_55, %c0_56, %c0_57], %70 {strides = array<i32>} : memref<8x8x128xf32, #tpu.memory_space<vmem>>, vector<1x8x128xf32>,
    %c7 = arith.constant 7 : index
    %c0_58 = arith.constant 0 : index
    %c0_59 = arith.constant 0 : index
    %71 = vector.load %arg13[%c7, %c0_58, %c0_59] : memref<8x8x128xf32, #tpu.memory_space<vmem>>, vector<1x8x128xf32>
    %72 = vector.shape_cast %71 : vector<1x8x128xf32> to vector<8x128xf32>
    %cst_60 = arith.constant dense<0.000000e+00> : vector<8x128xf32>
    %73 = tpu.matmul %67, %12, %cst_60 {dimension_numbers = #tpu.dot_dimension_numbers<[1], [0], [0], [1], [0, 0, 1, 1], [], []>} : vector<8x128xf32>, vector<128x128xf32>, vector<8x128xf32> -> vector<8x128xf32>
    %74 = arith.addf %72, %73 : vector<8x128xf32>
    %75 = math.tanh %74 : vector<8x128xf32>
    %c7_61 = arith.constant 7 : index
    %c0_62 = arith.constant 0 : index
    %c0_63 = arith.constant 0 : index
    %76 = vector.load %arg14[%c7_61, %c0_62, %c0_63] : memref<8x8x128xf32, #tpu.memory_space<vmem>>, vector<1x8x128xf32>
    %77 = vector.shape_cast %76 : vector<1x8x128xf32> to vector<8x128xf32>
    %78 = vector.shape_cast %75 : vector<8x128xf32> to vector<1x8x128xf32>
    tpu.vector_store %arg14[%c7_61, %c0_62, %c0_63], %78 {strides = array<i32>} : memref<8x8x128xf32, #tpu.memory_space<vmem>>, vector<1x8x128xf32>,
    %c0_64 = arith.constant 0 : index
    %c0_65 = arith.constant 0 : index
    %c0_66 = arith.constant 0 : index
    %79 = vector.load %arg12[%c0_64, %c0_65, %c0_66] : memref<2x8x128xf32, #tpu.memory_space<vmem>>, vector<1x8x128xf32>
    %80 = vector.shape_cast %79 : vector<1x8x128xf32> to vector<8x128xf32>
    %81 = vector.shape_cast %75 : vector<8x128xf32> to vector<1x8x128xf32>
    tpu.vector_store %arg12[%c0_64, %c0_65, %c0_66], %81 {strides = array<i32>} : memref<2x8x128xf32, #tpu.memory_space<vmem>>, vector<1x8x128xf32>,
    %c0_67 = arith.constant 0 : index
    %c0_68 = arith.constant 0 : index
    %c0_69 = arith.constant 0 : index
    %82 = vector.load %arg14[%c0_67, %c0_68, %c0_69] : memref<8x8x128xf32, #tpu.memory_space<vmem>>, vector<8x8x128xf32>
    %83 = vector.shape_cast %82 : vector<8x8x128xf32> to vector<64x128xf32>
    %c0_70 = arith.constant 0 : index
    %c0_71 = arith.constant 0 : index
    %c0_72 = arith.constant 0 : index
    %84 = vector.load %arg6[%c0_70, %c0_71, %c0_72] : memref<1x128x128xf32, #tpu.memory_space<vmem>>, vector<1x128x128xf32>
    %85 = vector.shape_cast %84 : vector<1x128x128xf32> to vector<128x128xf32>
    %c0_73 = arith.constant 0 : index
    %c0_74 = arith.constant 0 : index
    %c0_75 = arith.constant 0 : index
    %86 = vector.load %arg8[%c0_73, %c0_74, %c0_75] : memref<1x1x128xf32, #tpu.memory_space<vmem>>, vector<1x1x128xf32>
    %87 = vector.shape_cast %86 : vector<1x1x128xf32> to vector<1x128xf32>
    %cst_76 = arith.constant dense<0.000000e+00> : vector<64x128xf32>
    %88 = tpu.matmul %83, %85, %cst_76 {dimension_numbers = #tpu.dot_dimension_numbers<[1], [0], [0], [1], [0, 0, 1, 1], [], []>} : vector<64x128xf32>, vector<128x128xf32>, vector<64x128xf32> -> vector<64x128xf32>
    %89 = vector.broadcast %87 : vector<1x128xf32> to vector<64x128xf32>
    %90 = arith.addf %88, %89 : vector<64x128xf32>
    %91 = vector.shape_cast %90 : vector<64x128xf32> to vector<8x8x128xf32>
    %c0_77 = arith.constant 0 : index
    %c0_78 = arith.constant 0 : index
    %c0_79 = arith.constant 0 : index
    %92 = vector.load %arg13[%c0_77, %c0_78, %c0_79] : memref<8x8x128xf32, #tpu.memory_space<vmem>>, vector<8x8x128xf32>
    tpu.vector_store %arg13[%c0_77, %c0_78, %c0_79], %91 {strides = array<i32>} : memref<8x8x128xf32, #tpu.memory_space<vmem>>, vector<8x8x128xf32>,
    %c0_80 = arith.constant 0 : index
    %c0_81 = arith.constant 0 : index
    %c0_82 = arith.constant 0 : index
    %93 = vector.load %arg7[%c0_80, %c0_81, %c0_82] : memref<1x128x128xf32, #tpu.memory_space<vmem>>, vector<1x128x128xf32>
    %94 = vector.shape_cast %93 : vector<1x128x128xf32> to vector<128x128xf32>
    %c1_83 = arith.constant 1 : index
    %c0_84 = arith.constant 0 : index
    %c0_85 = arith.constant 0 : index
    %95 = vector.load %arg12[%c1_83, %c0_84, %c0_85] : memref<2x8x128xf32, #tpu.memory_space<vmem>>, vector<1x8x128xf32>
    %96 = vector.shape_cast %95 : vector<1x8x128xf32> to vector<8x128xf32>
    %c0_86 = arith.constant 0 : index
    %c0_87 = arith.constant 0 : index
    %c0_88 = arith.constant 0 : index
    %97 = vector.load %arg13[%c0_86, %c0_87, %c0_88] : memref<8x8x128xf32, #tpu.memory_space<vmem>>, vector<1x8x128xf32>
    %98 = vector.shape_cast %97 : vector<1x8x128xf32> to vector<8x128xf32>
    %cst_89 = arith.constant dense<0.000000e+00> : vector<8x128xf32>
    %99 = tpu.matmul %96, %94, %cst_89 {dimension_numbers = #tpu.dot_dimension_numbers<[1], [0], [0], [1], [0, 0, 1, 1], [], []>} : vector<8x128xf32>, vector<128x128xf32>, vector<8x128xf32> -> vector<8x128xf32>
    %100 = arith.addf %98, %99 : vector<8x128xf32>
    %101 = math.tanh %100 : vector<8x128xf32>
    %c1_90 = arith.constant 1 : index
    %c0_91 = arith.constant 0 : index
    %c0_92 = arith.constant 0 : index
    %102 = vector.load %arg13[%c1_90, %c0_91, %c0_92] : memref<8x8x128xf32, #tpu.memory_space<vmem>>, vector<1x8x128xf32>
    %103 = vector.shape_cast %102 : vector<1x8x128xf32> to vector<8x128xf32>
    %cst_93 = arith.constant dense<0.000000e+00> : vector<8x128xf32>
    %104 = tpu.matmul %101, %94, %cst_93 {dimension_numbers = #tpu.dot_dimension_numbers<[1], [0], [0], [1], [0, 0, 1, 1], [], []>} : vector<8x128xf32>, vector<128x128xf32>, vector<8x128xf32> -> vector<8x128xf32>
    %105 = arith.addf %103, %104 : vector<8x128xf32>
    %106 = math.tanh %105 : vector<8x128xf32>
    %c2_94 = arith.constant 2 : index
    %c0_95 = arith.constant 0 : index
    %c0_96 = arith.constant 0 : index
    %107 = vector.load %arg13[%c2_94, %c0_95, %c0_96] : memref<8x8x128xf32, #tpu.memory_space<vmem>>, vector<1x8x128xf32>
    %108 = vector.shape_cast %107 : vector<1x8x128xf32> to vector<8x128xf32>
    %cst_97 = arith.constant dense<0.000000e+00> : vector<8x128xf32>
    %109 = tpu.matmul %106, %94, %cst_97 {dimension_numbers = #tpu.dot_dimension_numbers<[1], [0], [0], [1], [0, 0, 1, 1], [], []>} : vector<8x128xf32>, vector<128x128xf32>, vector<8x128xf32> -> vector<8x128xf32>
    %110 = arith.addf %108, %109 : vector<8x128xf32>
    %111 = math.tanh %110 : vector<8x128xf32>
    %c3_98 = arith.constant 3 : index
    %c0_99 = arith.constant 0 : index
    %c0_100 = arith.constant 0 : index
    %112 = vector.load %arg13[%c3_98, %c0_99, %c0_100] : memref<8x8x128xf32, #tpu.memory_space<vmem>>, vector<1x8x128xf32>
    %113 = vector.shape_cast %112 : vector<1x8x128xf32> to vector<8x128xf32>
    %cst_101 = arith.constant dense<0.000000e+00> : vector<8x128xf32>
    %114 = tpu.matmul %111, %94, %cst_101 {dimension_numbers = #tpu.dot_dimension_numbers<[1], [0], [0], [1], [0, 0, 1, 1], [], []>} : vector<8x128xf32>, vector<128x128xf32>, vector<8x128xf32> -> vector<8x128xf32>
    %115 = arith.addf %113, %114 : vector<8x128xf32>
    %116 = math.tanh %115 : vector<8x128xf32>
    %c4_102 = arith.constant 4 : index
    %c0_103 = arith.constant 0 : index
    %c0_104 = arith.constant 0 : index
    %117 = vector.load %arg13[%c4_102, %c0_103, %c0_104] : memref<8x8x128xf32, #tpu.memory_space<vmem>>, vector<1x8x128xf32>
    %118 = vector.shape_cast %117 : vector<1x8x128xf32> to vector<8x128xf32>
    %cst_105 = arith.constant dense<0.000000e+00> : vector<8x128xf32>
    %119 = tpu.matmul %116, %94, %cst_105 {dimension_numbers = #tpu.dot_dimension_numbers<[1], [0], [0], [1], [0, 0, 1, 1], [], []>} : vector<8x128xf32>, vector<128x128xf32>, vector<8x128xf32> -> vector<8x128xf32>
    %120 = arith.addf %118, %119 : vector<8x128xf32>
    %121 = math.tanh %120 : vector<8x128xf32>
    %c5_106 = arith.constant 5 : index
    %c0_107 = arith.constant 0 : index
    %c0_108 = arith.constant 0 : index
    %122 = vector.load %arg13[%c5_106, %c0_107, %c0_108] : memref<8x8x128xf32, #tpu.memory_space<vmem>>, vector<1x8x128xf32>
    %123 = vector.shape_cast %122 : vector<1x8x128xf32> to vector<8x128xf32>
    %cst_109 = arith.constant dense<0.000000e+00> : vector<8x128xf32>
    %124 = tpu.matmul %121, %94, %cst_109 {dimension_numbers = #tpu.dot_dimension_numbers<[1], [0], [0], [1], [0, 0, 1, 1], [], []>} : vector<8x128xf32>, vector<128x128xf32>, vector<8x128xf32> -> vector<8x128xf32>
    %125 = arith.addf %123, %124 : vector<8x128xf32>
    %126 = math.tanh %125 : vector<8x128xf32>
    %c6_110 = arith.constant 6 : index
    %c0_111 = arith.constant 0 : index
    %c0_112 = arith.constant 0 : index
    %127 = vector.load %arg13[%c6_110, %c0_111, %c0_112] : memref<8x8x128xf32, #tpu.memory_space<vmem>>, vector<1x8x128xf32>
    %128 = vector.shape_cast %127 : vector<1x8x128xf32> to vector<8x128xf32>
    %cst_113 = arith.constant dense<0.000000e+00> : vector<8x128xf32>
    %129 = tpu.matmul %126, %94, %cst_113 {dimension_numbers = #tpu.dot_dimension_numbers<[1], [0], [0], [1], [0, 0, 1, 1], [], []>} : vector<8x128xf32>, vector<128x128xf32>, vector<8x128xf32> -> vector<8x128xf32>
    %130 = arith.addf %128, %129 : vector<8x128xf32>
    %131 = math.tanh %130 : vector<8x128xf32>
    %c7_114 = arith.constant 7 : index
    %c0_115 = arith.constant 0 : index
    %c0_116 = arith.constant 0 : index
    %132 = vector.load %arg13[%c7_114, %c0_115, %c0_116] : memref<8x8x128xf32, #tpu.memory_space<vmem>>, vector<1x8x128xf32>
    %133 = vector.shape_cast %132 : vector<1x8x128xf32> to vector<8x128xf32>
    %cst_117 = arith.constant dense<0.000000e+00> : vector<8x128xf32>
    %134 = tpu.matmul %131, %94, %cst_117 {dimension_numbers = #tpu.dot_dimension_numbers<[1], [0], [0], [1], [0, 0, 1, 1], [], []>} : vector<8x128xf32>, vector<128x128xf32>, vector<8x128xf32> -> vector<8x128xf32>
    %135 = arith.addf %133, %134 : vector<8x128xf32>
    %136 = math.tanh %135 : vector<8x128xf32>
    %c1_118 = arith.constant 1 : index
    %c0_119 = arith.constant 0 : index
    %c0_120 = arith.constant 0 : index
    %137 = vector.load %arg12[%c1_118, %c0_119, %c0_120] : memref<2x8x128xf32, #tpu.memory_space<vmem>>, vector<1x8x128xf32>
    %138 = vector.shape_cast %137 : vector<1x8x128xf32> to vector<8x128xf32>
    %139 = vector.shape_cast %136 : vector<8x128xf32> to vector<1x8x128xf32>
    tpu.vector_store %arg12[%c1_118, %c0_119, %c0_120], %139 {strides = array<i32>} : memref<2x8x128xf32, #tpu.memory_space<vmem>>, vector<1x8x128xf32>,
    %c0_i32_121 = arith.constant 0 : i32
    %140 = arith.cmpi eq, %arg1, %c0_i32_121 : i32
    %141 = arith.extui %140 : i1 to i32
    %c0_i32_122 = arith.constant 0 : i32
    %142 = arith.cmpi ne, %141, %c0_i32_122 : i32
    scf.if %142 {
      %c1_123 = arith.constant 1 : index
      %c0_124 = arith.constant 0 : index
      %c0_125 = arith.constant 0 : index
      %143 = vector.load %arg12[%c1_123, %c0_124, %c0_125] : memref<2x8x128xf32, #tpu.memory_space<vmem>>, vector<1x8x128xf32>
      %144 = vector.shape_cast %143 : vector<1x8x128xf32> to vector<8x128xf32>
      %c0_126 = arith.constant 0 : index
      %c0_127 = arith.constant 0 : index
      %145 = vector.load %arg9[%c0_126, %c0_127] : memref<128x4xf32, #tpu.memory_space<vmem>>, vector<128x4xf32>
      %cst_128 = arith.constant dense<0.000000e+00> : vector<8x4xf32>
      %146 = tpu.matmul %144, %145, %cst_128 {dimension_numbers = #tpu.dot_dimension_numbers<[1], [0], [0], [1], [0, 0, 1, 1], [], []>} : vector<8x128xf32>, vector<128x4xf32>, vector<8x4xf32> -> vector<8x4xf32>
      %c0_129 = arith.constant 0 : index
      %c0_130 = arith.constant 0 : index
      %147 = vector.load %arg10[%c0_129, %c0_130] : memref<1x4xf32, #tpu.memory_space<vmem>>, vector<1x4xf32>
      %148 = vector.broadcast %147 : vector<1x4xf32> to vector<8x4xf32>
      %149 = arith.addf %146, %148 : vector<8x4xf32>
      %c0_131 = arith.constant 0 : index
      %c0_132 = arith.constant 0 : index
      %150 = vector.load %arg11[%c0_131, %c0_132] : memref<8x4xf32, #tpu.memory_space<vmem>>, vector<8x4xf32>
      tpu.vector_store %arg11[%c0_131, %c0_132], %149 {strides = array<i32>} : memref<8x4xf32, #tpu.memory_space<vmem>>, vector<8x4xf32>,
    } else {
    }
    return
  }
  func.func @transform_0(%arg0: i32, %arg1: i32) -> (i32, i32, i32) {
    %c0_i32 = arith.constant 0 : i32
    %c0_i32_0 = arith.constant 0 : i32
    return %arg1, %arg0, %c0_i32 : i32, i32, i32
  }
  func.func @transform_1(%arg0: i32, %arg1: i32) -> (i32, i32) {
    %c0_i32 = arith.constant 0 : i32
    %c0_i32_0 = arith.constant 0 : i32
    %c0_i32_1 = arith.constant 0 : i32
    return %c0_i32, %c0_i32_0 : i32, i32
  }
  func.func @transform_2(%arg0: i32, %arg1: i32) -> (i32, i32) {
    %c0_i32 = arith.constant 0 : i32
    %c0_i32_0 = arith.constant 0 : i32
    %c0_i32_1 = arith.constant 0 : i32
    return %c0_i32, %c0_i32_0 : i32, i32
  }
  func.func @transform_3(%arg0: i32, %arg1: i32) -> (i32, i32) {
    %c0_i32 = arith.constant 0 : i32
    %c0_i32_0 = arith.constant 0 : i32
    %c0_i32_1 = arith.constant 0 : i32
    return %c0_i32, %c0_i32_0 : i32, i32
  }
  func.func @transform_4(%arg0: i32, %arg1: i32) -> (i32, i32, i32) {
    %c0_i32 = arith.constant 0 : i32
    %c0_i32_0 = arith.constant 0 : i32
    %c0_i32_1 = arith.constant 0 : i32
    %c0_i32_2 = arith.constant 0 : i32
    return %c0_i32, %c0_i32_0, %c0_i32_1 : i32, i32, i32
  }
  func.func @transform_5(%arg0: i32, %arg1: i32) -> (i32, i32, i32) {
    %c0_i32 = arith.constant 0 : i32
    %c0_i32_0 = arith.constant 0 : i32
    %c0_i32_1 = arith.constant 0 : i32
    %c0_i32_2 = arith.constant 0 : i32
    return %c0_i32, %c0_i32_0, %c0_i32_1 : i32, i32, i32
  }
  func.func @transform_6(%arg0: i32, %arg1: i32) -> (i32, i32, i32) {
    %c0_i32 = arith.constant 0 : i32
    %c0_i32_0 = arith.constant 0 : i32
    %c0_i32_1 = arith.constant 0 : i32
    %c0_i32_2 = arith.constant 0 : i32
    return %c0_i32, %c0_i32_0, %c0_i32_1 : i32, i32, i32
  }
  func.func @transform_7(%arg0: i32, %arg1: i32) -> (i32, i32) {
    %c0_i32 = arith.constant 0 : i32
    %c0_i32_0 = arith.constant 0 : i32
    %c0_i32_1 = arith.constant 0 : i32
    return %c0_i32, %c0_i32_0 : i32, i32
  }
  func.func @transform_8(%arg0: i32, %arg1: i32) -> (i32, i32) {
    %c0_i32 = arith.constant 0 : i32
    %c0_i32_0 = arith.constant 0 : i32
    %c0_i32_1 = arith.constant 0 : i32
    return %c0_i32, %c0_i32_0 : i32, i32
  }
  func.func @transform_9(%arg0: i32, %arg1: i32) -> (i32, i32) {
    %c0_i32 = arith.constant 0 : i32
    %c0_i32_0 = arith.constant 0 : i32
    return %arg0, %c0_i32 : i32, i32
  }
}

</mosaic_0001>

<bundles_post_ra>
// kernel: tpu_custom_call.1
= control target key start
LH: loop header
LB: loop body
LE: loop exit
PB: predicated region body
PF: predicated region fallthrough
CT: control target
= control target key end

     0   :  { %14 = vsyncpa [#allocation6], 0  ;;  %s3947_s0 = inlined_call_operand.hbm [shape: f32[8,8,16], index: 0, kind: input, shape index: {}]   ;;  %s3948_s1 = inlined_call_operand.hbm [shape: f32[16,128], index: 1, kind: input, shape index: {}]   ;;  %s3949_s2 = inlined_call_operand.vmem [shape: f32[128,128], index: 2, kind: input, shape index: {}]   ;;  %s3950_s3 = inlined_call_operand.vmem [shape: f32[1,128], index: 3, kind: input, shape index: {}]   ;;  %s3951_s4 = inlined_call_operand.hbm [shape: f32[1,128,128], index: 4, kind: input, shape index: {}]   ;;  %s3952_s5 = inlined_call_operand.hbm [shape: f32[1,128,128], index: 5, kind: input, shape index: {}]   ;;  %s3953_s6 = inlined_call_operand.vmem [shape: f32[1,1,128], index: 6, kind: input, shape index: {}]   ;;  %s3954_s7 = inlined_call_operand.vmem [shape: f32[128,4], index: 7, kind: input, shape index: {}]   ;;  %s3955_s8 = inlined_call_operand.vmem [shape: f32[1,4], index: 8, kind: input, shape index: {}]   ;;  %s3956_s9 = inlined_call_operand.vmem [shape: f32[8,4], index: 9, kind: output, shape index: {}]  }
   0x1   :  { %15 = vsyncpa [#allocation8], 0 }
   0x2   :  { %16 = vsyncpa [#allocation11], 0  ;;  %s3293_s30 = smov [#allocation7]   ;;  %s3294_s11 = smov [#allocation5]  }
   0x3   :  { %s34_s10 = sshll.u32 %s3293_s30, 4  ;;  %s22_s12 = sshll.u32 %s3294_s11, 4  ;;  %s35_s10 = int_to_ptr.vmem [resolvable:$true] %s34_s10  ;;  %s3352_s12 = int_to_ptr.vmem [resolvable:$true] %s22_s12 }
   0x4   :  { %s3199_s15 = scalar_lea.hbm %s3948_s1, 256 }
   0x5   :  { %p3200_p0 = scmp.ne.s32.totalorder %s3948_s1, %s3199_s15  ;;  %p3203_p1 = scmp.lt.u32.totalorder %s3199_s15, %s3948_s1 }
   0x7   :  { %p3205_p2 = pnand %p3203_p1, %p3200_p0 }
   0x9   :  { %3208 = shalt.err (!%p3205_p2)
}
   0xa   :  { %s3209_s20 = scalar_lea.vmem %s35_s10, 256  ;;  %p3214_p4 = scmp.lt.s32.totalorder %s35_s10, %s35_s10 }
   0xb   :  { %p3210_p3 = scmp.ne.s32.totalorder %s35_s10, %s3209_s20  ;;  %p3215_p5 = scmp.lt.s32.totalorder %s3209_s20, %s3209_s20 }
   0xd   :  { %p3216_p6 = por %p3215_p5, %p3214_p4 }
   0xf   :  { %p3217_p7 = pnand %p3216_p6, %p3210_p3 }
  0x11   :  { %3220 = shalt.err (!%p3217_p7)
}
  0x12   :  { %s3295_s21 = smov 128   ;;  %s3296_s22 = smov 8  }
  0x13   :  { %40 = dma.hbm_to_vmem [thread:$0]  %s3948_s1, 256, %s35_s10, [#allocation8], %s3295_s21, %s3295_s21, %s3296_s22  }
  0x14   :  { %s3221_s27 = scalar_lea.hbm %s3947_s0, 1024 }
  0x15   :  { %p3222_p8 = scmp.ne.s32.totalorder %s3947_s0, %s3221_s27  ;;  %p3225_p9 = scmp.lt.u32.totalorder %s3221_s27, %s3947_s0 }
  0x17   :  { %p3227_p10 = pnand %p3225_p9, %p3222_p8 }
  0x19   :  { %3230 = shalt.err (!%p3227_p10)
}
  0x1a   :  { %s3231_s13 = scalar_lea.vmem %s3352_s12, 1024  ;;  %p3236_p12 = scmp.lt.s32.totalorder %s3352_s12, %s3352_s12 }
  0x1b   :  { %p3232_p11 = scmp.ne.s32.totalorder %s3352_s12, %s3231_s13  ;;  %p3237_p13 = scmp.lt.s32.totalorder %s3231_s13, %s3231_s13 }
  0x1d   :  { %p3238_p0 = por %p3237_p13, %p3236_p12 }
  0x1f   :  { %p3239_p1 = pnand %p3238_p0, %p3232_p11 }
  0x21   :  { %3242 = shalt.err (!%p3239_p1)
}
  0x22   :  { %28 = dma.hbm_to_vmem [thread:$0]  %s3947_s0, 1024, %s3352_s12, [#allocation6], %s3295_s21, %s3295_s21, %s3296_s22  }
  0x23   :  { %s3297_s14 = smov [#allocation9]   ;;  %s3298_s16 = smov [#allocation10]  }
  0x24   :  { %s50_s15 = sshll.u32 %s3297_s14, 4  ;;  %s62_s17 = sshll.u32 %s3298_s16, 4  ;;  %s51_s15 = int_to_ptr.vmem [resolvable:$true] %s50_s15  ;;  %s3389_s17 = int_to_ptr.vmem [resolvable:$true] %s62_s17 }
  0x25   :  { %s3243_s20 = scalar_lea.hbm %s3951_s4, 2048 }
  0x26   :  { %p3244_p2 = scmp.ne.s32.totalorder %s3951_s4, %s3243_s20  ;;  %p3247_p3 = scmp.lt.u32.totalorder %s3243_s20, %s3951_s4 }
  0x28   :  { %p3249_p4 = pnand %p3247_p3, %p3244_p2 }
  0x2a   :  { %3252 = shalt.err (!%p3249_p4)
}
  0x2b   :  { %s3253_s0 = scalar_lea.vmem %s51_s15, 2048  ;;  %p3258_p6 = scmp.lt.s32.totalorder %s51_s15, %s51_s15 }
  0x2c   :  { %p3254_p5 = scmp.ne.s32.totalorder %s51_s15, %s3253_s0  ;;  %p3259_p7 = scmp.lt.s32.totalorder %s3253_s0, %s3253_s0 }
  0x2e   :  { %p3260_p8 = por %p3259_p7, %p3258_p6 }
  0x30   :  { %p3261_p9 = pnand %p3260_p8, %p3254_p5 }
  0x32   :  { %3264 = shalt.err (!%p3261_p9)
}
  0x33   :  { %56 = dma.hbm_to_vmem [thread:$0]  %s3951_s4, 2048, %s51_s15, [#allocation8], %s3295_s21, %s3295_s21, %s3296_s22  }
  0x34   :  { %s3265_s30 = scalar_lea.hbm %s3952_s5, 2048 }
  0x35   :  { %p3266_p10 = scmp.ne.s32.totalorder %s3952_s5, %s3265_s30  ;;  %p3269_p11 = scmp.lt.u32.totalorder %s3265_s30, %s3952_s5 }
  0x37   :  { %p3271_p12 = pnand %p3269_p11, %p3266_p10 }
  0x39   :  { %3274 = shalt.err (!%p3271_p12)
}
  0x3a   :  { %s3275_s14 = scalar_lea.vmem %s3389_s17, 2048  ;;  %p3280_p0 = scmp.lt.s32.totalorder %s3389_s17, %s3389_s17 }
  0x3b   :  { %p3276_p13 = scmp.ne.s32.totalorder %s3389_s17, %s3275_s14  ;;  %p3281_p1 = scmp.lt.s32.totalorder %s3275_s14, %s3275_s14 }
  0x3d   :  { %p3282_p2 = por %p3281_p1, %p3280_p0 }
  0x3f   :  { %p3283_p3 = pnand %p3282_p2, %p3276_p13 }
  0x41   :  { %3286 = shalt.err (!%p3283_p3)
}
  0x42   :  { %68 = dma.hbm_to_vmem [thread:$0]  %s3952_s5, 2048, %s3389_s17, [#allocation11], %s3295_s21, %s3295_s21, %s3296_s22  }
  0x43   :  { %3287 = dma.done.wait [#allocation6], 1024  }
  0x44   :  { %3288 = vsyncadd [#allocation6], 4294966272 }
  0x45   :  { %3289 = dma.done.wait [#allocation8], 2304  }
  0x46   :  { %3290 = vsyncadd [#allocation8], 4294964992 }
  0x47   :  { %3291 = dma.done.wait [#allocation11], 2048  }
  0x48   :  { %3292 = vsyncadd [#allocation11], 4294965248  ;;  %v3299_v0 = vmov 0.0|0.0   ;;  %vm3300_vm0 = vmmov 0   ;;  %v3301_v1 = vmov 0.0   ;;  %v248_v2 = vld [vmem:[%s3949_s2] sm:$0xff] }
  0x49   :  { %2718 = vmatprep.subr.bf16.mxu1 %v3299_v0  ;;  %2107 = vmatprep.mubr.msk.f32.mxu1 %vm3300_vm0, %v3301_v1  ;;  %v249_v3 = vld [vmem:[%s3949_s2 + $0x8] sm:$0xff]  ;;  %v250_v4 = vld [vmem:[%s3949_s2 + $0x10] sm:$0xff]  ;;  %v251_v6 = vld [vmem:[%s3949_s2 + $0x18] sm:$0xff]  ;;  %vm110_vm1 = vcmask 130048   ;;  %vm1716_vm2 = vcmask 31744  }
  0x4a   :  { %v3438_v5 = vpack.c.bf16 %v249_v3, %v248_v2  ;;  %v3444_v7 = vpack.c.bf16 %v251_v6, %v250_v4  ;;  %v252_v8 = vld [vmem:[%s3949_s2 + $0x20] sm:$0xff]  ;;  %v253_v9 = vld [vmem:[%s3949_s2 + $0x28] sm:$0xff]  ;;  %v254_v15 = vld [vmem:[%s3949_s2 + $0x30] sm:$0xff] }
  0x4b   :  { %v101_v10 = vld [vmem:[#allocation7] sm:$0xff]  ;;  %v102_v11 = vld [vmem:[#allocation7 + $0x8] sm:$0xff]  ;;  %v3455_v14 = vpack.c.bf16 %v253_v9, %v252_v8  ;;  %v255_v16 = vld [vmem:[%s3949_s2 + $0x38] sm:$0xff] }
  0x4c   :  { %2720 = vmatpush3.bf16.msra.mxu1 %v3438_v5  ;;  %v2714_v12 = vpack.c.bf16 %v102_v11, %v101_v10  ;;  %v93_v13 = vld [vmem:[#allocation5] sm:$0xff]  ;;  %v94_v17 = vld [vmem:[#allocation5 + $0x8] sm:$0xff]  ;;  %v3466_v18 = vpack.c.bf16 %v255_v16, %v254_v15  ;;  %v258_v22 = vld [vmem:[%s3949_s2 + $0x50] sm:$0xff] }
  0x4d   :  { %2721 = vmatprep.subr.bf16.mxu1 %v3299_v0  ;;  %2063 = vmatprep.mubr.msk.f32.mxu0 %vm110_vm1, %v93_v13  ;;  %v256_v19 = vld [vmem:[%s3949_s2 + $0x40] sm:$0xff]  ;;  %v257_v20 = vld [vmem:[%s3949_s2 + $0x48] sm:$0xff]  ;;  %v259_v23 = vld [vmem:[%s3949_s2 + $0x58] sm:$0xff] }
  0x4e   :  { %2715 = vmatprep.subr.bf16.mxu0 %v2714_v12  ;;  %v3479_v21 = vpack.c.bf16 %v257_v20, %v256_v19  ;;  %v3491_v24 = vpack.c.bf16 %v259_v23, %v258_v22  ;;  %v260_v25 = vld [vmem:[%s3949_s2 + $0x60] sm:$0xff]  ;;  %v261_v26 = vld [vmem:[%s3949_s2 + $0x68] sm:$0xff]  ;;  %v262_v28 = vld [vmem:[%s3949_s2 + $0x70] sm:$0xff] }
  0x4f   :  { %2717 = vmatpush3.bf16.msra.mxu0 %v2714_v12  ;;  %v3503_v27 = vpack.c.bf16 %v261_v26, %v260_v25  ;;  %v263_v29 = vld [vmem:[%s3949_s2 + $0x78] sm:$0xff]  ;;  %v95_v31 = vld [vmem:[#allocation5 + $0x10] sm:$0xff]  ;;  %v97_v33 = vld [vmem:[#allocation5 + $0x20] sm:$0xff] }
  0x50   :  { %2723 = vmatpush3.bf16.msra.mxu1 %v3444_v7  ;;  %2742 = vmatprep.subr.bf16.mxu0 %v3299_v0  ;;  %v3515_v30 = vpack.c.bf16 %v263_v29, %v262_v28  ;;  %v96_v32 = vld [vmem:[#allocation5 + $0x18] sm:$0xff]  ;;  %v98_v34 = vld [vmem:[#allocation5 + $0x28] sm:$0xff]  ;;  %v99_v35 = vld [vmem:[#allocation5 + $0x30] sm:$0xff] }
  0x51   :  { %2724 = vmatprep.subr.bf16.mxu1 %v3299_v0  ;;  %v100_v36 = vld [vmem:[#allocation5 + $0x38] sm:$0xff]  ;;  %v3558_v39 = vld [vmem:[%s3950_s3] ss:$0 sm:$0xff]  ;;  %v884_v20 = vld [vmem:[#allocation9 + $0x20] sm:$0xff] }
  0x52   :  { %2064 = vmatmul.mubr.msk.f32.vlgmr.msra.gmra.mrb[0].mxu0 %vm110_vm1, %v94_v17  ;;  %v882_v16 = vld [vmem:[#allocation9 + $0x10] sm:$0xff]  ;;  %v883_v17 = vld [vmem:[#allocation9 + $0x18] sm:$0xff]  ;;  %v888_v26 = vld [vmem:[#allocation9 + $0x40] sm:$0xff] }
  0x53   :  { %2744 = vmatpush3.bf16.msra.mxu0 %v3438_v5  ;;  %2066 = vmatprep.mubr.msk.f32.mxu0 %vm110_vm1, %v95_v31  ;;  %v886_v23 = vld [vmem:[#allocation9 + $0x30] sm:$0xff] }
  0x54   :  { %2726 = vmatpush3.bf16.msra.mxu1 %v3455_v14  ;;  %2745 = vmatprep.subr.bf16.mxu0 %v3299_v0  ;;  %v890_v29 = vld [vmem:[#allocation9 + $0x50] sm:$0xff] }
  0x55   :  { %2727 = vmatprep.subr.bf16.mxu1 %v3299_v0 }
  0x56   :  { %2067 = vmatmul.mubr.msk.f32.gmra.mrb[2].mxu0 %vm110_vm1, %v96_v32  ;;  %v892_v32 = vld [vmem:[#allocation9 + $0x60] sm:$0xff] }
  0x57   :  { %2747 = vmatpush3.bf16.msra.mxu0 %v3444_v7  ;;  %2069 = vmatprep.mubr.msk.f32.mxu0 %vm110_vm1, %v97_v33  ;;  %v893_v33 = vld [vmem:[#allocation9 + $0x68] sm:$0xff] }
  0x58   :  { %2729 = vmatpush3.bf16.msra.mxu1 %v3466_v18  ;;  %2748 = vmatprep.subr.bf16.mxu0 %v3299_v0 }
  0x59   :  { %2730 = vmatprep.subr.bf16.mxu1 %v3299_v0 }
  0x5a   :  { %2070 = vmatmul.mubr.msk.f32.gmra.mrb[4].mxu0 %vm110_vm1, %v98_v34  ;;  %v2934_v34 = vpack.c.bf16 %v893_v33, %v892_v32 }
  0x5b   :  { %2750 = vmatpush3.bf16.msra.mxu0 %v3455_v14  ;;  %2072 = vmatprep.mubr.msk.f32.mxu0 %vm110_vm1, %v99_v35  ;;  %v894_v35 = vld [vmem:[#allocation9 + $0x70] sm:$0xff] }
  0x5c   :  { %2732 = vmatpush3.bf16.msra.mxu1 %v3479_v21  ;;  %2751 = vmatprep.subr.bf16.mxu0 %v3299_v0 }
  0x5d   :  { %2733 = vmatprep.subr.bf16.mxu1 %v3299_v0 }
  0x5e   :  { %2073 = vmatmul.mubr.msk.f32.gmra.mrb[6].mxu0 %vm110_vm1, %v100_v36  ;;  %v895_v36 = vld [vmem:[#allocation9 + $0x78] sm:$0xff] }
  0x5f   :  { %2753 = vmatpush3.bf16.msra.mxu0 %v3466_v18  ;;  %2142 = vmatprep.mubr.msk.f32.mxu0 %vm3300_vm0, %v3301_v1 }
  0x60   :  { %2735 = vmatpush3.bf16.msra.mxu1 %v3491_v24  ;;  %2754 = vmatprep.subr.bf16.mxu0 %v3299_v0 }
  0x61   :  { %2736 = vmatprep.subr.bf16.mxu1 %v3299_v0 }
  0x63   :  { %2756 = vmatpush3.bf16.msra.mxu0 %v3479_v21 }
  0x64   :  { %2738 = vmatpush3.bf16.msra.mxu1 %v3503_v27  ;;  %2757 = vmatprep.subr.bf16.mxu0 %v3299_v0 }
  0x65   :  { %2739 = vmatprep.subr.bf16.mxu1 %v3299_v0 }
  0x67   :  { %2759 = vmatpush3.bf16.msra.mxu0 %v3491_v24 }
  0x68   :  { %2741 = vmatpush3.bf16.msra.mxu1 %v3515_v30  ;;  %2760 = vmatprep.subr.bf16.mxu0 %v3299_v0 }
  0x69   :  { %2766 = vmatprep.subr.bf16.mxu1 %v3299_v0 }
  0x6b   :  { %2108 = vmatmul.mubr.f32.vlgmr.msra.gmra.mrb[0].mxu1 %v3301_v1  ;;  %2762 = vmatpush3.bf16.msra.mxu0 %v3503_v27 }
  0x6c   :  { %2768 = vmatpush3.bf16.msra.mxu1 %v3438_v5  ;;  %2177 = vmatprep.mubr.msk.f32.mxu1 %vm3300_vm0, %v3301_v1 }
  0x6d   :  { %2769 = vmatprep.subr.bf16.mxu1 %v3299_v0  ;;  %2763 = vmatprep.subr.bf16.mxu0 %v3299_v0 }
  0x6f   :  { %2765 = vmatpush3.bf16.msra.mxu0 %v3515_v30 }
  0x70   :  { %2771 = vmatpush3.bf16.msra.mxu1 %v3444_v7  ;;  %2790 = vmatprep.subr.bf16.mxu0 %v3299_v0 }
  0x71   :  { %2772 = vmatprep.subr.bf16.mxu1 %v3299_v0 }
  0x74   :  { %2774 = vmatpush3.bf16.msra.mxu1 %v3455_v14 }
  0x75   :  { %2775 = vmatprep.subr.bf16.mxu1 %v3299_v0 }
  0x78   :  { %2777 = vmatpush3.bf16.msra.mxu1 %v3466_v18 }
  0x79   :  { %2778 = vmatprep.subr.bf16.mxu1 %v3299_v0 }
  0x7c   :  { %2780 = vmatpush3.bf16.msra.mxu1 %v3479_v21 }
  0x7d   :  { %2781 = vmatprep.subr.bf16.mxu1 %v3299_v0 }
  0x80   :  { %2783 = vmatpush3.bf16.msra.mxu1 %v3491_v24 }
  0x81   :  { %2784 = vmatprep.subr.bf16.mxu1 %v3299_v0 }
  0x84   :  { %2786 = vmatpush3.bf16.msra.mxu1 %v3503_v27 }
  0x85   :  { %2787 = vmatprep.subr.bf16.mxu1 %v3299_v0 }
  0x88   :  { %2789 = vmatpush3.bf16.msra.mxu1 %v3515_v30 }
  0x89   :  { %2814 = vmatprep.subr.bf16.mxu1 %v3299_v0 }
 0x125   :  { %v2065_v37 = vpop.f32.mrb[0].mxu0 }
 0x126   :  { %v201_v38 = vpop.f32.mrb[1].mxu0  ;;  %v207_v51 = vadd.f32 %v2065_v37, %v3558_v39  ;;  %v2938_v37 = vpack.c.bf16 %v895_v36, %v894_v35 }
 0x127   :  { %v202_v40 = vadd.f32 %v3558_v39, %v201_v38  ;;  %v1016_v38 = vld [vmem:[#allocation10] sm:$0xff] }
 0x129   :  { %v2068_v45 = vpop.f32.mrb[2].mxu0 }
 0x12a   :  { %v211_v46 = vpop.f32.mrb[3].mxu0  ;;  %v217_v61 = vadd.f32 %v2068_v45, %v3558_v39  ;;  %v1020_v45 = vld [vmem:[#allocation10 + $0x20] sm:$0xff] }
 0x12b   :  { %v212_v56 = vadd.f32 %v3558_v39, %v211_v46  ;;  %v1021_v46 = vld [vmem:[#allocation10 + $0x28] sm:$0xff] }
 0x12d   :  { %v3582_v47 = vpop.f32.mrb[4].mxu0 }
 0x12e   :  { %v3584_v48 = vpop.f32.mrb[5].mxu0  ;;  %v227_v12 = vadd.f32 %v3582_v47, %v3558_v39  ;;  %v3694_v47 = vpack.c.bf16 %v1021_v46, %v1020_v45 }
 0x12f   :  { %v222_v4 = vadd.f32 %v3558_v39, %v3584_v48  ;;  %v1022_v48 = vld [vmem:[#allocation10 + $0x30] sm:$0xff] }
 0x131   :  { %v3586_v49 = vpop.f32.mrb[6].mxu0 }
 0x132   :  { %v3588_v50 = vpop.f32.mrb[7].mxu0 }
 0x13e   :  { %v332_v41 = vpop.f32.mrb[0].mxu1 }
 0x13f   :  { %v336_v42 = vadd.f32 %v332_v41, %v202_v40  ;;  %v2109_v43 = vpop.f32.mrb[1].mxu1  ;;  %v1017_v40 = vld [vmem:[#allocation10 + $0x8] sm:$0xff] }
 0x140   :  { %v3686_v41 = vpack.c.bf16 %v1017_v40, %v1016_v38  ;;  %v1019_v43 = vld [vmem:[#allocation10 + $0x18] sm:$0xff] }
 0x141   :  { %3167 = vtanh.f32 %v336_v42  ;;  %v1018_v42 = vld [vmem:[#allocation10 + $0x10] sm:$0xff] }
 0x14b   :  { %v3561_v44 = vpop.eup %3167 }
 0x14c   :  { %2143 = vmatmul.mubr.f32.vlgmr.msra.gmra.mrb[8].mxu0 %v3561_v44 }
 0x14d   :  { %2792 = vmatpush3.bf16.msra.mxu0 %v3438_v5  ;;  %2212 = vmatprep.mubr.msk.f32.mxu0 %vm3300_vm0, %v3301_v1 }
 0x14e   :  { %2793 = vmatprep.subr.bf16.mxu0 %v3299_v0 }
 0x151   :  { %2795 = vmatpush3.bf16.msra.mxu0 %v3444_v7 }
 0x152   :  { %2796 = vmatprep.subr.bf16.mxu0 %v3299_v0 }
 0x155   :  { %2798 = vmatpush3.bf16.msra.mxu0 %v3455_v14 }
 0x156   :  { %2799 = vmatprep.subr.bf16.mxu0 %v3299_v0 }
 0x159   :  { %2801 = vmatpush3.bf16.msra.mxu0 %v3466_v18 }
 0x15a   :  { %2802 = vmatprep.subr.bf16.mxu0 %v3299_v0 }
 0x15d   :  { %2804 = vmatpush3.bf16.msra.mxu0 %v3479_v21 }
 0x15e   :  { %2805 = vmatprep.subr.bf16.mxu0 %v3299_v0 }
 0x161   :  { %2807 = vmatpush3.bf16.msra.mxu0 %v3491_v24 }
 0x162   :  { %2808 = vmatprep.subr.bf16.mxu0 %v3299_v0 }
 0x165   :  { %2810 = vmatpush3.bf16.msra.mxu0 %v3503_v27 }
 0x166   :  { %2811 = vmatprep.subr.bf16.mxu0 %v3299_v0 }
 0x169   :  { %2813 = vmatpush3.bf16.msra.mxu0 %v3515_v30 }
 0x16a   :  { %2838 = vmatprep.subr.bf16.mxu0 %v3299_v0 }
 0x21f   :  { %v407_v52 = vpop.f32.mrb[8].mxu0 }
 0x220   :  { %v411_v53 = vadd.f32 %v407_v52, %v207_v51  ;;  %v2144_v54 = vpop.f32.mrb[9].mxu0  ;;  %v1023_v51 = vld [vmem:[#allocation10 + $0x38] sm:$0xff] }
 0x221   :  { %v3698_v52 = vpack.c.bf16 %v1023_v51, %v1022_v48  ;;  %v1025_v54 = vld [vmem:[#allocation10 + $0x48] sm:$0xff] }
 0x222   :  { %3169 = vtanh.f32 %v411_v53  ;;  %v1024_v53 = vld [vmem:[#allocation10 + $0x40] sm:$0xff] }
 0x22c   :  { %v3591_v55 = vpop.eup %3169 }
 0x22d   :  { %2178 = vmatmul.mubr.f32.vlgmr.msra.gmra.mrb[2].mxu1 %v3591_v55 }
 0x22e   :  { %2816 = vmatpush3.bf16.msra.mxu1 %v3438_v5  ;;  %2247 = vmatprep.mubr.msk.f32.mxu1 %vm3300_vm0, %v3301_v1 }
 0x22f   :  { %2817 = vmatprep.subr.bf16.mxu1 %v3299_v0 }
 0x232   :  { %2819 = vmatpush3.bf16.msra.mxu1 %v3444_v7 }
 0x233   :  { %2820 = vmatprep.subr.bf16.mxu1 %v3299_v0 }
 0x236   :  { %2822 = vmatpush3.bf16.msra.mxu1 %v3455_v14 }
 0x237   :  { %2823 = vmatprep.subr.bf16.mxu1 %v3299_v0 }
 0x23a   :  { %2825 = vmatpush3.bf16.msra.mxu1 %v3466_v18 }
 0x23b   :  { %2826 = vmatprep.subr.bf16.mxu1 %v3299_v0 }
 0x23e   :  { %2828 = vmatpush3.bf16.msra.mxu1 %v3479_v21 }
 0x23f   :  { %2829 = vmatprep.subr.bf16.mxu1 %v3299_v0 }
 0x242   :  { %2831 = vmatpush3.bf16.msra.mxu1 %v3491_v24 }
 0x243   :  { %2832 = vmatprep.subr.bf16.mxu1 %v3299_v0 }
 0x246   :  { %2834 = vmatpush3.bf16.msra.mxu1 %v3503_v27 }
 0x247   :  { %2835 = vmatprep.subr.bf16.mxu1 %v3299_v0 }
 0x24a   :  { %2837 = vmatpush3.bf16.msra.mxu1 %v3515_v30 }
 0x24b   :  { %2862 = vmatprep.subr.bf16.mxu1 %v3299_v0 }
 0x300   :  { %v483_v57 = vpop.f32.mrb[2].mxu1 }
 0x301   :  { %v487_v58 = vadd.f32 %v483_v57, %v212_v56  ;;  %v2179_v59 = vpop.f32.mrb[3].mxu1  ;;  %v1026_v56 = vld [vmem:[#allocation10 + $0x50] sm:$0xff]  ;;  %v1027_v57 = vld [vmem:[#allocation10 + $0x58] sm:$0xff] }
 0x302   :  { %v1028_v59 = vld [vmem:[#allocation10 + $0x60] sm:$0xff] }
 0x303   :  { %3171 = vtanh.f32 %v487_v58  ;;  %v3706_v58 = vpack.c.bf16 %v1027_v57, %v1026_v56  ;;  %v1626_v56 = vld [vmem:[%s3954_s7 + $0x18] sm:$0xff] }
 0x30d   :  { %v3613_v60 = vpop.eup %3171 }
 0x30e   :  { %2213 = vmatmul.mubr.f32.vlgmr.msra.gmra.mrb[10].mxu0 %v3613_v60 }
 0x30f   :  { %2840 = vmatpush3.bf16.msra.mxu0 %v3438_v5  ;;  %2282 = vmatprep.mubr.msk.f32.mxu0 %vm3300_vm0, %v3301_v1 }
 0x310   :  { %2841 = vmatprep.subr.bf16.mxu0 %v3299_v0 }
 0x313   :  { %2843 = vmatpush3.bf16.msra.mxu0 %v3444_v7 }
 0x314   :  { %2844 = vmatprep.subr.bf16.mxu0 %v3299_v0 }
 0x317   :  { %2846 = vmatpush3.bf16.msra.mxu0 %v3455_v14 }
 0x318   :  { %2847 = vmatprep.subr.bf16.mxu0 %v3299_v0 }
 0x31b   :  { %2849 = vmatpush3.bf16.msra.mxu0 %v3466_v18 }
 0x31c   :  { %2850 = vmatprep.subr.bf16.mxu0 %v3299_v0 }
 0x31f   :  { %2852 = vmatpush3.bf16.msra.mxu0 %v3479_v21 }
 0x320   :  { %2853 = vmatprep.subr.bf16.mxu0 %v3299_v0 }
 0x323   :  { %2855 = vmatpush3.bf16.msra.mxu0 %v3491_v24 }
 0x324   :  { %2856 = vmatprep.subr.bf16.mxu0 %v3299_v0 }
 0x327   :  { %2858 = vmatpush3.bf16.msra.mxu0 %v3503_v27 }
 0x328   :  { %2859 = vmatprep.subr.bf16.mxu0 %v3299_v0 }
 0x32b   :  { %2861 = vmatpush3.bf16.msra.mxu0 %v3515_v30 }
 0x32c   :  { %2886 = vmatprep.subr.bf16.mxu0 %v3299_v0 }
 0x3e1   :  { %v559_v62 = vpop.f32.mrb[10].mxu0 }
 0x3e2   :  { %v563_v63 = vadd.f32 %v559_v62, %v217_v61  ;;  %v2214_v2 = vpop.f32.mrb[11].mxu0  ;;  %v1030_v62 = vld [vmem:[#allocation10 + $0x70] sm:$0xff] }
 0x3e4   :  { %3173 = vtanh.f32 %v563_v63  ;;  %v1031_v63 = vld [vmem:[#allocation10 + $0x78] sm:$0xff] }
 0x3e5   :  { %v3714_v2 = vpack.c.bf16 %v1031_v63, %v1030_v62  ;;  %v1631_v63 = vld [vmem:[%s3954_s7 + $0x40] sm:$0xff] }
 0x3ee   :  { %v3635_v3 = vpop.eup %3173 }
 0x3ef   :  { %2248 = vmatmul.mubr.f32.vlgmr.msra.gmra.mrb[4].mxu1 %v3635_v3 }
 0x3f0   :  { %2864 = vmatpush3.bf16.msra.mxu1 %v3438_v5  ;;  %2317 = vmatprep.mubr.msk.f32.mxu1 %vm3300_vm0, %v3301_v1 }
 0x3f1   :  { %2865 = vmatprep.subr.bf16.mxu1 %v3299_v0 }
 0x3f4   :  { %2867 = vmatpush3.bf16.msra.mxu1 %v3444_v7 }
 0x3f5   :  { %2868 = vmatprep.subr.bf16.mxu1 %v3299_v0 }
 0x3f8   :  { %2870 = vmatpush3.bf16.msra.mxu1 %v3455_v14 }
 0x3f9   :  { %2871 = vmatprep.subr.bf16.mxu1 %v3299_v0 }
 0x3fc   :  { %2873 = vmatpush3.bf16.msra.mxu1 %v3466_v18 }
 0x3fd   :  { %2874 = vmatprep.subr.bf16.mxu1 %v3299_v0 }
 0x400   :  { %2876 = vmatpush3.bf16.msra.mxu1 %v3479_v21 }
 0x401   :  { %2877 = vmatprep.subr.bf16.mxu1 %v3299_v0 }
 0x404   :  { %2879 = vmatpush3.bf16.msra.mxu1 %v3491_v24 }
 0x405   :  { %2880 = vmatprep.subr.bf16.mxu1 %v3299_v0 }
 0x408   :  { %2882 = vmatpush3.bf16.msra.mxu1 %v3503_v27 }
 0x409   :  { %2883 = vmatprep.subr.bf16.mxu1 %v3299_v0 }
 0x40c   :  { %2885 = vmatpush3.bf16.msra.mxu1 %v3515_v30 }
 0x4c2   :  { %v635_v6 = vpop.f32.mrb[4].mxu1 }
 0x4c3   :  { %v639_v8 = vadd.f32 %v635_v6, %v222_v4  ;;  %v2249_v9 = vpop.f32.mrb[5].mxu1 }
 0x4c5   :  { %3175 = vtanh.f32 %v639_v8 }
 0x4cf   :  { %v3657_v10 = vpop.eup %3175 }
 0x4d0   :  { %2283 = vmatmul.mubr.f32.vlgmr.msra.gmra.mrb[12].mxu0 %v3657_v10 }
 0x4d1   :  { %2888 = vmatpush3.bf16.msra.mxu0 %v3438_v5  ;;  %2352 = vmatprep.mubr.msk.f32.mxu0 %vm3300_vm0, %v3301_v1  ;;  %v880_v5 = vld [vmem:[#allocation9] sm:$0xff] }
 0x4d2   :  { %2889 = vmatprep.subr.bf16.mxu0 %v3299_v0 }
 0x4d5   :  { %2891 = vmatpush3.bf16.msra.mxu0 %v3444_v7  ;;  %v881_v7 = vld [vmem:[#allocation9 + $0x8] sm:$0xff] }
 0x4d6   :  { %2892 = vmatprep.subr.bf16.mxu0 %v3299_v0  ;;  %v2910_v11 = vpack.c.bf16 %v881_v7, %v880_v5 }
 0x4d8   :  { %2911 = vmatprep.subr.bf16.mxu1 %v2910_v11 }
 0x4d9   :  { %2894 = vmatpush3.bf16.msra.mxu0 %v3455_v14 }
 0x4da   :  { %2895 = vmatprep.subr.bf16.mxu0 %v3299_v0 }
 0x4dd   :  { %2897 = vmatpush3.bf16.msra.mxu0 %v3466_v18  ;;  %v2914_v18 = vpack.c.bf16 %v883_v17, %v882_v16 }
 0x4de   :  { %2898 = vmatprep.subr.bf16.mxu0 %v3299_v0 }
 0x4e1   :  { %2900 = vmatpush3.bf16.msra.mxu0 %v3479_v21  ;;  %v885_v21 = vld [vmem:[#allocation9 + $0x28] sm:$0xff] }
 0x4e2   :  { %2901 = vmatprep.subr.bf16.mxu0 %v3299_v0  ;;  %v2918_v22 = vpack.c.bf16 %v885_v21, %v884_v20 }
 0x4e5   :  { %2903 = vmatpush3.bf16.msra.mxu0 %v3491_v24  ;;  %v887_v24 = vld [vmem:[#allocation9 + $0x38] sm:$0xff] }
 0x4e6   :  { %2904 = vmatprep.subr.bf16.mxu0 %v3299_v0  ;;  %v2922_v25 = vpack.c.bf16 %v887_v24, %v886_v23 }
 0x4e9   :  { %2906 = vmatpush3.bf16.msra.mxu0 %v3503_v27  ;;  %v889_v27 = vld [vmem:[#allocation9 + $0x48] sm:$0xff] }
 0x4ea   :  { %2907 = vmatprep.subr.bf16.mxu0 %v3299_v0  ;;  %v2926_v28 = vpack.c.bf16 %v889_v27, %v888_v26 }
 0x4ed   :  { %2909 = vmatpush3.bf16.msra.mxu0 %v3515_v30  ;;  %v891_v30 = vld [vmem:[#allocation9 + $0x58] sm:$0xff] }
 0x4ee   :  { %2942 = vmatprep.subr.bf16.mxu0 %v3299_v0  ;;  %v2930_v31 = vpack.c.bf16 %v891_v30, %v890_v29 }
 0x5a3   :  { %v711_v13 = vpop.f32.mrb[12].mxu0 }
 0x5a4   :  { %v715_v14 = vadd.f32 %v711_v13, %v227_v12  ;;  %v2284_v15 = vpop.f32.mrb[13].mxu0  ;;  %v237_v13 = vadd.f32 %v3586_v49, %v3558_v39 }
 0x5a6   :  { %3177 = vtanh.f32 %v715_v14 }
 0x5b0   :  { %v3178_v19 = vpop.eup %3177 }
 0x5b1   :  { %2318 = vmatmul.mubr.f32.vlgmr.msra.gmra.mrb[6].mxu1 %v3178_v19 }
 0x5b2   :  { %2913 = vmatpush3.bf16.msra.mxu1 %v2910_v11  ;;  %2387 = vmatprep.mubr.f32.mxu1 %v3561_v44  ;;  %v3690_v44 = vpack.c.bf16 %v1019_v43, %v1018_v42 }
 0x5b3   :  { %2915 = vmatprep.subr.bf16.mxu1 %v2914_v18 }
 0x5b6   :  { %2917 = vmatpush3.bf16.msra.mxu1 %v2914_v18  ;;  %v3774_v18 = vld [vmem:[%s3953_s6] ss:$0 sm:$0xff] }
 0x5b7   :  { %2919 = vmatprep.subr.bf16.mxu1 %v2918_v22 }
 0x5ba   :  { %2921 = vmatpush3.bf16.msra.mxu1 %v2918_v22 }
 0x5bb   :  { %2923 = vmatprep.subr.bf16.mxu1 %v2922_v25 }
 0x5be   :  { %2925 = vmatpush3.bf16.msra.mxu1 %v2922_v25 }
 0x5bf   :  { %2927 = vmatprep.subr.bf16.mxu1 %v2926_v28 }
 0x5c2   :  { %2929 = vmatpush3.bf16.msra.mxu1 %v2926_v28 }
 0x5c3   :  { %2931 = vmatprep.subr.bf16.mxu1 %v2930_v31 }
 0x5c6   :  { %2933 = vmatpush3.bf16.msra.mxu1 %v2930_v31 }
 0x5c7   :  { %2935 = vmatprep.subr.bf16.mxu1 %v2934_v34 }
 0x5ca   :  { %2937 = vmatpush3.bf16.msra.mxu1 %v2934_v34 }
 0x5cb   :  { %2939 = vmatprep.subr.bf16.mxu1 %v2938_v37 }
 0x5ce   :  { %2941 = vmatpush3.bf16.msra.mxu1 %v2938_v37 }
 0x5cf   :  { %2966 = vmatprep.subr.bf16.mxu1 %v3299_v0 }
 0x5d1   :  { %2388 = vmatmul.mubr.f32.vlgmr.msra.gmra.mrb[8].mxu1 %v3591_v55  ;;  %v3702_v55 = vpack.c.bf16 %v1025_v54, %v1024_v53  ;;  %v1624_v53 = vld [vmem:[%s3954_s7 + $0x8] sm:$0xff]  ;;  %v1625_v54 = vld [vmem:[%s3954_s7 + $0x10] sm:$0xff] }
 0x5d2   :  { %2390 = vmatprep.mubr.f32.mxu1 %v3613_v60  ;;  %2968 = vmatpush3.bf16.msra.mxu1 %v3686_v41  ;;  %v1029_v60 = vld [vmem:[#allocation10 + $0x68] sm:$0xff]  ;;  %v3138_v57 = vpack.c.bf16 %v1626_v56, %v1625_v54 }
 0x5d3   :  { %2969 = vmatprep.subr.bf16.mxu1 %v3299_v0  ;;  %v3710_v61 = vpack.c.bf16 %v1029_v60, %v1028_v59  ;;  %v1629_v60 = vld [vmem:[%s3954_s7 + $0x30] sm:$0xff] }
 0x5d5   :  { %2391 = vmatmul.mubr.f32.gmra.mrb[10].mxu1 %v3635_v3  ;;  %v232_v3 = vadd.f32 %v3558_v39, %v3588_v50 }
 0x5d6   :  { %2393 = vmatprep.mubr.f32.mxu1 %v3657_v10  ;;  %2971 = vmatpush3.bf16.msra.mxu1 %v3690_v44 }
 0x5d7   :  { %2972 = vmatprep.subr.bf16.mxu1 %v3299_v0 }
 0x5d9   :  { %2394 = vmatmul.mubr.f32.gmra.mrb[12].mxu1 %v3178_v19 }
 0x5da   :  { %2974 = vmatpush3.bf16.msra.mxu1 %v3694_v47 }
 0x5db   :  { %2975 = vmatprep.subr.bf16.mxu1 %v3299_v0 }
 0x5de   :  { %2977 = vmatpush3.bf16.msra.mxu1 %v3698_v52 }
 0x5df   :  { %2978 = vmatprep.subr.bf16.mxu1 %v3299_v0 }
 0x5e2   :  { %2980 = vmatpush3.bf16.msra.mxu1 %v3702_v55 }
 0x5e3   :  { %2981 = vmatprep.subr.bf16.mxu1 %v3299_v0 }
 0x5e6   :  { %2983 = vmatpush3.bf16.msra.mxu1 %v3706_v58 }
 0x5e7   :  { %2984 = vmatprep.subr.bf16.mxu1 %v3299_v0 }
 0x5ea   :  { %2986 = vmatpush3.bf16.msra.mxu1 %v3710_v61 }
 0x5eb   :  { %2987 = vmatprep.subr.bf16.mxu1 %v3299_v0 }
 0x5ee   :  { %2989 = vmatpush3.bf16.msra.mxu1 %v3714_v2 }
 0x5ef   :  { %3014 = vmatprep.subr.bf16.mxu1 %v3299_v0 }
 0x684   :  { %v787_v4 = vpop.f32.mrb[6].mxu1 }
 0x685   :  { %v791_v6 = vadd.f32 %v787_v4, %v232_v3  ;;  %v2319_v8 = vpop.f32.mrb[7].mxu1 }
 0x687   :  { %3179 = vtanh.f32 %v791_v6 }
 0x691   :  { %v3180_v9 = vpop.eup %3179 }
 0x692   :  { %2353 = vmatmul.mubr.f32.vlgmr.msra.gmra.mrb[14].mxu0 %v3180_v9  ;;  %2396 = vmatprep.mubr.f32.mxu1 %v3180_v9 }
 0x693   :  { %2944 = vmatpush3.bf16.msra.mxu0 %v3686_v41  ;;  %2431 = vmatprep.mubr.msk.f32.mxu0 %vm3300_vm0, %v3301_v1 }
 0x694   :  { %2945 = vmatprep.subr.bf16.mxu0 %v3299_v0 }
 0x697   :  { %2947 = vmatpush3.bf16.msra.mxu0 %v3690_v44 }
 0x698   :  { %2948 = vmatprep.subr.bf16.mxu0 %v3299_v0 }
 0x69b   :  { %2950 = vmatpush3.bf16.msra.mxu0 %v3694_v47 }
 0x69c   :  { %2951 = vmatprep.subr.bf16.mxu0 %v3299_v0 }
 0x69f   :  { %2953 = vmatpush3.bf16.msra.mxu0 %v3698_v52 }
 0x6a0   :  { %2954 = vmatprep.subr.bf16.mxu0 %v3299_v0 }
 0x6a3   :  { %2956 = vmatpush3.bf16.msra.mxu0 %v3702_v55 }
 0x6a4   :  { %v3731_v50 = vpop.f32.mrb[8].mxu1  ;;  %2957 = vmatprep.subr.bf16.mxu0 %v3299_v0 }
 0x6a5   :  { %v969_v10 = vpop.f32.mrb[9].mxu1  ;;  %v975_v24 = vadd.f32 %v3731_v50, %v3774_v18 }
 0x6a6   :  { %v970_v19 = vadd.f32 %v3774_v18, %v969_v10  ;;  %v1633_v10 = vld [vmem:[%s3954_s7 + $0x50] sm:$0xff] }
 0x6a7   :  { %2959 = vmatpush3.bf16.msra.mxu0 %v3706_v58 }
 0x6a8   :  { %v3735_v5 = vpop.f32.mrb[10].mxu1  ;;  %2960 = vmatprep.subr.bf16.mxu0 %v3299_v0 }
 0x6a9   :  { %v3738_v7 = vpop.f32.mrb[11].mxu1  ;;  %v985_v34 = vadd.f32 %v3735_v5, %v3774_v18  ;;  %v1634_v5 = vld [vmem:[%s3954_s7 + $0x58] sm:$0xff] }
 0x6aa   :  { %v980_v29 = vadd.f32 %v3774_v18, %v3738_v7  ;;  %v3150_v7 = vpack.c.bf16 %v1634_v5, %v1633_v10 }
 0x6ab   :  { %2962 = vmatpush3.bf16.msra.mxu0 %v3710_v61 }
 0x6ac   :  { %v3741_v11 = vpop.f32.mrb[12].mxu1  ;;  %2963 = vmatprep.subr.bf16.mxu0 %v3299_v0 }
 0x6ad   :  { %v3744_v12 = vpop.f32.mrb[13].mxu1 }
 0x6ae   :  { %v990_v40 = vadd.f32 %v3774_v18, %v3744_v12  ;;  %v1636_v12 = vld [vmem:[%s3954_s7 + $0x68] sm:$0xff] }
 0x6af   :  { %2965 = vmatpush3.bf16.msra.mxu0 %v3714_v2 }
 0x6b0   :  { %2990 = vmatprep.subr.bf16.mxu0 %v3299_v0 }
 0x6b2   :  { %2432 = vmatmul.mubr.f32.vlgmr.msra.gmra.mrb[16].mxu0 %v3301_v1 }
 0x6b3   :  { %2992 = vmatpush3.bf16.msra.mxu0 %v3686_v41  ;;  %2501 = vmatprep.mubr.msk.f32.mxu0 %vm3300_vm0, %v3301_v1 }
 0x6b4   :  { %2993 = vmatprep.subr.bf16.mxu0 %v3299_v0 }
 0x6b7   :  { %2995 = vmatpush3.bf16.msra.mxu0 %v3690_v44 }
 0x6b8   :  { %2996 = vmatprep.subr.bf16.mxu0 %v3299_v0 }
 0x6bb   :  { %2998 = vmatpush3.bf16.msra.mxu0 %v3694_v47 }
 0x6bc   :  { %2999 = vmatprep.subr.bf16.mxu0 %v3299_v0 }
 0x6bf   :  { %3001 = vmatpush3.bf16.msra.mxu0 %v3698_v52 }
 0x6c0   :  { %3002 = vmatprep.subr.bf16.mxu0 %v3299_v0 }
 0x6c3   :  { %3004 = vmatpush3.bf16.msra.mxu0 %v3702_v55 }
 0x6c4   :  { %3005 = vmatprep.subr.bf16.mxu0 %v3299_v0 }
 0x6c7   :  { %3007 = vmatpush3.bf16.msra.mxu0 %v3706_v58 }
 0x6c8   :  { %3008 = vmatprep.subr.bf16.mxu0 %v3299_v0 }
 0x6cb   :  { %3010 = vmatpush3.bf16.msra.mxu0 %v3710_v61 }
 0x6cc   :  { %3011 = vmatprep.subr.bf16.mxu0 %v3299_v0 }
 0x6cf   :  { %3013 = vmatpush3.bf16.msra.mxu0 %v3714_v2 }
 0x6d0   :  { %3038 = vmatprep.subr.bf16.mxu0 %v3299_v0 }
 0x765   :  { %v863_v14 = vpop.f32.mrb[14].mxu0 }
 0x766   :  { %v867_v15 = vadd.f32 %v863_v14, %v237_v13  ;;  %v2354_v16 = vpop.f32.mrb[15].mxu0  ;;  %v1637_v14 = vld [vmem:[%s3954_s7 + $0x70] sm:$0xff] }
 0x768   :  { %3181 = vtanh.f32 %v867_v15  ;;  %v1638_v15 = vld [vmem:[%s3954_s7 + $0x78] sm:$0xff] }
 0x769   :  { %v3156_v16 = vpack.c.bf16 %v1638_v15, %v1637_v14 }
 0x772   :  { %v3182_v17 = vpop.eup %3181 }
 0x773   :  { %2397 = vmatmul.mubr.f32.gmra.mrb[14].mxu1 %v3182_v17 }
 0x774   :  { %2466 = vmatprep.mubr.msk.f32.mxu1 %vm3300_vm0, %v3301_v1 }
 0x785   :  { %v1101_v20 = vpop.f32.mrb[16].mxu0 }
 0x786   :  { %v1105_v21 = vadd.f32 %v1101_v20, %v970_v19  ;;  %v2433_v22 = vpop.f32.mrb[17].mxu0 }
 0x788   :  { %3183 = vtanh.f32 %v1105_v21 }
 0x792   :  { %v3184_v39 = vpop.eup %3183 }
 0x793   :  { %2467 = vmatmul.mubr.f32.vlgmr.msra.gmra.mrb[16].mxu1 %v3184_v39  ;;  %v1735_v39 = vld [vmem:[%s3955_s8] ss:$0 sm:$0xff] }
 0x794   :  { %3016 = vmatpush3.bf16.msra.mxu1 %v3686_v41  ;;  %2536 = vmatprep.mubr.msk.f32.mxu1 %vm3300_vm0, %v3301_v1 }
 0x795   :  { %3017 = vmatprep.subr.bf16.mxu1 %v3299_v0 }
 0x798   :  { %3019 = vmatpush3.bf16.msra.mxu1 %v3690_v44 }
 0x799   :  { %3020 = vmatprep.subr.bf16.mxu1 %v3299_v0 }
 0x79c   :  { %3022 = vmatpush3.bf16.msra.mxu1 %v3694_v47 }
 0x79d   :  { %3023 = vmatprep.subr.bf16.mxu1 %v3299_v0 }
 0x7a0   :  { %3025 = vmatpush3.bf16.msra.mxu1 %v3698_v52 }
 0x7a1   :  { %3026 = vmatprep.subr.bf16.mxu1 %v3299_v0 }
 0x7a4   :  { %3028 = vmatpush3.bf16.msra.mxu1 %v3702_v55 }
 0x7a5   :  { %3029 = vmatprep.subr.bf16.mxu1 %v3299_v0 }
 0x7a8   :  { %3031 = vmatpush3.bf16.msra.mxu1 %v3706_v58 }
 0x7a9   :  { %3032 = vmatprep.subr.bf16.mxu1 %v3299_v0 }
 0x7ac   :  { %3034 = vmatpush3.bf16.msra.mxu1 %v3710_v61 }
 0x7ad   :  { %3035 = vmatprep.subr.bf16.mxu1 %v3299_v0 }
 0x7b0   :  { %3037 = vmatpush3.bf16.msra.mxu1 %v3714_v2 }
 0x7b1   :  { %3062 = vmatprep.subr.bf16.mxu1 %v3299_v0 }
 0x846   :  { %v3795_v49 = vpop.f32.mrb[14].mxu1 }
 0x847   :  { %v3797_v23 = vpop.f32.mrb[15].mxu1  ;;  %v1005_v17 = vadd.f32 %v3795_v49, %v3774_v18 }
 0x848   :  { %v1000_v4 = vadd.f32 %v3774_v18, %v3797_v23 }
 0x866   :  { %v1174_v25 = vpop.f32.mrb[16].mxu1 }
 0x867   :  { %v1178_v26 = vadd.f32 %v1174_v25, %v975_v24  ;;  %v2468_v27 = vpop.f32.mrb[17].mxu1 }
 0x869   :  { %3185 = vtanh.f32 %v1178_v26 }
 0x873   :  { %v3186_v28 = vpop.eup %3185 }
 0x874   :  { %2502 = vmatmul.mubr.f32.vlgmr.msra.gmra.mrb[18].mxu0 %v3186_v28 }
 0x875   :  { %3040 = vmatpush3.bf16.msra.mxu0 %v3686_v41  ;;  %2571 = vmatprep.mubr.msk.f32.mxu0 %vm3300_vm0, %v3301_v1 }
 0x876   :  { %3041 = vmatprep.subr.bf16.mxu0 %v3299_v0 }
 0x879   :  { %3043 = vmatpush3.bf16.msra.mxu0 %v3690_v44 }
 0x87a   :  { %3044 = vmatprep.subr.bf16.mxu0 %v3299_v0 }
 0x87d   :  { %3046 = vmatpush3.bf16.msra.mxu0 %v3694_v47 }
 0x87e   :  { %3047 = vmatprep.subr.bf16.mxu0 %v3299_v0 }
 0x881   :  { %3049 = vmatpush3.bf16.msra.mxu0 %v3698_v52 }
 0x882   :  { %3050 = vmatprep.subr.bf16.mxu0 %v3299_v0 }
 0x885   :  { %3052 = vmatpush3.bf16.msra.mxu0 %v3702_v55 }
 0x886   :  { %3053 = vmatprep.subr.bf16.mxu0 %v3299_v0 }
 0x889   :  { %3055 = vmatpush3.bf16.msra.mxu0 %v3706_v58 }
 0x88a   :  { %3056 = vmatprep.subr.bf16.mxu0 %v3299_v0 }
 0x88d   :  { %3058 = vmatpush3.bf16.msra.mxu0 %v3710_v61 }
 0x88e   :  { %3059 = vmatprep.subr.bf16.mxu0 %v3299_v0 }
 0x891   :  { %3061 = vmatpush3.bf16.msra.mxu0 %v3714_v2 }
 0x892   :  { %3086 = vmatprep.subr.bf16.mxu0 %v3299_v0 }
 0x947   :  { %v1247_v30 = vpop.f32.mrb[18].mxu0 }
 0x948   :  { %v1251_v31 = vadd.f32 %v1247_v30, %v980_v29  ;;  %v2503_v32 = vpop.f32.mrb[19].mxu0 }
 0x94a   :  { %3187 = vtanh.f32 %v1251_v31 }
 0x954   :  { %v3188_v33 = vpop.eup %3187 }
 0x955   :  { %2537 = vmatmul.mubr.f32.vlgmr.msra.gmra.mrb[18].mxu1 %v3188_v33 }
 0x956   :  { %3064 = vmatpush3.bf16.msra.mxu1 %v3686_v41  ;;  %2606 = vmatprep.mubr.msk.f32.mxu1 %vm3300_vm0, %v3301_v1 }
 0x957   :  { %3065 = vmatprep.subr.bf16.mxu1 %v3299_v0 }
 0x95a   :  { %3067 = vmatpush3.bf16.msra.mxu1 %v3690_v44 }
 0x95b   :  { %3068 = vmatprep.subr.bf16.mxu1 %v3299_v0 }
 0x95e   :  { %3070 = vmatpush3.bf16.msra.mxu1 %v3694_v47 }
 0x95f   :  { %3071 = vmatprep.subr.bf16.mxu1 %v3299_v0 }
 0x962   :  { %3073 = vmatpush3.bf16.msra.mxu1 %v3698_v52 }
 0x963   :  { %3074 = vmatprep.subr.bf16.mxu1 %v3299_v0 }
 0x966   :  { %3076 = vmatpush3.bf16.msra.mxu1 %v3702_v55 }
 0x967   :  { %3077 = vmatprep.subr.bf16.mxu1 %v3299_v0 }
 0x96a   :  { %3079 = vmatpush3.bf16.msra.mxu1 %v3706_v58 }
 0x96b   :  { %3080 = vmatprep.subr.bf16.mxu1 %v3299_v0 }
 0x96e   :  { %3082 = vmatpush3.bf16.msra.mxu1 %v3710_v61 }
 0x96f   :  { %3083 = vmatprep.subr.bf16.mxu1 %v3299_v0 }
 0x972   :  { %3085 = vmatpush3.bf16.msra.mxu1 %v3714_v2 }
 0x973   :  { %3110 = vmatprep.subr.bf16.mxu1 %v3299_v0 }
 0xa28   :  { %v1320_v35 = vpop.f32.mrb[18].mxu1 }
 0xa29   :  { %v1324_v36 = vadd.f32 %v1320_v35, %v985_v34  ;;  %v2538_v37 = vpop.f32.mrb[19].mxu1 }
 0xa2b   :  { %3189 = vtanh.f32 %v1324_v36 }
 0xa35   :  { %v3190_v38 = vpop.eup %3189 }
 0xa36   :  { %2572 = vmatmul.mubr.f32.vlgmr.msra.gmra.mrb[20].mxu0 %v3190_v38 }
 0xa37   :  { %3088 = vmatpush3.bf16.msra.mxu0 %v3686_v41  ;;  %2641 = vmatprep.mubr.msk.f32.mxu0 %vm3300_vm0, %v3301_v1 }
 0xa38   :  { %3089 = vmatprep.subr.bf16.mxu0 %v3299_v0 }
 0xa3b   :  { %3091 = vmatpush3.bf16.msra.mxu0 %v3690_v44 }
 0xa3c   :  { %3092 = vmatprep.subr.bf16.mxu0 %v3299_v0 }
 0xa3f   :  { %3094 = vmatpush3.bf16.msra.mxu0 %v3694_v47 }
 0xa40   :  { %3095 = vmatprep.subr.bf16.mxu0 %v3299_v0 }
 0xa43   :  { %3097 = vmatpush3.bf16.msra.mxu0 %v3698_v52 }
 0xa44   :  { %3098 = vmatprep.subr.bf16.mxu0 %v3299_v0 }
 0xa47   :  { %3100 = vmatpush3.bf16.msra.mxu0 %v3702_v55 }
 0xa48   :  { %3101 = vmatprep.subr.bf16.mxu0 %v3299_v0 }
 0xa4b   :  { %3103 = vmatpush3.bf16.msra.mxu0 %v3706_v58 }
 0xa4c   :  { %3104 = vmatprep.subr.bf16.mxu0 %v3299_v0 }
 0xa4f   :  { %3106 = vmatpush3.bf16.msra.mxu0 %v3710_v61 }
 0xa50   :  { %3107 = vmatprep.subr.bf16.mxu0 %v3299_v0 }
 0xa53   :  { %3109 = vmatpush3.bf16.msra.mxu0 %v3714_v2 }
 0xa54   :  { %3134 = vmatprep.subr.bf16.mxu0 %v3299_v0 }
 0xb09   :  { %v1393_v42 = vpop.f32.mrb[20].mxu0 }
 0xb0a   :  { %v1397_v43 = vadd.f32 %v1393_v42, %v990_v40  ;;  %v2573_v45 = vpop.f32.mrb[21].mxu0 }
 0xb0c   :  { %3191 = vtanh.f32 %v1397_v43 }
 0xb16   :  { %v3192_v46 = vpop.eup %3191 }
 0xb17   :  { %2607 = vmatmul.mubr.f32.vlgmr.msra.gmra.mrb[20].mxu1 %v3192_v46 }
 0xb18   :  { %3112 = vmatpush3.bf16.msra.mxu1 %v3686_v41  ;;  %2676 = vmatprep.mubr.msk.f32.mxu1 %vm3300_vm0, %v3301_v1  ;;  %v995_v41 = vadd.f32 %v3741_v11, %v3774_v18  ;;  %v1635_v11 = vld [vmem:[%s3954_s7 + $0x60] sm:$0xff] }
 0xb19   :  { %3113 = vmatprep.subr.bf16.mxu1 %v3299_v0  ;;  %v3153_v13 = vpack.c.bf16 %v1636_v12, %v1635_v11 }
 0xb1c   :  { %3115 = vmatpush3.bf16.msra.mxu1 %v3690_v44 }
 0xb1d   :  { %3116 = vmatprep.subr.bf16.mxu1 %v3299_v0 }
 0xb20   :  { %3118 = vmatpush3.bf16.msra.mxu1 %v3694_v47 }
 0xb21   :  { %3119 = vmatprep.subr.bf16.mxu1 %v3299_v0 }
 0xb24   :  { %3121 = vmatpush3.bf16.msra.mxu1 %v3698_v52  ;;  %v1623_v52 = vld [vmem:[%s3954_s7] sm:$0xff] }
 0xb25   :  { %3122 = vmatprep.subr.bf16.mxu1 %v3299_v0 }
 0xb28   :  { %3124 = vmatpush3.bf16.msra.mxu1 %v3702_v55  ;;  %v3135_v55 = vpack.c.bf16 %v1624_v53, %v1623_v52 }
 0xb29   :  { %3125 = vmatprep.subr.bf16.mxu1 %v3299_v0 }
 0xb2c   :  { %3127 = vmatpush3.bf16.msra.mxu1 %v3706_v58  ;;  %v1628_v58 = vld [vmem:[%s3954_s7 + $0x28] sm:$0xff] }
 0xb2d   :  { %3128 = vmatprep.subr.bf16.mxu1 %v3299_v0 }
 0xb30   :  { %3130 = vmatpush3.bf16.msra.mxu1 %v3710_v61  ;;  %v1630_v61 = vld [vmem:[%s3954_s7 + $0x38] sm:$0xff] }
 0xb31   :  { %3131 = vmatprep.subr.bf16.mxu1 %v3299_v0  ;;  %v3144_v62 = vpack.c.bf16 %v1630_v61, %v1629_v60 }
 0xb34   :  { %3133 = vmatpush3.bf16.msra.mxu1 %v3714_v2  ;;  %v1632_v2 = vld [vmem:[%s3954_s7 + $0x48] sm:$0xff] }
 0xb35   :  { %v3147_v3 = vpack.c.bf16 %v1632_v2, %v1631_v63 }
 0xbea   :  { %v1466_v44 = vpop.f32.mrb[20].mxu1 }
 0xbeb   :  { %v1470_v47 = vadd.f32 %v1466_v44, %v995_v41  ;;  %v2608_v48 = vpop.f32.mrb[21].mxu1 }
 0xbed   :  { %3193 = vtanh.f32 %v1470_v47 }
 0xbf7   :  { %v3194_v51 = vpop.eup %3193 }
 0xbf8   :  { %2642 = vmatmul.mubr.f32.vlgmr.msra.gmra.mrb[22].mxu0 %v3194_v51 }
 0xbf9   :  { %2711 = vmatprep.mubr.msk.f32.mxu0 %vm3300_vm0, %v3301_v1  ;;  %3136 = vmatpush3.bf16.msra.mxu0 %v3135_v55  ;;  %v1627_v1 = vld [vmem:[%s3954_s7 + $0x20] sm:$0xff] }
 0xbfa   :  { %3137 = vmatprep.subr.bf16.mxu0 %v3299_v0  ;;  %v3141_v59 = vpack.c.bf16 %v1628_v58, %v1627_v1 }
 0xbfd   :  { %3139 = vmatpush3.bf16.msra.mxu0 %v3138_v57 }
 0xbfe   :  { %3140 = vmatprep.subr.bf16.mxu0 %v3299_v0 }
 0xc01   :  { %3142 = vmatpush3.bf16.msra.mxu0 %v3141_v59 }
 0xc02   :  { %3143 = vmatprep.subr.bf16.mxu0 %v3299_v0 }
 0xc05   :  { %3145 = vmatpush3.bf16.msra.mxu0 %v3144_v62 }
 0xc06   :  { %3146 = vmatprep.subr.bf16.mxu0 %v3299_v0 }
 0xc09   :  { %3148 = vmatpush3.bf16.msra.mxu0 %v3147_v3 }
 0xc0a   :  { %3149 = vmatprep.subr.bf16.mxu0 %v3299_v0 }
 0xc0d   :  { %3151 = vmatpush3.bf16.msra.mxu0 %v3150_v7 }
 0xc0e   :  { %3152 = vmatprep.subr.bf16.mxu0 %v3299_v0 }
 0xc11   :  { %3154 = vmatpush3.bf16.msra.mxu0 %v3153_v13 }
 0xc12   :  { %3155 = vmatprep.subr.bf16.mxu0 %v3299_v0 }
 0xc15   :  { %3157 = vmatpush3.bf16.msra.mxu0 %v3156_v16 }
 0xccb   :  { %v1539_v6 = vpop.f32.mrb[22].mxu0 }
 0xccc   :  { %v1543_v8 = vadd.f32 %v1539_v6, %v1000_v4  ;;  %v2643_v9 = vpop.f32.mrb[23].mxu0 }
 0xcce   :  { %3195 = vtanh.f32 %v1543_v8 }
 0xcd8   :  { %v3196_v50 = vpop.eup %3195 }
 0xcd9   :  { %2677 = vmatmul.mubr.f32.vlgmr.msra.gmra.mrb[22].mxu1 %v3196_v50 }
 0xdac   :  { %v1612_v19 = vpop.f32.mrb[22].mxu1 }
 0xdad   :  { %v1616_v20 = vadd.f32 %v1612_v19, %v1005_v17  ;;  %v2678_v21 = vpop.f32.mrb[23].mxu1 }
 0xdaf   :  { %3197 = vtanh.f32 %v1616_v20 }
 0xdb9   :  { %v3198_v22 = vpop.eup %3197 }
 0xdba   :  { %2712 = vmatmul.mubr.f32.vlgmr.msra.gmra.mrb[24].mxu0 %v3198_v22 }
 0xe8d   :  { %v1712_v23 = vpop.f32.mrb[24].mxu0 }
 0xe8e   :  { %v1713_v24 = vadd.f32 %v1735_v39, %v1712_v23  ;;  %v2713_v25 = vpop.f32.mrb[25].mxu0 }
 0xe90   :  { %1717 = vst.msk [vmem:[%s3956_s9] sm:$0xff] %vm1716_vm2, %v1713_v24 }
 0xe91   :  { %1722 = vsyncpa [#allocation6], 1 }
 0xe92   :  { %1723 = vsyncpa [#allocation8], 1 }
 0xe93   :  { %1724 = vsyncpa [#allocation11], 1 }

// kernel: tpu_custom_call.1
= control target key start
LH: loop header
LB: loop body
LE: loop exit
PB: predicated region body
PF: predicated region fallthrough
CT: control target
= control target key end

     0   :  { %14 = vsyncpa [#allocation6], 0  ;;  %s3947_s0 = inlined_call_operand.hbm [shape: f32[8,8,16], index: 0, kind: input, shape index: {}]   ;;  %s3948_s1 = inlined_call_operand.hbm [shape: f32[16,128], index: 1, kind: input, shape index: {}]   ;;  %s3949_s2 = inlined_call_operand.vmem [shape: f32[128,128], index: 2, kind: input, shape index: {}]   ;;  %s3950_s3 = inlined_call_operand.vmem [shape: f32[1,128], index: 3, kind: input, shape index: {}]   ;;  %s3951_s4 = inlined_call_operand.hbm [shape: f32[1,128,128], index: 4, kind: input, shape index: {}]   ;;  %s3952_s5 = inlined_call_operand.hbm [shape: f32[1,128,128], index: 5, kind: input, shape index: {}]   ;;  %s3953_s6 = inlined_call_operand.vmem [shape: f32[1,1,128], index: 6, kind: input, shape index: {}]   ;;  %s3954_s7 = inlined_call_operand.vmem [shape: f32[128,4], index: 7, kind: input, shape index: {}]   ;;  %s3955_s8 = inlined_call_operand.vmem [shape: f32[1,4], index: 8, kind: input, shape index: {}]   ;;  %s3956_s9 = inlined_call_operand.vmem [shape: f32[8,4], index: 9, kind: output, shape index: {}]  }
   0x1   :  { %15 = vsyncpa [#allocation8], 0 }
   0x2   :  { %16 = vsyncpa [#allocation11], 0  ;;  %s3293_s30 = smov [#allocation7]   ;;  %s3294_s11 = smov [#allocation5]  }
   0x3   :  { %s34_s10 = sshll.u32 %s3293_s30, 4  ;;  %s22_s12 = sshll.u32 %s3294_s11, 4  ;;  %s35_s10 = int_to_ptr.vmem [resolvable:$true] %s34_s10  ;;  %s3352_s12 = int_to_ptr.vmem [resolvable:$true] %s22_s12 }
   0x4   :  { %s3199_s15 = scalar_lea.hbm %s3948_s1, 256 }
   0x5   :  { %p3200_p0 = scmp.ne.s32.totalorder %s3948_s1, %s3199_s15  ;;  %p3203_p1 = scmp.lt.u32.totalorder %s3199_s15, %s3948_s1 }
   0x7   :  { %p3205_p2 = pnand %p3203_p1, %p3200_p0 }
   0x9   :  { %3208 = shalt.err (!%p3205_p2)
}
   0xa   :  { %s3209_s20 = scalar_lea.vmem %s35_s10, 256  ;;  %p3214_p4 = scmp.lt.s32.totalorder %s35_s10, %s35_s10 }
   0xb   :  { %p3210_p3 = scmp.ne.s32.totalorder %s35_s10, %s3209_s20  ;;  %p3215_p5 = scmp.lt.s32.totalorder %s3209_s20, %s3209_s20 }
   0xd   :  { %p3216_p6 = por %p3215_p5, %p3214_p4 }
   0xf   :  { %p3217_p7 = pnand %p3216_p6, %p3210_p3 }
  0x11   :  { %3220 = shalt.err (!%p3217_p7)
}
  0x12   :  { %s3295_s21 = smov 128   ;;  %s3296_s22 = smov 8  }
  0x13   :  { %40 = dma.hbm_to_vmem [thread:$0]  %s3948_s1, 256, %s35_s10, [#allocation8], %s3295_s21, %s3295_s21, %s3296_s22  }
  0x14   :  { %s3221_s27 = scalar_lea.hbm %s3947_s0, 1024 }
  0x15   :  { %p3222_p8 = scmp.ne.s32.totalorder %s3947_s0, %s3221_s27  ;;  %p3225_p9 = scmp.lt.u32.totalorder %s3221_s27, %s3947_s0 }
  0x17   :  { %p3227_p10 = pnand %p3225_p9, %p3222_p8 }
  0x19   :  { %3230 = shalt.err (!%p3227_p10)
}
  0x1a   :  { %s3231_s13 = scalar_lea.vmem %s3352_s12, 1024  ;;  %p3236_p12 = scmp.lt.s32.totalorder %s3352_s12, %s3352_s12 }
  0x1b   :  { %p3232_p11 = scmp.ne.s32.totalorder %s3352_s12, %s3231_s13  ;;  %p3237_p13 = scmp.lt.s32.totalorder %s3231_s13, %s3231_s13 }
  0x1d   :  { %p3238_p0 = por %p3237_p13, %p3236_p12 }
  0x1f   :  { %p3239_p1 = pnand %p3238_p0, %p3232_p11 }
  0x21   :  { %3242 = shalt.err (!%p3239_p1)
}
  0x22   :  { %28 = dma.hbm_to_vmem [thread:$0]  %s3947_s0, 1024, %s3352_s12, [#allocation6], %s3295_s21, %s3295_s21, %s3296_s22  }
  0x23   :  { %s3297_s14 = smov [#allocation9]   ;;  %s3298_s16 = smov [#allocation10]  }
  0x24   :  { %s50_s15 = sshll.u32 %s3297_s14, 4  ;;  %s62_s17 = sshll.u32 %s3298_s16, 4  ;;  %s51_s15 = int_to_ptr.vmem [resolvable:$true] %s50_s15  ;;  %s3389_s17 = int_to_ptr.vmem [resolvable:$true] %s62_s17 }
  0x25   :  { %s3243_s20 = scalar_lea.hbm %s3951_s4, 2048 }
  0x26   :  { %p3244_p2 = scmp.ne.s32.totalorder %s3951_s4, %s3243_s20  ;;  %p3247_p3 = scmp.lt.u32.totalorder %s3243_s20, %s3951_s4 }
  0x28   :  { %p3249_p4 = pnand %p3247_p3, %p3244_p2 }
  0x2a   :  { %3252 = shalt.err (!%p3249_p4)
}
  0x2b   :  { %s3253_s0 = scalar_lea.vmem %s51_s15, 2048  ;;  %p3258_p6 = scmp.lt.s32.totalorder %s51_s15, %s51_s15 }
  0x2c   :  { %p3254_p5 = scmp.ne.s32.totalorder %s51_s15, %s3253_s0  ;;  %p3259_p7 = scmp.lt.s32.totalorder %s3253_s0, %s3253_s0 }
  0x2e   :  { %p3260_p8 = por %p3259_p7, %p3258_p6 }
  0x30   :  { %p3261_p9 = pnand %p3260_p8, %p3254_p5 }
  0x32   :  { %3264 = shalt.err (!%p3261_p9)
}
  0x33   :  { %56 = dma.hbm_to_vmem [thread:$0]  %s3951_s4, 2048, %s51_s15, [#allocation8], %s3295_s21, %s3295_s21, %s3296_s22  }
  0x34   :  { %s3265_s30 = scalar_lea.hbm %s3952_s5, 2048 }
  0x35   :  { %p3266_p10 = scmp.ne.s32.totalorder %s3952_s5, %s3265_s30  ;;  %p3269_p11 = scmp.lt.u32.totalorder %s3265_s30, %s3952_s5 }
  0x37   :  { %p3271_p12 = pnand %p3269_p11, %p3266_p10 }
  0x39   :  { %3274 = shalt.err (!%p3271_p12)
}
  0x3a   :  { %s3275_s14 = scalar_lea.vmem %s3389_s17, 2048  ;;  %p3280_p0 = scmp.lt.s32.totalorder %s3389_s17, %s3389_s17 }
  0x3b   :  { %p3276_p13 = scmp.ne.s32.totalorder %s3389_s17, %s3275_s14  ;;  %p3281_p1 = scmp.lt.s32.totalorder %s3275_s14, %s3275_s14 }
  0x3d   :  { %p3282_p2 = por %p3281_p1, %p3280_p0 }
  0x3f   :  { %p3283_p3 = pnand %p3282_p2, %p3276_p13 }
  0x41   :  { %3286 = shalt.err (!%p3283_p3)
}
  0x42   :  { %68 = dma.hbm_to_vmem [thread:$0]  %s3952_s5, 2048, %s3389_s17, [#allocation11], %s3295_s21, %s3295_s21, %s3296_s22  }
  0x43   :  { %3287 = dma.done.wait [#allocation6], 1024  }
  0x44   :  { %3288 = vsyncadd [#allocation6], 4294966272 }
  0x45   :  { %3289 = dma.done.wait [#allocation8], 2304  }
  0x46   :  { %3290 = vsyncadd [#allocation8], 4294964992 }
  0x47   :  { %3291 = dma.done.wait [#allocation11], 2048  }
  0x48   :  { %3292 = vsyncadd [#allocation11], 4294965248  ;;  %v3299_v0 = vmov 0.0|0.0   ;;  %vm3300_vm0 = vmmov 0   ;;  %v3301_v1 = vmov 0.0   ;;  %v248_v2 = vld [vmem:[%s3949_s2] sm:$0xff] }
  0x49   :  { %2718 = vmatprep.subr.bf16.mxu1 %v3299_v0  ;;  %2107 = vmatprep.mubr.msk.f32.mxu1 %vm3300_vm0, %v3301_v1  ;;  %v249_v3 = vld [vmem:[%s3949_s2 + $0x8] sm:$0xff]  ;;  %v250_v4 = vld [vmem:[%s3949_s2 + $0x10] sm:$0xff]  ;;  %v251_v6 = vld [vmem:[%s3949_s2 + $0x18] sm:$0xff]  ;;  %vm110_vm1 = vcmask 130048   ;;  %vm1716_vm2 = vcmask 31744  }
  0x4a   :  { %v3438_v5 = vpack.c.bf16 %v249_v3, %v248_v2  ;;  %v3444_v7 = vpack.c.bf16 %v251_v6, %v250_v4  ;;  %v252_v8 = vld [vmem:[%s3949_s2 + $0x20] sm:$0xff]  ;;  %v253_v9 = vld [vmem:[%s3949_s2 + $0x28] sm:$0xff]  ;;  %v254_v15 = vld [vmem:[%s3949_s2 + $0x30] sm:$0xff] }
  0x4b   :  { %v101_v10 = vld [vmem:[#allocation7] sm:$0xff]  ;;  %v102_v11 = vld [vmem:[#allocation7 + $0x8] sm:$0xff]  ;;  %v3455_v14 = vpack.c.bf16 %v253_v9, %v252_v8  ;;  %v255_v16 = vld [vmem:[%s3949_s2 + $0x38] sm:$0xff] }
  0x4c   :  { %2720 = vmatpush3.bf16.msra.mxu1 %v3438_v5  ;;  %v2714_v12 = vpack.c.bf16 %v102_v11, %v101_v10  ;;  %v93_v13 = vld [vmem:[#allocation5] sm:$0xff]  ;;  %v94_v17 = vld [vmem:[#allocation5 + $0x8] sm:$0xff]  ;;  %v3466_v18 = vpack.c.bf16 %v255_v16, %v254_v15  ;;  %v258_v22 = vld [vmem:[%s3949_s2 + $0x50] sm:$0xff] }
  0x4d   :  { %2721 = vmatprep.subr.bf16.mxu1 %v3299_v0  ;;  %2063 = vmatprep.mubr.msk.f32.mxu0 %vm110_vm1, %v93_v13  ;;  %v256_v19 = vld [vmem:[%s3949_s2 + $0x40] sm:$0xff]  ;;  %v257_v20 = vld [vmem:[%s3949_s2 + $0x48] sm:$0xff]  ;;  %v259_v23 = vld [vmem:[%s3949_s2 + $0x58] sm:$0xff] }
  0x4e   :  { %2715 = vmatprep.subr.bf16.mxu0 %v2714_v12  ;;  %v3479_v21 = vpack.c.bf16 %v257_v20, %v256_v19  ;;  %v3491_v24 = vpack.c.bf16 %v259_v23, %v258_v22  ;;  %v260_v25 = vld [vmem:[%s3949_s2 + $0x60] sm:$0xff]  ;;  %v261_v26 = vld [vmem:[%s3949_s2 + $0x68] sm:$0xff]  ;;  %v262_v28 = vld [vmem:[%s3949_s2 + $0x70] sm:$0xff] }
  0x4f   :  { %2717 = vmatpush3.bf16.msra.mxu0 %v2714_v12  ;;  %v3503_v27 = vpack.c.bf16 %v261_v26, %v260_v25  ;;  %v263_v29 = vld [vmem:[%s3949_s2 + $0x78] sm:$0xff]  ;;  %v95_v31 = vld [vmem:[#allocation5 + $0x10] sm:$0xff]  ;;  %v97_v33 = vld [vmem:[#allocation5 + $0x20] sm:$0xff] }
  0x50   :  { %2723 = vmatpush3.bf16.msra.mxu1 %v3444_v7  ;;  %2742 = vmatprep.subr.bf16.mxu0 %v3299_v0  ;;  %v3515_v30 = vpack.c.bf16 %v263_v29, %v262_v28  ;;  %v96_v32 = vld [vmem:[#allocation5 + $0x18] sm:$0xff]  ;;  %v98_v34 = vld [vmem:[#allocation5 + $0x28] sm:$0xff]  ;;  %v99_v35 = vld [vmem:[#allocation5 + $0x30] sm:$0xff] }
  0x51   :  { %2724 = vmatprep.subr.bf16.mxu1 %v3299_v0  ;;  %v100_v36 = vld [vmem:[#allocation5 + $0x38] sm:$0xff]  ;;  %v3558_v39 = vld [vmem:[%s3950_s3] ss:$0 sm:$0xff]  ;;  %v884_v20 = vld [vmem:[#allocation9 + $0x20] sm:$0xff] }
  0x52   :  { %2064 = vmatmul.mubr.msk.f32.vlgmr.msra.gmra.mrb[0].mxu0 %vm110_vm1, %v94_v17  ;;  %v882_v16 = vld [vmem:[#allocation9 + $0x10] sm:$0xff]  ;;  %v883_v17 = vld [vmem:[#allocation9 + $0x18] sm:$0xff]  ;;  %v888_v26 = vld [vmem:[#allocation9 + $0x40] sm:$0xff] }
  0x53   :  { %2744 = vmatpush3.bf16.msra.mxu0 %v3438_v5  ;;  %2066 = vmatprep.mubr.msk.f32.mxu0 %vm110_vm1, %v95_v31  ;;  %v886_v23 = vld [vmem:[#allocation9 + $0x30] sm:$0xff] }
  0x54   :  { %2726 = vmatpush3.bf16.msra.mxu1 %v3455_v14  ;;  %2745 = vmatprep.subr.bf16.mxu0 %v3299_v0  ;;  %v890_v29 = vld [vmem:[#allocation9 + $0x50] sm:$0xff] }
  0x55   :  { %2727 = vmatprep.subr.bf16.mxu1 %v3299_v0 }
  0x56   :  { %2067 = vmatmul.mubr.msk.f32.gmra.mrb[2].mxu0 %vm110_vm1, %v96_v32  ;;  %v892_v32 = vld [vmem:[#allocation9 + $0x60] sm:$0xff] }
  0x57   :  { %2747 = vmatpush3.bf16.msra.mxu0 %v3444_v7  ;;  %2069 = vmatprep.mubr.msk.f32.mxu0 %vm110_vm1, %v97_v33  ;;  %v893_v33 = vld [vmem:[#allocation9 + $0x68] sm:$0xff] }
  0x58   :  { %2729 = vmatpush3.bf16.msra.mxu1 %v3466_v18  ;;  %2748 = vmatprep.subr.bf16.mxu0 %v3299_v0 }
  0x59   :  { %2730 = vmatprep.subr.bf16.mxu1 %v3299_v0 }
  0x5a   :  { %2070 = vmatmul.mubr.msk.f32.gmra.mrb[4].mxu0 %vm110_vm1, %v98_v34  ;;  %v2934_v34 = vpack.c.bf16 %v893_v33, %v892_v32 }
  0x5b   :  { %2750 = vmatpush3.bf16.msra.mxu0 %v3455_v14  ;;  %2072 = vmatprep.mubr.msk.f32.mxu0 %vm110_vm1, %v99_v35  ;;  %v894_v35 = vld [vmem:[#allocation9 + $0x70] sm:$0xff] }
  0x5c   :  { %2732 = vmatpush3.bf16.msra.mxu1 %v3479_v21  ;;  %2751 = vmatprep.subr.bf16.mxu0 %v3299_v0 }
  0x5d   :  { %2733 = vmatprep.subr.bf16.mxu1 %v3299_v0 }
  0x5e   :  { %2073 = vmatmul.mubr.msk.f32.gmra.mrb[6].mxu0 %vm110_vm1, %v100_v36  ;;  %v895_v36 = vld [vmem:[#allocation9 + $0x78] sm:$0xff] }
  0x5f   :  { %2753 = vmatpush3.bf16.msra.mxu0 %v3466_v18  ;;  %2142 = vmatprep.mubr.msk.f32.mxu0 %vm3300_vm0, %v3301_v1 }
  0x60   :  { %2735 = vmatpush3.bf16.msra.mxu1 %v3491_v24  ;;  %2754 = vmatprep.subr.bf16.mxu0 %v3299_v0 }
  0x61   :  { %2736 = vmatprep.subr.bf16.mxu1 %v3299_v0 }
  0x63   :  { %2756 = vmatpush3.bf16.msra.mxu0 %v3479_v21 }
  0x64   :  { %2738 = vmatpush3.bf16.msra.mxu1 %v3503_v27  ;;  %2757 = vmatprep.subr.bf16.mxu0 %v3299_v0 }
  0x65   :  { %2739 = vmatprep.subr.bf16.mxu1 %v3299_v0 }
  0x67   :  { %2759 = vmatpush3.bf16.msra.mxu0 %v3491_v24 }
  0x68   :  { %2741 = vmatpush3.bf16.msra.mxu1 %v3515_v30  ;;  %2760 = vmatprep.subr.bf16.mxu0 %v3299_v0 }
  0x69   :  { %2766 = vmatprep.subr.bf16.mxu1 %v3299_v0 }
  0x6b   :  { %2108 = vmatmul.mubr.f32.vlgmr.msra.gmra.mrb[0].mxu1 %v3301_v1  ;;  %2762 = vmatpush3.bf16.msra.mxu0 %v3503_v27 }
  0x6c   :  { %2768 = vmatpush3.bf16.msra.mxu1 %v3438_v5  ;;  %2177 = vmatprep.mubr.msk.f32.mxu1 %vm3300_vm0, %v3301_v1 }
  0x6d   :  { %2769 = vmatprep.subr.bf16.mxu1 %v3299_v0  ;;  %2763 = vmatprep.subr.bf16.mxu0 %v3299_v0 }
  0x6f   :  { %2765 = vmatpush3.bf16.msra.mxu0 %v3515_v30 }
  0x70   :  { %2771 = vmatpush3.bf16.msra.mxu1 %v3444_v7  ;;  %2790 = vmatprep.subr.bf16.mxu0 %v3299_v0 }
  0x71   :  { %2772 = vmatprep.subr.bf16.mxu1 %v3299_v0 }
  0x74   :  { %2774 = vmatpush3.bf16.msra.mxu1 %v3455_v14 }
  0x75   :  { %2775 = vmatprep.subr.bf16.mxu1 %v3299_v0 }
  0x78   :  { %2777 = vmatpush3.bf16.msra.mxu1 %v3466_v18 }
  0x79   :  { %2778 = vmatprep.subr.bf16.mxu1 %v3299_v0 }
  0x7c   :  { %2780 = vmatpush3.bf16.msra.mxu1 %v3479_v21 }
  0x7d   :  { %2781 = vmatprep.subr.bf16.mxu1 %v3299_v0 }
  0x80   :  { %2783 = vmatpush3.bf16.msra.mxu1 %v3491_v24 }
  0x81   :  { %2784 = vmatprep.subr.bf16.mxu1 %v3299_v0 }
  0x84   :  { %2786 = vmatpush3.bf16.msra.mxu1 %v3503_v27 }
  0x85   :  { %2787 = vmatprep.subr.bf16.mxu1 %v3299_v0 }
  0x88   :  { %2789 = vmatpush3.bf16.msra.mxu1 %v3515_v30 }
  0x89   :  { %2814 = vmatprep.subr.bf16.mxu1 %v3299_v0 }
 0x125   :  { %v2065_v37 = vpop.f32.mrb[0].mxu0 }
 0x126   :  { %v201_v38 = vpop.f32.mrb[1].mxu0  ;;  %v207_v51 = vadd.f32 %v2065_v37, %v3558_v39  ;;  %v2938_v37 = vpack.c.bf16 %v895_v36, %v894_v35 }
 0x127   :  { %v202_v40 = vadd.f32 %v3558_v39, %v201_v38  ;;  %v1016_v38 = vld [vmem:[#allocation10] sm:$0xff] }
 0x129   :  { %v2068_v45 = vpop.f32.mrb[2].mxu0 }
 0x12a   :  { %v211_v46 = vpop.f32.mrb[3].mxu0  ;;  %v217_v61 = vadd.f32 %v2068_v45, %v3558_v39  ;;  %v1020_v45 = vld [vmem:[#allocation10 + $0x20] sm:$0xff] }
 0x12b   :  { %v212_v56 = vadd.f32 %v3558_v39, %v211_v46  ;;  %v1021_v46 = vld [vmem:[#allocation10 + $0x28] sm:$0xff] }
 0x12d   :  { %v3582_v47 = vpop.f32.mrb[4].mxu0 }
 0x12e   :  { %v3584_v48 = vpop.f32.mrb[5].mxu0  ;;  %v227_v12 = vadd.f32 %v3582_v47, %v3558_v39  ;;  %v3694_v47 = vpack.c.bf16 %v1021_v46, %v1020_v45 }
 0x12f   :  { %v222_v4 = vadd.f32 %v3558_v39, %v3584_v48  ;;  %v1022_v48 = vld [vmem:[#allocation10 + $0x30] sm:$0xff] }
 0x131   :  { %v3586_v49 = vpop.f32.mrb[6].mxu0 }
 0x132   :  { %v3588_v50 = vpop.f32.mrb[7].mxu0 }
 0x13e   :  { %v332_v41 = vpop.f32.mrb[0].mxu1 }
 0x13f   :  { %v336_v42 = vadd.f32 %v332_v41, %v202_v40  ;;  %v2109_v43 = vpop.f32.mrb[1].mxu1  ;;  %v1017_v40 = vld [vmem:[#allocation10 + $0x8] sm:$0xff] }
 0x140   :  { %v3686_v41 = vpack.c.bf16 %v1017_v40, %v1016_v38  ;;  %v1019_v43 = vld [vmem:[#allocation10 + $0x18] sm:$0xff] }
 0x141   :  { %3167 = vtanh.f32 %v336_v42  ;;  %v1018_v42 = vld [vmem:[#allocation10 + $0x10] sm:$0xff] }
 0x14b   :  { %v3561_v44 = vpop.eup %3167 }
 0x14c   :  { %2143 = vmatmul.mubr.f32.vlgmr.msra.gmra.mrb[8].mxu0 %v3561_v44 }
 0x14d   :  { %2792 = vmatpush3.bf16.msra.mxu0 %v3438_v5  ;;  %2212 = vmatprep.mubr.msk.f32.mxu0 %vm3300_vm0, %v3301_v1 }
 0x14e   :  { %2793 = vmatprep.subr.bf16.mxu0 %v3299_v0 }
 0x151   :  { %2795 = vmatpush3.bf16.msra.mxu0 %v3444_v7 }
 0x152   :  { %2796 = vmatprep.subr.bf16.mxu0 %v3299_v0 }
 0x155   :  { %2798 = vmatpush3.bf16.msra.mxu0 %v3455_v14 }
 0x156   :  { %2799 = vmatprep.subr.bf16.mxu0 %v3299_v0 }
 0x159   :  { %2801 = vmatpush3.bf16.msra.mxu0 %v3466_v18 }
 0x15a   :  { %2802 = vmatprep.subr.bf16.mxu0 %v3299_v0 }
 0x15d   :  { %2804 = vmatpush3.bf16.msra.mxu0 %v3479_v21 }
 0x15e   :  { %2805 = vmatprep.subr.bf16.mxu0 %v3299_v0 }
 0x161   :  { %2807 = vmatpush3.bf16.msra.mxu0 %v3491_v24 }
 0x162   :  { %2808 = vmatprep.subr.bf16.mxu0 %v3299_v0 }
 0x165   :  { %2810 = vmatpush3.bf16.msra.mxu0 %v3503_v27 }
 0x166   :  { %2811 = vmatprep.subr.bf16.mxu0 %v3299_v0 }
 0x169   :  { %2813 = vmatpush3.bf16.msra.mxu0 %v3515_v30 }
 0x16a   :  { %2838 = vmatprep.subr.bf16.mxu0 %v3299_v0 }
 0x21f   :  { %v407_v52 = vpop.f32.mrb[8].mxu0 }
 0x220   :  { %v411_v53 = vadd.f32 %v407_v52, %v207_v51  ;;  %v2144_v54 = vpop.f32.mrb[9].mxu0  ;;  %v1023_v51 = vld [vmem:[#allocation10 + $0x38] sm:$0xff] }
 0x221   :  { %v3698_v52 = vpack.c.bf16 %v1023_v51, %v1022_v48  ;;  %v1025_v54 = vld [vmem:[#allocation10 + $0x48] sm:$0xff] }
 0x222   :  { %3169 = vtanh.f32 %v411_v53  ;;  %v1024_v53 = vld [vmem:[#allocation10 + $0x40] sm:$0xff] }
 0x22c   :  { %v3591_v55 = vpop.eup %3169 }
 0x22d   :  { %2178 = vmatmul.mubr.f32.vlgmr.msra.gmra.mrb[2].mxu1 %v3591_v55 }
 0x22e   :  { %2816 = vmatpush3.bf16.msra.mxu1 %v3438_v5  ;;  %2247 = vmatprep.mubr.msk.f32.mxu1 %vm3300_vm0, %v3301_v1 }
 0x22f   :  { %2817 = vmatprep.subr.bf16.mxu1 %v3299_v0 }
 0x232   :  { %2819 = vmatpush3.bf16.msra.mxu1 %v3444_v7 }
 0x233   :  { %2820 = vmatprep.subr.bf16.mxu1 %v3299_v0 }
 0x236   :  { %2822 = vmatpush3.bf16.msra.mxu1 %v3455_v14 }
 0x237   :  { %2823 = vmatprep.subr.bf16.mxu1 %v3299_v0 }
 0x23a   :  { %2825 = vmatpush3.bf16.msra.mxu1 %v3466_v18 }
 0x23b   :  { %2826 = vmatprep.subr.bf16.mxu1 %v3299_v0 }
 0x23e   :  { %2828 = vmatpush3.bf16.msra.mxu1 %v3479_v21 }
 0x23f   :  { %2829 = vmatprep.subr.bf16.mxu1 %v3299_v0 }
 0x242   :  { %2831 = vmatpush3.bf16.msra.mxu1 %v3491_v24 }
 0x243   :  { %2832 = vmatprep.subr.bf16.mxu1 %v3299_v0 }
 0x246   :  { %2834 = vmatpush3.bf16.msra.mxu1 %v3503_v27 }
 0x247   :  { %2835 = vmatprep.subr.bf16.mxu1 %v3299_v0 }
 0x24a   :  { %2837 = vmatpush3.bf16.msra.mxu1 %v3515_v30 }
 0x24b   :  { %2862 = vmatprep.subr.bf16.mxu1 %v3299_v0 }
 0x300   :  { %v483_v57 = vpop.f32.mrb[2].mxu1 }
 0x301   :  { %v487_v58 = vadd.f32 %v483_v57, %v212_v56  ;;  %v2179_v59 = vpop.f32.mrb[3].mxu1  ;;  %v1026_v56 = vld [vmem:[#allocation10 + $0x50] sm:$0xff]  ;;  %v1027_v57 = vld [vmem:[#allocation10 + $0x58] sm:$0xff] }
 0x302   :  { %v1028_v59 = vld [vmem:[#allocation10 + $0x60] sm:$0xff] }
 0x303   :  { %3171 = vtanh.f32 %v487_v58  ;;  %v3706_v58 = vpack.c.bf16 %v1027_v57, %v1026_v56  ;;  %v1626_v56 = vld [vmem:[%s3954_s7 + $0x18] sm:$0xff] }
 0x30d   :  { %v3613_v60 = vpop.eup %3171 }
 0x30e   :  { %2213 = vmatmul.mubr.f32.vlgmr.msra.gmra.mrb[10].mxu0 %v3613_v60 }
 0x30f   :  { %2840 = vmatpush3.bf16.msra.mxu0 %v3438_v5  ;;  %2282 = vmatprep.mubr.msk.f32.mxu0 %vm3300_vm0, %v3301_v1 }
 0x310   :  { %2841 = vmatprep.subr.bf16.mxu0 %v3299_v0 }
 0x313   :  { %2843 = vmatpush3.bf16.msra.mxu0 %v3444_v7 }
 0x314   :  { %2844 = vmatprep.subr.bf16.mxu0 %v3299_v0 }
 0x317   :  { %2846 = vmatpush3.bf16.msra.mxu0 %v3455_v14 }
 0x318   :  { %2847 = vmatprep.subr.bf16.mxu0 %v3299_v0 }
 0x31b   :  { %2849 = vmatpush3.bf16.msra.mxu0 %v3466_v18 }
 0x31c   :  { %2850 = vmatprep.subr.bf16.mxu0 %v3299_v0 }
 0x31f   :  { %2852 = vmatpush3.bf16.msra.mxu0 %v3479_v21 }
 0x320   :  { %2853 = vmatprep.subr.bf16.mxu0 %v3299_v0 }
 0x323   :  { %2855 = vmatpush3.bf16.msra.mxu0 %v3491_v24 }
 0x324   :  { %2856 = vmatprep.subr.bf16.mxu0 %v3299_v0 }
 0x327   :  { %2858 = vmatpush3.bf16.msra.mxu0 %v3503_v27 }
 0x328   :  { %2859 = vmatprep.subr.bf16.mxu0 %v3299_v0 }
 0x32b   :  { %2861 = vmatpush3.bf16.msra.mxu0 %v3515_v30 }
 0x32c   :  { %2886 = vmatprep.subr.bf16.mxu0 %v3299_v0 }
 0x3e1   :  { %v559_v62 = vpop.f32.mrb[10].mxu0 }
 0x3e2   :  { %v563_v63 = vadd.f32 %v559_v62, %v217_v61  ;;  %v2214_v2 = vpop.f32.mrb[11].mxu0  ;;  %v1030_v62 = vld [vmem:[#allocation10 + $0x70] sm:$0xff] }
 0x3e4   :  { %3173 = vtanh.f32 %v563_v63  ;;  %v1031_v63 = vld [vmem:[#allocation10 + $0x78] sm:$0xff] }
 0x3e5   :  { %v3714_v2 = vpack.c.bf16 %v1031_v63, %v1030_v62  ;;  %v1631_v63 = vld [vmem:[%s3954_s7 + $0x40] sm:$0xff] }
 0x3ee   :  { %v3635_v3 = vpop.eup %3173 }
 0x3ef   :  { %2248 = vmatmul.mubr.f32.vlgmr.msra.gmra.mrb[4].mxu1 %v3635_v3 }
 0x3f0   :  { %2864 = vmatpush3.bf16.msra.mxu1 %v3438_v5  ;;  %2317 = vmatprep.mubr.msk.f32.mxu1 %vm3300_vm0, %v3301_v1 }
 0x3f1   :  { %2865 = vmatprep.subr.bf16.mxu1 %v3299_v0 }
 0x3f4   :  { %2867 = vmatpush3.bf16.msra.mxu1 %v3444_v7 }
 0x3f5   :  { %2868 = vmatprep.subr.bf16.mxu1 %v3299_v0 }
 0x3f8   :  { %2870 = vmatpush3.bf16.msra.mxu1 %v3455_v14 }
 0x3f9   :  { %2871 = vmatprep.subr.bf16.mxu1 %v3299_v0 }
 0x3fc   :  { %2873 = vmatpush3.bf16.msra.mxu1 %v3466_v18 }
 0x3fd   :  { %2874 = vmatprep.subr.bf16.mxu1 %v3299_v0 }
 0x400   :  { %2876 = vmatpush3.bf16.msra.mxu1 %v3479_v21 }
 0x401   :  { %2877 = vmatprep.subr.bf16.mxu1 %v3299_v0 }
 0x404   :  { %2879 = vmatpush3.bf16.msra.mxu1 %v3491_v24 }
 0x405   :  { %2880 = vmatprep.subr.bf16.mxu1 %v3299_v0 }
 0x408   :  { %2882 = vmatpush3.bf16.msra.mxu1 %v3503_v27 }
 0x409   :  { %2883 = vmatprep.subr.bf16.mxu1 %v3299_v0 }
 0x40c   :  { %2885 = vmatpush3.bf16.msra.mxu1 %v3515_v30 }
 0x4c2   :  { %v635_v6 = vpop.f32.mrb[4].mxu1 }
 0x4c3   :  { %v639_v8 = vadd.f32 %v635_v6, %v222_v4  ;;  %v2249_v9 = vpop.f32.mrb[5].mxu1 }
 0x4c5   :  { %3175 = vtanh.f32 %v639_v8 }
 0x4cf   :  { %v3657_v10 = vpop.eup %3175 }
 0x4d0   :  { %2283 = vmatmul.mubr.f32.vlgmr.msra.gmra.mrb[12].mxu0 %v3657_v10 }
 0x4d1   :  { %2888 = vmatpush3.bf16.msra.mxu0 %v3438_v5  ;;  %2352 = vmatprep.mubr.msk.f32.mxu0 %vm3300_vm0, %v3301_v1  ;;  %v880_v5 = vld [vmem:[#allocation9] sm:$0xff] }
 0x4d2   :  { %2889 = vmatprep.subr.bf16.mxu0 %v3299_v0 }
 0x4d5   :  { %2891 = vmatpush3.bf16.msra.mxu0 %v3444_v7  ;;  %v881_v7 = vld [vmem:[#allocation9 + $0x8] sm:$0xff] }
 0x4d6   :  { %2892 = vmatprep.subr.bf16.mxu0 %v3299_v0  ;;  %v2910_v11 = vpack.c.bf16 %v881_v7, %v880_v5 }
 0x4d8   :  { %2911 = vmatprep.subr.bf16.mxu1 %v2910_v11 }
 0x4d9   :  { %2894 = vmatpush3.bf16.msra.mxu0 %v3455_v14 }
 0x4da   :  { %2895 = vmatprep.subr.bf16.mxu0 %v3299_v0 }
 0x4dd   :  { %2897 = vmatpush3.bf16.msra.mxu0 %v3466_v18  ;;  %v2914_v18 = vpack.c.bf16 %v883_v17, %v882_v16 }
 0x4de   :  { %2898 = vmatprep.subr.bf16.mxu0 %v3299_v0 }
 0x4e1   :  { %2900 = vmatpush3.bf16.msra.mxu0 %v3479_v21  ;;  %v885_v21 = vld [vmem:[#allocation9 + $0x28] sm:$0xff] }
 0x4e2   :  { %2901 = vmatprep.subr.bf16.mxu0 %v3299_v0  ;;  %v2918_v22 = vpack.c.bf16 %v885_v21, %v884_v20 }
 0x4e5   :  { %2903 = vmatpush3.bf16.msra.mxu0 %v3491_v24  ;;  %v887_v24 = vld [vmem:[#allocation9 + $0x38] sm:$0xff] }
 0x4e6   :  { %2904 = vmatprep.subr.bf16.mxu0 %v3299_v0  ;;  %v2922_v25 = vpack.c.bf16 %v887_v24, %v886_v23 }
 0x4e9   :  { %2906 = vmatpush3.bf16.msra.mxu0 %v3503_v27  ;;  %v889_v27 = vld [vmem:[#allocation9 + $0x48] sm:$0xff] }
 0x4ea   :  { %2907 = vmatprep.subr.bf16.mxu0 %v3299_v0  ;;  %v2926_v28 = vpack.c.bf16 %v889_v27, %v888_v26 }
 0x4ed   :  { %2909 = vmatpush3.bf16.msra.mxu0 %v3515_v30  ;;  %v891_v30 = vld [vmem:[#allocation9 + $0x58] sm:$0xff] }
 0x4ee   :  { %2942 = vmatprep.subr.bf16.mxu0 %v3299_v0  ;;  %v2930_v31 = vpack.c.bf16 %v891_v30, %v890_v29 }
 0x5a3   :  { %v711_v13 = vpop.f32.mrb[12].mxu0 }
 0x5a4   :  { %v715_v14 = vadd.f32 %v711_v13, %v227_v12  ;;  %v2284_v15 = vpop.f32.mrb[13].mxu0  ;;  %v237_v13 = vadd.f32 %v3586_v49, %v3558_v39 }
 0x5a6   :  { %3177 = vtanh.f32 %v715_v14 }
 0x5b0   :  { %v3178_v19 = vpop.eup %3177 }
 0x5b1   :  { %2318 = vmatmul.mubr.f32.vlgmr.msra.gmra.mrb[6].mxu1 %v3178_v19 }
 0x5b2   :  { %2913 = vmatpush3.bf16.msra.mxu1 %v2910_v11  ;;  %2387 = vmatprep.mubr.f32.mxu1 %v3561_v44  ;;  %v3690_v44 = vpack.c.bf16 %v1019_v43, %v1018_v42 }
 0x5b3   :  { %2915 = vmatprep.subr.bf16.mxu1 %v2914_v18 }
 0x5b6   :  { %2917 = vmatpush3.bf16.msra.mxu1 %v2914_v18  ;;  %v3774_v18 = vld [vmem:[%s3953_s6] ss:$0 sm:$0xff] }
 0x5b7   :  { %2919 = vmatprep.subr.bf16.mxu1 %v2918_v22 }
 0x5ba   :  { %2921 = vmatpush3.bf16.msra.mxu1 %v2918_v22 }
 0x5bb   :  { %2923 = vmatprep.subr.bf16.mxu1 %v2922_v25 }
 0x5be   :  { %2925 = vmatpush3.bf16.msra.mxu1 %v2922_v25 }
 0x5bf   :  { %2927 = vmatprep.subr.bf16.mxu1 %v2926_v28 }
 0x5c2   :  { %2929 = vmatpush3.bf16.msra.mxu1 %v2926_v28 }
 0x5c3   :  { %2931 = vmatprep.subr.bf16.mxu1 %v2930_v31 }
 0x5c6   :  { %2933 = vmatpush3.bf16.msra.mxu1 %v2930_v31 }
 0x5c7   :  { %2935 = vmatprep.subr.bf16.mxu1 %v2934_v34 }
 0x5ca   :  { %2937 = vmatpush3.bf16.msra.mxu1 %v2934_v34 }
 0x5cb   :  { %2939 = vmatprep.subr.bf16.mxu1 %v2938_v37 }
 0x5ce   :  { %2941 = vmatpush3.bf16.msra.mxu1 %v2938_v37 }
 0x5cf   :  { %2966 = vmatprep.subr.bf16.mxu1 %v3299_v0 }
 0x5d1   :  { %2388 = vmatmul.mubr.f32.vlgmr.msra.gmra.mrb[8].mxu1 %v3591_v55  ;;  %v3702_v55 = vpack.c.bf16 %v1025_v54, %v1024_v53  ;;  %v1624_v53 = vld [vmem:[%s3954_s7 + $0x8] sm:$0xff]  ;;  %v1625_v54 = vld [vmem:[%s3954_s7 + $0x10] sm:$0xff] }
 0x5d2   :  { %2390 = vmatprep.mubr.f32.mxu1 %v3613_v60  ;;  %2968 = vmatpush3.bf16.msra.mxu1 %v3686_v41  ;;  %v1029_v60 = vld [vmem:[#allocation10 + $0x68] sm:$0xff]  ;;  %v3138_v57 = vpack.c.bf16 %v1626_v56, %v1625_v54 }
 0x5d3   :  { %2969 = vmatprep.subr.bf16.mxu1 %v3299_v0  ;;  %v3710_v61 = vpack.c.bf16 %v1029_v60, %v1028_v59  ;;  %v1629_v60 = vld [vmem:[%s3954_s7 + $0x30] sm:$0xff] }
 0x5d5   :  { %2391 = vmatmul.mubr.f32.gmra.mrb[10].mxu1 %v3635_v3  ;;  %v232_v3 = vadd.f32 %v3558_v39, %v3588_v50 }
 0x5d6   :  { %2393 = vmatprep.mubr.f32.mxu1 %v3657_v10  ;;  %2971 = vmatpush3.bf16.msra.mxu1 %v3690_v44 }
 0x5d7   :  { %2972 = vmatprep.subr.bf16.mxu1 %v3299_v0 }
 0x5d9   :  { %2394 = vmatmul.mubr.f32.gmra.mrb[12].mxu1 %v3178_v19 }
 0x5da   :  { %2974 = vmatpush3.bf16.msra.mxu1 %v3694_v47 }
 0x5db   :  { %2975 = vmatprep.subr.bf16.mxu1 %v3299_v0 }
 0x5de   :  { %2977 = vmatpush3.bf16.msra.mxu1 %v3698_v52 }
 0x5df   :  { %2978 = vmatprep.subr.bf16.mxu1 %v3299_v0 }
 0x5e2   :  { %2980 = vmatpush3.bf16.msra.mxu1 %v3702_v55 }
 0x5e3   :  { %2981 = vmatprep.subr.bf16.mxu1 %v3299_v0 }
 0x5e6   :  { %2983 = vmatpush3.bf16.msra.mxu1 %v3706_v58 }
 0x5e7   :  { %2984 = vmatprep.subr.bf16.mxu1 %v3299_v0 }
 0x5ea   :  { %2986 = vmatpush3.bf16.msra.mxu1 %v3710_v61 }
 0x5eb   :  { %2987 = vmatprep.subr.bf16.mxu1 %v3299_v0 }
 0x5ee   :  { %2989 = vmatpush3.bf16.msra.mxu1 %v3714_v2 }
 0x5ef   :  { %3014 = vmatprep.subr.bf16.mxu1 %v3299_v0 }
 0x684   :  { %v787_v4 = vpop.f32.mrb[6].mxu1 }
 0x685   :  { %v791_v6 = vadd.f32 %v787_v4, %v232_v3  ;;  %v2319_v8 = vpop.f32.mrb[7].mxu1 }
 0x687   :  { %3179 = vtanh.f32 %v791_v6 }
 0x691   :  { %v3180_v9 = vpop.eup %3179 }
 0x692   :  { %2353 = vmatmul.mubr.f32.vlgmr.msra.gmra.mrb[14].mxu0 %v3180_v9  ;;  %2396 = vmatprep.mubr.f32.mxu1 %v3180_v9 }
 0x693   :  { %2944 = vmatpush3.bf16.msra.mxu0 %v3686_v41  ;;  %2431 = vmatprep.mubr.msk.f32.mxu0 %vm3300_vm0, %v3301_v1 }
 0x694   :  { %2945 = vmatprep.subr.bf16.mxu0 %v3299_v0 }
 0x697   :  { %2947 = vmatpush3.bf16.msra.mxu0 %v3690_v44 }
 0x698   :  { %2948 = vmatprep.subr.bf16.mxu0 %v3299_v0 }
 0x69b   :  { %2950 = vmatpush3.bf16.msra.mxu0 %v3694_v47 }
 0x69c   :  { %2951 = vmatprep.subr.bf16.mxu0 %v3299_v0 }
 0x69f   :  { %2953 = vmatpush3.bf16.msra.mxu0 %v3698_v52 }
 0x6a0   :  { %2954 = vmatprep.subr.bf16.mxu0 %v3299_v0 }
 0x6a3   :  { %2956 = vmatpush3.bf16.msra.mxu0 %v3702_v55 }
 0x6a4   :  { %v3731_v50 = vpop.f32.mrb[8].mxu1  ;;  %2957 = vmatprep.subr.bf16.mxu0 %v3299_v0 }
 0x6a5   :  { %v969_v10 = vpop.f32.mrb[9].mxu1  ;;  %v975_v24 = vadd.f32 %v3731_v50, %v3774_v18 }
 0x6a6   :  { %v970_v19 = vadd.f32 %v3774_v18, %v969_v10  ;;  %v1633_v10 = vld [vmem:[%s3954_s7 + $0x50] sm:$0xff] }
 0x6a7   :  { %2959 = vmatpush3.bf16.msra.mxu0 %v3706_v58 }
 0x6a8   :  { %v3735_v5 = vpop.f32.mrb[10].mxu1  ;;  %2960 = vmatprep.subr.bf16.mxu0 %v3299_v0 }
 0x6a9   :  { %v3738_v7 = vpop.f32.mrb[11].mxu1  ;;  %v985_v34 = vadd.f32 %v3735_v5, %v3774_v18  ;;  %v1634_v5 = vld [vmem:[%s3954_s7 + $0x58] sm:$0xff] }
 0x6aa   :  { %v980_v29 = vadd.f32 %v3774_v18, %v3738_v7  ;;  %v3150_v7 = vpack.c.bf16 %v1634_v5, %v1633_v10 }
 0x6ab   :  { %2962 = vmatpush3.bf16.msra.mxu0 %v3710_v61 }
 0x6ac   :  { %v3741_v11 = vpop.f32.mrb[12].mxu1  ;;  %2963 = vmatprep.subr.bf16.mxu0 %v3299_v0 }
 0x6ad   :  { %v3744_v12 = vpop.f32.mrb[13].mxu1 }
 0x6ae   :  { %v990_v40 = vadd.f32 %v3774_v18, %v3744_v12  ;;  %v1636_v12 = vld [vmem:[%s3954_s7 + $0x68] sm:$0xff] }
 0x6af   :  { %2965 = vmatpush3.bf16.msra.mxu0 %v3714_v2 }
 0x6b0   :  { %2990 = vmatprep.subr.bf16.mxu0 %v3299_v0 }
 0x6b2   :  { %2432 = vmatmul.mubr.f32.vlgmr.msra.gmra.mrb[16].mxu0 %v3301_v1 }
 0x6b3   :  { %2992 = vmatpush3.bf16.msra.mxu0 %v3686_v41  ;;  %2501 = vmatprep.mubr.msk.f32.mxu0 %vm3300_vm0, %v3301_v1 }
 0x6b4   :  { %2993 = vmatprep.subr.bf16.mxu0 %v3299_v0 }
 0x6b7   :  { %2995 = vmatpush3.bf16.msra.mxu0 %v3690_v44 }
 0x6b8   :  { %2996 = vmatprep.subr.bf16.mxu0 %v3299_v0 }
 0x6bb   :  { %2998 = vmatpush3.bf16.msra.mxu0 %v3694_v47 }
 0x6bc   :  { %2999 = vmatprep.subr.bf16.mxu0 %v3299_v0 }
 0x6bf   :  { %3001 = vmatpush3.bf16.msra.mxu0 %v3698_v52 }
 0x6c0   :  { %3002 = vmatprep.subr.bf16.mxu0 %v3299_v0 }
 0x6c3   :  { %3004 = vmatpush3.bf16.msra.mxu0 %v3702_v55 }
 0x6c4   :  { %3005 = vmatprep.subr.bf16.mxu0 %v3299_v0 }
 0x6c7   :  { %3007 = vmatpush3.bf16.msra.mxu0 %v3706_v58 }
 0x6c8   :  { %3008 = vmatprep.subr.bf16.mxu0 %v3299_v0 }
 0x6cb   :  { %3010 = vmatpush3.bf16.msra.mxu0 %v3710_v61 }
 0x6cc   :  { %3011 = vmatprep.subr.bf16.mxu0 %v3299_v0 }
 0x6cf   :  { %3013 = vmatpush3.bf16.msra.mxu0 %v3714_v2 }
 0x6d0   :  { %3038 = vmatprep.subr.bf16.mxu0 %v3299_v0 }
 0x765   :  { %v863_v14 = vpop.f32.mrb[14].mxu0 }
 0x766   :  { %v867_v15 = vadd.f32 %v863_v14, %v237_v13  ;;  %v2354_v16 = vpop.f32.mrb[15].mxu0  ;;  %v1637_v14 = vld [vmem:[%s3954_s7 + $0x70] sm:$0xff] }
 0x768   :  { %3181 = vtanh.f32 %v867_v15  ;;  %v1638_v15 = vld [vmem:[%s3954_s7 + $0x78] sm:$0xff] }
 0x769   :  { %v3156_v16 = vpack.c.bf16 %v1638_v15, %v1637_v14 }
 0x772   :  { %v3182_v17 = vpop.eup %3181 }
 0x773   :  { %2397 = vmatmul.mubr.f32.gmra.mrb[14].mxu1 %v3182_v17 }
 0x774   :  { %2466 = vmatprep.mubr.msk.f32.mxu1 %vm3300_vm0, %v3301_v1 }
 0x785   :  { %v1101_v20 = vpop.f32.mrb[16].mxu0 }
 0x786   :  { %v1105_v21 = vadd.f32 %v1101_v20, %v970_v19  ;;  %v2433_v22 = vpop.f32.mrb[17].mxu0 }
 0x788   :  { %3183 = vtanh.f32 %v1105_v21 }
 0x792   :  { %v3184_v39 = vpop.eup %3183 }
 0x793   :  { %2467 = vmatmul.mubr.f32.vlgmr.msra.gmra.mrb[16].mxu1 %v3184_v39  ;;  %v1735_v39 = vld [vmem:[%s3955_s8] ss:$0 sm:$0xff] }
 0x794   :  { %3016 = vmatpush3.bf16.msra.mxu1 %v3686_v41  ;;  %2536 = vmatprep.mubr.msk.f32.mxu1 %vm3300_vm0, %v3301_v1 }
 0x795   :  { %3017 = vmatprep.subr.bf16.mxu1 %v3299_v0 }
 0x798   :  { %3019 = vmatpush3.bf16.msra.mxu1 %v3690_v44 }
 0x799   :  { %3020 = vmatprep.subr.bf16.mxu1 %v3299_v0 }
 0x79c   :  { %3022 = vmatpush3.bf16.msra.mxu1 %v3694_v47 }
 0x79d   :  { %3023 = vmatprep.subr.bf16.mxu1 %v3299_v0 }
 0x7a0   :  { %3025 = vmatpush3.bf16.msra.mxu1 %v3698_v52 }
 0x7a1   :  { %3026 = vmatprep.subr.bf16.mxu1 %v3299_v0 }
 0x7a4   :  { %3028 = vmatpush3.bf16.msra.mxu1 %v3702_v55 }
 0x7a5   :  { %3029 = vmatprep.subr.bf16.mxu1 %v3299_v0 }
 0x7a8   :  { %3031 = vmatpush3.bf16.msra.mxu1 %v3706_v58 }
 0x7a9   :  { %3032 = vmatprep.subr.bf16.mxu1 %v3299_v0 }
 0x7ac   :  { %3034 = vmatpush3.bf16.msra.mxu1 %v3710_v61 }
 0x7ad   :  { %3035 = vmatprep.subr.bf16.mxu1 %v3299_v0 }
 0x7b0   :  { %3037 = vmatpush3.bf16.msra.mxu1 %v3714_v2 }
 0x7b1   :  { %3062 = vmatprep.subr.bf16.mxu1 %v3299_v0 }
 0x846   :  { %v3795_v49 = vpop.f32.mrb[14].mxu1 }
 0x847   :  { %v3797_v23 = vpop.f32.mrb[15].mxu1  ;;  %v1005_v17 = vadd.f32 %v3795_v49, %v3774_v18 }
 0x848   :  { %v1000_v4 = vadd.f32 %v3774_v18, %v3797_v23 }
 0x866   :  { %v1174_v25 = vpop.f32.mrb[16].mxu1 }
 0x867   :  { %v1178_v26 = vadd.f32 %v1174_v25, %v975_v24  ;;  %v2468_v27 = vpop.f32.mrb[17].mxu1 }
 0x869   :  { %3185 = vtanh.f32 %v1178_v26 }
 0x873   :  { %v3186_v28 = vpop.eup %3185 }
 0x874   :  { %2502 = vmatmul.mubr.f32.vlgmr.msra.gmra.mrb[18].mxu0 %v3186_v28 }
 0x875   :  { %3040 = vmatpush3.bf16.msra.mxu0 %v3686_v41  ;;  %2571 = vmatprep.mubr.msk.f32.mxu0 %vm3300_vm0, %v3301_v1 }
 0x876   :  { %3041 = vmatprep.subr.bf16.mxu0 %v3299_v0 }
 0x879   :  { %3043 = vmatpush3.bf16.msra.mxu0 %v3690_v44 }
 0x87a   :  { %3044 = vmatprep.subr.bf16.mxu0 %v3299_v0 }
 0x87d   :  { %3046 = vmatpush3.bf16.msra.mxu0 %v3694_v47 }
 0x87e   :  { %3047 = vmatprep.subr.bf16.mxu0 %v3299_v0 }
 0x881   :  { %3049 = vmatpush3.bf16.msra.mxu0 %v3698_v52 }
 0x882   :  { %3050 = vmatprep.subr.bf16.mxu0 %v3299_v0 }
 0x885   :  { %3052 = vmatpush3.bf16.msra.mxu0 %v3702_v55 }
 0x886   :  { %3053 = vmatprep.subr.bf16.mxu0 %v3299_v0 }
 0x889   :  { %3055 = vmatpush3.bf16.msra.mxu0 %v3706_v58 }
 0x88a   :  { %3056 = vmatprep.subr.bf16.mxu0 %v3299_v0 }
 0x88d   :  { %3058 = vmatpush3.bf16.msra.mxu0 %v3710_v61 }
 0x88e   :  { %3059 = vmatprep.subr.bf16.mxu0 %v3299_v0 }
 0x891   :  { %3061 = vmatpush3.bf16.msra.mxu0 %v3714_v2 }
 0x892   :  { %3086 = vmatprep.subr.bf16.mxu0 %v3299_v0 }
 0x947   :  { %v1247_v30 = vpop.f32.mrb[18].mxu0 }
 0x948   :  { %v1251_v31 = vadd.f32 %v1247_v30, %v980_v29  ;;  %v2503_v32 = vpop.f32.mrb[19].mxu0 }
 0x94a   :  { %3187 = vtanh.f32 %v1251_v31 }
 0x954   :  { %v3188_v33 = vpop.eup %3187 }
 0x955   :  { %2537 = vmatmul.mubr.f32.vlgmr.msra.gmra.mrb[18].mxu1 %v3188_v33 }
 0x956   :  { %3064 = vmatpush3.bf16.msra.mxu1 %v3686_v41  ;;  %2606 = vmatprep.mubr.msk.f32.mxu1 %vm3300_vm0, %v3301_v1 }
 0x957   :  { %3065 = vmatprep.subr.bf16.mxu1 %v3299_v0 }
 0x95a   :  { %3067 = vmatpush3.bf16.msra.mxu1 %v3690_v44 }
 0x95b   :  { %3068 = vmatprep.subr.bf16.mxu1 %v3299_v0 }
 0x95e   :  { %3070 = vmatpush3.bf16.msra.mxu1 %v3694_v47 }
 0x95f   :  { %3071 = vmatprep.subr.bf16.mxu1 %v3299_v0 }
 0x962   :  { %3073 = vmatpush3.bf16.msra.mxu1 %v3698_v52 }
 0x963   :  { %3074 = vmatprep.subr.bf16.mxu1 %v3299_v0 }
 0x966   :  { %3076 = vmatpush3.bf16.msra.mxu1 %v3702_v55 }
 0x967   :  { %3077 = vmatprep.subr.bf16.mxu1 %v3299_v0 }
 0x96a   :  { %3079 = vmatpush3.bf16.msra.mxu1 %v3706_v58 }
 0x96b   :  { %3080 = vmatprep.subr.bf16.mxu1 %v3299_v0 }
 0x96e   :  { %3082 = vmatpush3.bf16.msra.mxu1 %v3710_v61 }
 0x96f   :  { %3083 = vmatprep.subr.bf16.mxu1 %v3299_v0 }
 0x972   :  { %3085 = vmatpush3.bf16.msra.mxu1 %v3714_v2 }
 0x973   :  { %3110 = vmatprep.subr.bf16.mxu1 %v3299_v0 }
 0xa28   :  { %v1320_v35 = vpop.f32.mrb[18].mxu1 }
 0xa29   :  { %v1324_v36 = vadd.f32 %v1320_v35, %v985_v34  ;;  %v2538_v37 = vpop.f32.mrb[19].mxu1 }
 0xa2b   :  { %3189 = vtanh.f32 %v1324_v36 }
 0xa35   :  { %v3190_v38 = vpop.eup %3189 }
 0xa36   :  { %2572 = vmatmul.mubr.f32.vlgmr.msra.gmra.mrb[20].mxu0 %v3190_v38 }
 0xa37   :  { %3088 = vmatpush3.bf16.msra.mxu0 %v3686_v41  ;;  %2641 = vmatprep.mubr.msk.f32.mxu0 %vm3300_vm0, %v3301_v1 }
 0xa38   :  { %3089 = vmatprep.subr.bf16.mxu0 %v3299_v0 }
 0xa3b   :  { %3091 = vmatpush3.bf16.msra.mxu0 %v3690_v44 }
 0xa3c   :  { %3092 = vmatprep.subr.bf16.mxu0 %v3299_v0 }
 0xa3f   :  { %3094 = vmatpush3.bf16.msra.mxu0 %v3694_v47 }
 0xa40   :  { %3095 = vmatprep.subr.bf16.mxu0 %v3299_v0 }
 0xa43   :  { %3097 = vmatpush3.bf16.msra.mxu0 %v3698_v52 }
 0xa44   :  { %3098 = vmatprep.subr.bf16.mxu0 %v3299_v0 }
 0xa47   :  { %3100 = vmatpush3.bf16.msra.mxu0 %v3702_v55 }
 0xa48   :  { %3101 = vmatprep.subr.bf16.mxu0 %v3299_v0 }
 0xa4b   :  { %3103 = vmatpush3.bf16.msra.mxu0 %v3706_v58 }
 0xa4c   :  { %3104 = vmatprep.subr.bf16.mxu0 %v3299_v0 }
 0xa4f   :  { %3106 = vmatpush3.bf16.msra.mxu0 %v3710_v61 }
 0xa50   :  { %3107 = vmatprep.subr.bf16.mxu0 %v3299_v0 }
 0xa53   :  { %3109 = vmatpush3.bf16.msra.mxu0 %v3714_v2 }
 0xa54   :  { %3134 = vmatprep.subr.bf16.mxu0 %v3299_v0 }
 0xb09   :  { %v1393_v42 = vpop.f32.mrb[20].mxu0 }
 0xb0a   :  { %v1397_v43 = vadd.f32 %v1393_v42, %v990_v40  ;;  %v2573_v45 = vpop.f32.mrb[21].mxu0 }
 0xb0c   :  { %3191 = vtanh.f32 %v1397_v43 }
 0xb16   :  { %v3192_v46 = vpop.eup %3191 }
 0xb17   :  { %2607 = vmatmul.mubr.f32.vlgmr.msra.gmra.mrb[20].mxu1 %v3192_v46 }
 0xb18   :  { %3112 = vmatpush3.bf16.msra.mxu1 %v3686_v41  ;;  %2676 = vmatprep.mubr.msk.f32.mxu1 %vm3300_vm0, %v3301_v1  ;;  %v995_v41 = vadd.f32 %v3741_v11, %v3774_v18  ;;  %v1635_v11 = vld [vmem:[%s3954_s7 + $0x60] sm:$0xff] }
 0xb19   :  { %3113 = vmatprep.subr.bf16.mxu1 %v3299_v0  ;;  %v3153_v13 = vpack.c.bf16 %v1636_v12, %v1635_v11 }
 0xb1c   :  { %3115 = vmatpush3.bf16.msra.mxu1 %v3690_v44 }
 0xb1d   :  { %3116 = vmatprep.subr.bf16.mxu1 %v3299_v0 }
 0xb20   :  { %3118 = vmatpush3.bf16.msra.mxu1 %v3694_v47 }
 0xb21   :  { %3119 = vmatprep.subr.bf16.mxu1 %v3299_v0 }
 0xb24   :  { %3121 = vmatpush3.bf16.msra.mxu1 %v3698_v52  ;;  %v1623_v52 = vld [vmem:[%s3954_s7] sm:$0xff] }
 0xb25   :  { %3122 = vmatprep.subr.bf16.mxu1 %v3299_v0 }
 0xb28   :  { %3124 = vmatpush3.bf16.msra.mxu1 %v3702_v55  ;;  %v3135_v55 = vpack.c.bf16 %v1624_v53, %v1623_v52 }
 0xb29   :  { %3125 = vmatprep.subr.bf16.mxu1 %v3299_v0 }
 0xb2c   :  { %3127 = vmatpush3.bf16.msra.mxu1 %v3706_v58  ;;  %v1628_v58 = vld [vmem:[%s3954_s7 + $0x28] sm:$0xff] }
 0xb2d   :  { %3128 = vmatprep.subr.bf16.mxu1 %v3299_v0 }
 0xb30   :  { %3130 = vmatpush3.bf16.msra.mxu1 %v3710_v61  ;;  %v1630_v61 = vld [vmem:[%s3954_s7 + $0x38] sm:$0xff] }
 0xb31   :  { %3131 = vmatprep.subr.bf16.mxu1 %v3299_v0  ;;  %v3144_v62 = vpack.c.bf16 %v1630_v61, %v1629_v60 }
 0xb34   :  { %3133 = vmatpush3.bf16.msra.mxu1 %v3714_v2  ;;  %v1632_v2 = vld [vmem:[%s3954_s7 + $0x48] sm:$0xff] }
 0xb35   :  { %v3147_v3 = vpack.c.bf16 %v1632_v2, %v1631_v63 }
 0xbea   :  { %v1466_v44 = vpop.f32.mrb[20].mxu1 }
 0xbeb   :  { %v1470_v47 = vadd.f32 %v1466_v44, %v995_v41  ;;  %v2608_v48 = vpop.f32.mrb[21].mxu1 }
 0xbed   :  { %3193 = vtanh.f32 %v1470_v47 }
 0xbf7   :  { %v3194_v51 = vpop.eup %3193 }
 0xbf8   :  { %2642 = vmatmul.mubr.f32.vlgmr.msra.gmra.mrb[22].mxu0 %v3194_v51 }
 0xbf9   :  { %2711 = vmatprep.mubr.msk.f32.mxu0 %vm3300_vm0, %v3301_v1  ;;  %3136 = vmatpush3.bf16.msra.mxu0 %v3135_v55  ;;  %v1627_v1 = vld [vmem:[%s3954_s7 + $0x20] sm:$0xff] }
 0xbfa   :  { %3137 = vmatprep.subr.bf16.mxu0 %v3299_v0  ;;  %v3141_v59 = vpack.c.bf16 %v1628_v58, %v1627_v1 }
 0xbfd   :  { %3139 = vmatpush3.bf16.msra.mxu0 %v3138_v57 }
 0xbfe   :  { %3140 = vmatprep.subr.bf16.mxu0 %v3299_v0 }
 0xc01   :  { %3142 = vmatpush3.bf16.msra.mxu0 %v3141_v59 }
 0xc02   :  { %3143 = vmatprep.subr.bf16.mxu0 %v3299_v0 }
 0xc05   :  { %3145 = vmatpush3.bf16.msra.mxu0 %v3144_v62 }
 0xc06   :  { %3146 = vmatprep.subr.bf16.mxu0 %v3299_v0 }
 0xc09   :  { %3148 = vmatpush3.bf16.msra.mxu0 %v3147_v3 }
 0xc0a   :  { %3149 = vmatprep.subr.bf16.mxu0 %v3299_v0 }
 0xc0d   :  { %3151 = vmatpush3.bf16.msra.mxu0 %v3150_v7 }
 0xc0e   :  { %3152 = vmatprep.subr.bf16.mxu0 %v3299_v0 }
 0xc11   :  { %3154 = vmatpush3.bf16.msra.mxu0 %v3153_v13 }
 0xc12   :  { %3155 = vmatprep.subr.bf16.mxu0 %v3299_v0 }
 0xc15   :  { %3157 = vmatpush3.bf16.msra.mxu0 %v3156_v16 }
 0xccb   :  { %v1539_v6 = vpop.f32.mrb[22].mxu0 }
 0xccc   :  { %v1543_v8 = vadd.f32 %v1539_v6, %v1000_v4  ;;  %v2643_v9 = vpop.f32.mrb[23].mxu0 }
 0xcce   :  { %3195 = vtanh.f32 %v1543_v8 }
 0xcd8   :  { %v3196_v50 = vpop.eup %3195 }
 0xcd9   :  { %2677 = vmatmul.mubr.f32.vlgmr.msra.gmra.mrb[22].mxu1 %v3196_v50 }
 0xdac   :  { %v1612_v19 = vpop.f32.mrb[22].mxu1 }
 0xdad   :  { %v1616_v20 = vadd.f32 %v1612_v19, %v1005_v17  ;;  %v2678_v21 = vpop.f32.mrb[23].mxu1 }
 0xdaf   :  { %3197 = vtanh.f32 %v1616_v20 }
 0xdb9   :  { %v3198_v22 = vpop.eup %3197 }
 0xdba   :  { %2712 = vmatmul.mubr.f32.vlgmr.msra.gmra.mrb[24].mxu0 %v3198_v22 }
 0xe8d   :  { %v1712_v23 = vpop.f32.mrb[24].mxu0 }
 0xe8e   :  { %v1713_v24 = vadd.f32 %v1735_v39, %v1712_v23  ;;  %v2713_v25 = vpop.f32.mrb[25].mxu0 }
 0xe90   :  { %1717 = vst.msk [vmem:[%s3956_s9] sm:$0xff] %vm1716_vm2, %v1713_v24 }
 0xe91   :  { %1722 = vsyncpa [#allocation6], 1 }
 0xe92   :  { %1723 = vsyncpa [#allocation8], 1 }
 0xe93   :  { %1724 = vsyncpa [#allocation11], 1 }

</bundles_post_ra>
